<compile_context>
chip_gen: v7x
topology: tpu7x:2x2x1
jax: 0.10.0
libtpu: 0.0.40
codegen_flags: <defaults>
</compile_context>

<pallas_src>
import math
from functools import partial

import jax
import jax.numpy as jnp
from jax.experimental import pallas as pl
from jax.experimental.pallas import tpu as pltpu


# ----------------------------- in-kernel helpers -----------------------------

def _layer_norm(x, w, b, eps=1e-12):
    # TF-style LayerNorm (eps inside the sqrt), matches the PyTorch LayerNorm.
    u = jnp.mean(x, axis=-1, keepdims=True)
    d = x - u
    s = jnp.mean(d * d, axis=-1, keepdims=True)
    return d * jax.lax.rsqrt(s + eps) * w + b


def _gelu(x, exact=True):
    if exact:
        # gelu(x) = x * 0.5 * (1 + erf(x / sqrt(2)))  -- matches the module
        return x * 0.5 * (1.0 + jax.lax.erf(x / math.sqrt(2.0)))
    # tanh approximation; used only as a lowering-compat fallback.
    c = math.sqrt(2.0 / math.pi)
    return 0.5 * x * (1.0 + jnp.tanh(c * (x + 0.044715 * x * x * x)))


# ------------------------------- fused kernel --------------------------------

def layer_kernel(x_ref, mask_ref,
                 wqkv_ref, bqkv_ref, wd_ref, bd_ref, ln1w_ref, ln1b_ref,
                 w1_ref, b1_ref, w2_ref, b2_ref, ln2w_ref, ln2b_ref,
                 o_ref, *, num_heads, head_size, ffn_chunk, exact_gelu):
    bt, seq, hidden = x_ref.shape
    cdt = wqkv_ref.dtype                          # matmul input dtype (bf16)

    x2 = x_ref[...].astype(jnp.float32).reshape(bt * seq, hidden)
    xc = x2.astype(cdt)

    mask = mask_ref[...].astype(jnp.float32)
    if mask.ndim == 2:
        mask = mask[None]                          # broadcast over batch rows

    # ---- fused QKV projection: one (H, 3H) matmul, f32 accumulation.
    # 1/sqrt(head_size) is already folded into wq / bq by the wrapper.
    qkv = jnp.dot(xc, wqkv_ref[...],
                  preferred_element_type=jnp.float32) + bqkv_ref[...]  # (Bt*S, 3H)

    # ---- per-head attention with the output projection fused into the loop.
    # No ctx VMEM scratch, no sub-128-lane masked stores: each head's context
    # is immediately contracted with the matching rows of wd into an f32
    # accumulator that already has the full hidden width.
    attn = jnp.zeros((bt * seq, hidden), jnp.float32)
    for h in range(num_heads):                     # static unroll (small nh)
        lo = h * head_size
        qh = qkv[:, lo:lo + head_size].reshape(bt, seq, head_size).astype(cdt)
        kh = qkv[:, hidden + lo:hidden + lo + head_size] \
            .reshape(bt, seq, head_size).astype(cdt)
        vh = qkv[:, 2 * hidden + lo:2 * hidden + lo + head_size] \
            .reshape(bt, seq, head_size).astype(cdt)

        # q . k^T without materializing a transpose (contract on head dim).
        scores = jnp.einsum('bqd,bkd->bqk', qh, kh,
                            preferred_element_type=jnp.float32) + mask
        m = jnp.max(scores, axis=-1, keepdims=True)
        e = jnp.exp(scores - m)
        probs = e * pl.reciprocal(jnp.sum(e, axis=-1, keepdims=True), approx=True)
        ctx_h = jnp.einsum('bqk,bkd->bqd', probs.astype(cdt), vh,
                           preferred_element_type=jnp.float32)
        attn = attn + jnp.dot(ctx_h.reshape(bt * seq, head_size).astype(cdt),
                              wd_ref[lo:lo + head_size, :],
                              preferred_element_type=jnp.float32)

    # ---- attention bias + residual + LayerNorm (f32)
    attn = _layer_norm(attn + bd_ref[...] + x2, ln1w_ref[...], ln1b_ref[...])

    # ---- Intermediate (FFN), K-tiled over the 4H dimension: the full
    # (rows, 4H) h1 is never materialized; h2 accumulates in f32.
    attn_c = attn.astype(cdt)
    inter = w1_ref.shape[1]
    h2 = jnp.zeros((bt * seq, hidden), jnp.float32)
    for lo in range(0, inter, ffn_chunk):
        hi = min(lo + ffn_chunk, inter)
        h1 = jnp.dot(attn_c, w1_ref[:, lo:hi],
                     preferred_element_type=jnp.float32) + b1_ref[:, lo:hi]
        h1 = _gelu(h1, exact=exact_gelu)
        h2 = h2 + jnp.dot(h1.astype(cdt), w2_ref[lo:hi, :],
                          preferred_element_type=jnp.float32)
    out = _layer_norm(h2 + b2_ref[...] + attn, ln2w_ref[...], ln2b_ref[...])

    o_ref[...] = out.reshape(bt, seq, hidden).astype(o_ref.dtype)


# --------------------------------- wrapper ------------------------------------

def _vmem_capacity_bytes():
    try:
        info = pltpu.get_tpu_info()
        for attr in ("vmem_capacity_bytes", "vmem_size_bytes", "vmem_bytes"):
            v = getattr(info, attr, None)
            if v:
                return int(v)
    except Exception:
        pass
    return 64 << 20          # conservative default (v7x per-core VMEM)


def _pick_block_b(B, S, fits):
    # >=2 grid steps when possible (v7x megacore + pipeline overlap), then the
    # largest divisor of B whose working set fits the VMEM budget; soft cap on
    # rows-per-step to amortize the ~600-cycle grid-step overhead.
    ub = B if B < 2 else max(1, B // 2)
    ub = min(ub, max(1, 4096 // max(S, 1)))
    bb = max(1, ub)
    while bb > 1 and (B % bb != 0 or not fits(bb)):
        bb -= 1
    return bb if B % bb == 0 else 1


def layer_forward(hidden_states, attention_mask, params, *, num_heads,
                  block_b=None, ffn_chunk=None, weight_dtype=jnp.bfloat16,
                  mask_dtype=jnp.bfloat16):
    B, S, H = hidden_states.shape
    head_size = H // num_heads
    inter = params["w1"].shape[1]
    io_dtype = hidden_states.dtype
    io_bytes = jnp.dtype(io_dtype).itemsize

    # Fold the attention scale into wq / bq; fuse QKV; cast weights once.
    scale = 1.0 / math.sqrt(head_size)
    wqkv = jnp.concatenate([params["wq"] * scale, params["wk"], params["wv"]],
                           axis=1).astype(weight_dtype)
    bqkv = jnp.concatenate([params["bq"] * scale, params["bk"], params["bv"]],
                           axis=1).astype(jnp.float32)
    wd = params["wd"].astype(weight_dtype)
    w1 = params["w1"].astype(weight_dtype)
    w2 = params["w2"].astype(weight_dtype)
    mask = attention_mask.astype(mask_dtype)       # additive mask: bf16 is plenty
    mask_is_2d = (mask.ndim == 2)

    if ffn_chunk is None:
        ffn_chunk = inter if inter <= 1024 else 1024

    const_arrays = [wqkv, bqkv, wd, params["bd"], params["attn_ln_w"],
                    params["attn_ln_b"], w1, params["b1"], w2, params["b2"],
                    params["inter_ln_w"], params["inter_ln_b"]]
    weight_bytes = sum(int(a.size) * jnp.dtype(a.dtype).itemsize for a in const_arrays)
    mask_bytes = int(mask.size) * jnp.dtype(mask.dtype).itemsize
    cap = _vmem_capacity_bytes()

    def footprint(bb):                              # rough per-step VMEM bound
        rows = bb * S
        act = rows * 4 * (H + 3 * H + H + H + ffn_chunk)   # x2,qkv,attn,h2,h1-chunk
        act += bb * S * S * 4 * 3                          # one head's scores/exp/probs
        io = 2 * 2 * rows * H * io_bytes                   # x + out blocks, dbl-buffered
        msk = mask_bytes if mask_is_2d else 2 * bb * S * S * jnp.dtype(mask_dtype).itemsize
        return weight_bytes + act + io + msk

    if block_b is None:
        block_b = _pick_block_b(B, S, lambda bb: footprint(bb) <= int(cap * 0.7))
    assert B % block_b == 0, "block_b must divide the batch"
    grid = (B // block_b,)

    vmem_limit = int(min(cap, max(int((footprint(block_b) + weight_bytes) * 1.25)
                                  + (4 << 20), 32 << 20)))

    flops = 2 * B * S * (4 * H * H + 2 * H * inter) \
        + 4 * B * num_heads * S * S * head_size
    transcendentals = B * num_heads * S * S + B * S * inter
    bytes_accessed = 2 * B * S * H * io_bytes + weight_bytes + mask_bytes
    try:
        cost = pl.CostEstimate(flops=flops, transcendentals=transcendentals,
                               bytes_accessed=bytes_accessed)
    except Exception:
        cost = None

    def run(single_buffer_consts, exact_gelu):
        if single_buffer_consts:
            def const_spec(shape):                  # resident once across the grid
                return pl.BlockSpec(shape, lambda b: (0,) * len(shape),
                                    pipeline_mode=pl.Buffered(1))
        else:
            def const_spec(shape):
                return pl.BlockSpec(shape, lambda b: (0,) * len(shape))

        x_spec = pl.BlockSpec((block_b, S, H), lambda b: (b, 0, 0))
        mask_spec = (const_spec((S, S)) if mask_is_2d
                     else pl.BlockSpec((block_b, S, S), lambda b: (b, 0, 0)))

        kernel = partial(layer_kernel, num_heads=num_heads, head_size=head_size,
                         ffn_chunk=ffn_chunk, exact_gelu=exact_gelu)
        return pl.pallas_call(
            kernel,
            out_shape=jax.ShapeDtypeStruct((B, S, H), io_dtype),
            grid=grid,
            in_specs=[
                x_spec, mask_spec,
                const_spec((H, 3 * H)), const_spec((1, 3 * H)),   # fused QKV
                const_spec((H, H)), const_spec((1, H)),           # attn dense
                const_spec((1, H)), const_spec((1, H)),           # attn LayerNorm
                const_spec((H, inter)), const_spec((1, inter)),   # FFN dense_1
                const_spec((inter, H)), const_spec((1, H)),       # FFN dense_2
                const_spec((1, H)), const_spec((1, H)),           # FFN LayerNorm
            ],
            out_specs=x_spec,
            compiler_params=pltpu.CompilerParams(
                dimension_semantics=("parallel",),
                vmem_limit_bytes=vmem_limit),
            cost_estimate=cost,
        )(hidden_states, mask,
          wqkv, bqkv, wd, params["bd"], params["attn_ln_w"], params["attn_ln_b"],
          w1, params["b1"], w2, params["b2"],
          params["inter_ln_w"], params["inter_ln_b"])

    # Compatibility ladder: prefer single-buffered constants + exact (erf) gelu;
    # fall back only if this JAX/Mosaic version rejects pl.Buffered(1) or erf.
    errs = []
    for single_buf, exact in ((True, True), (True, False), (False, True), (False, False)):
        try:
            return run(single_buf, exact)
        except Exception as e:            # noqa: BLE001 - surface first error below
            errs.append(e)
    raise errs[0]


# ---------------------------- pure-JAX reference (f32) -------------------------

def _ln_ref(x, w, b, eps=1e-12):
    u = jnp.mean(x, axis=-1, keepdims=True)
    s = jnp.mean((x - u) ** 2, axis=-1, keepdims=True)
    return w * ((x - u) / jnp.sqrt(s + eps)) + b


def _gelu_ref(x):
    return x * 0.5 * (1.0 + jax.lax.erf(x / math.sqrt(2.0)))


def layer_reference(x, mask, p, *, num_heads):
    B, S, H = x.shape
    hd = H // num_heads

    q = x @ p["wq"] + p["bq"]
    k = x @ p["wk"] + p["bk"]
    v = x @ p["wv"] + p["bv"]

    def split(t):  # (B,S,H) -> (B,nh,S,hd)
        return t.reshape(B, S, num_heads, hd).transpose(0, 2, 1, 3)

    qh, kh, vh = split(q), split(k), split(v)
    scores = jnp.einsum("bhqd,bhkd->bhqk", qh, kh) / math.sqrt(hd)
    madd = mask[None, None] if mask.ndim == 2 else mask[:, None]
    scores = scores + madd
    probs = jax.nn.softmax(scores, axis=-1)
    ctx = jnp.einsum("bhqk,bhkd->bhqd", probs, vh)
    ctx = ctx.transpose(0, 2, 1, 3).reshape(B, S, H)
    attn = ctx @ p["wd"] + p["bd"]
    attn = _ln_ref(attn + x, p["attn_ln_w"], p["attn_ln_b"])

    h1 = _gelu_ref(attn @ p["w1"] + p["b1"])
    h2 = h1 @ p["w2"] + p["b2"]
    return _ln_ref(h2 + attn, p["inter_ln_w"], p["inter_ln_b"])


# ----------------------------------- main --------------------------------------

if __name__ == "__main__":
    B, S, H = 2, 8, 32
    NUM_HEADS = 2

    key = jax.random.PRNGKey(0)
    ks = jax.random.split(key, 20)

    def w(k, shape, scale=0.02):
        return (scale * jax.random.normal(k, shape)).astype(jnp.float32)

    params = {
        "wq": w(ks[0], (H, H)), "bq": w(ks[1], (1, H)),
        "wk": w(ks[2], (H, H)), "bk": w(ks[3], (1, H)),
        "wv": w(ks[4], (H, H)), "bv": w(ks[5], (1, H)),
        "wd": w(ks[6], (H, H)), "bd": w(ks[7], (1, H)),
        "attn_ln_w": 1.0 + w(ks[8], (1, H), 0.1),
        "attn_ln_b": w(ks[9], (1, H), 0.1),
        "w1": w(ks[10], (H, 4 * H)), "b1": w(ks[11], (1, 4 * H)),
        "w2": w(ks[12], (4 * H, H)), "b2": w(ks[13], (1, H)),
        "inter_ln_w": 1.0 + w(ks[14], (1, H), 0.1),
        "inter_ln_b": w(ks[15], (1, H), 0.1),
    }

    hidden_states = jax.random.normal(ks[16], (B, S, H), dtype=jnp.float32)

    # Shared additive causal mask (0 = attend, -10000 = masked); a single (S,S)
    # array stays VMEM-resident (single-buffered) instead of a per-batch DMA.
    causal = jnp.tril(jnp.ones((S, S), jnp.float32))
    attention_mask = (1.0 - causal) * -10000.0

    out = layer_forward(hidden_states, attention_mask, params, num_heads=NUM_HEADS)
    out = jax.block_until_ready(out)

    ref = layer_reference(hidden_states, attention_mask, params, num_heads=NUM_HEADS)
    # Matmuls use bf16 inputs (f32 MXU accumulation) and the softmax denominator
    # uses the EUP approximate reciprocal; softmax/LN/residuals are f32, so a
    # bf16-appropriate tolerance vs the pure-f32 reference is expected.
    assert jnp.allclose(out, ref, atol=1e-2, rtol=1e-2), "mismatch vs reference"

    # TODO(synk): FilterLayer (torch.fft.rfft/irfft) + STFTLayer path
    # (no_filters=False) not implemented -- STFTLayer is undefined in the source
    # and FFT has no Pallas TPU primitive; this covers the no_filters=True path.
    print("KERNEL_OK")
</pallas_src>

<mosaic_0001>
module attributes {stable_mosaic.version = 11 : i64} {
  func.func @layer_kernel(%arg0: i32, %arg1: memref<1x8x32xf32, #tpu.memory_space<vmem>>, %arg2: memref<8x8xbf16, #tpu.memory_space<vmem>>, %arg3: memref<32x96xbf16, #tpu.memory_space<vmem>>, %arg4: memref<1x96xf32, #tpu.memory_space<vmem>>, %arg5: memref<32x32xbf16, #tpu.memory_space<vmem>>, %arg6: memref<1x32xf32, #tpu.memory_space<vmem>>, %arg7: memref<1x32xf32, #tpu.memory_space<vmem>>, %arg8: memref<1x32xf32, #tpu.memory_space<vmem>>, %arg9: memref<32x128xbf16, #tpu.memory_space<vmem>>, %arg10: memref<1x128xf32, #tpu.memory_space<vmem>>, %arg11: memref<128x32xbf16, #tpu.memory_space<vmem>>, %arg12: memref<1x32xf32, #tpu.memory_space<vmem>>, %arg13: memref<1x32xf32, #tpu.memory_space<vmem>>, %arg14: memref<1x32xf32, #tpu.memory_space<vmem>>, %arg15: memref<1x8x32xf32, #tpu.memory_space<vmem>>) attributes {dimension_semantics = [#tpu.dimension_semantics<parallel>], iteration_bounds = array<i64: 2>, scalar_prefetch = 0 : i64, scratch_operands = 0 : i64, tpu.core_type = #tpu.core_type<tc>, window_params = [{transform_indices = @transform_0, window_bounds = array<i64: 1, 8, 32>}, {pipeline_mode = #tpu.pipeline_mode<synchronous>, transform_indices = @transform_1, window_bounds = array<i64: 8, 8>}, {pipeline_mode = #tpu.pipeline_mode<synchronous>, transform_indices = @transform_2, window_bounds = array<i64: 32, 96>}, {pipeline_mode = #tpu.pipeline_mode<synchronous>, transform_indices = @transform_3, window_bounds = array<i64: 1, 96>}, {pipeline_mode = #tpu.pipeline_mode<synchronous>, transform_indices = @transform_4, window_bounds = array<i64: 32, 32>}, {pipeline_mode = #tpu.pipeline_mode<synchronous>, transform_indices = @transform_5, window_bounds = array<i64: 1, 32>}, {pipeline_mode = #tpu.pipeline_mode<synchronous>, transform_indices = @transform_6, window_bounds = array<i64: 1, 32>}, {pipeline_mode = #tpu.pipeline_mode<synchronous>, transform_indices = @transform_7, window_bounds = array<i64: 1, 32>}, {pipeline_mode = #tpu.pipeline_mode<synchronous>, transform_indices = @transform_8, window_bounds = array<i64: 32, 128>}, {pipeline_mode = #tpu.pipeline_mode<synchronous>, transform_indices = @transform_9, window_bounds = array<i64: 1, 128>}, {pipeline_mode = #tpu.pipeline_mode<synchronous>, transform_indices = @transform_10, window_bounds = array<i64: 128, 32>}, {pipeline_mode = #tpu.pipeline_mode<synchronous>, transform_indices = @transform_11, window_bounds = array<i64: 1, 32>}, {pipeline_mode = #tpu.pipeline_mode<synchronous>, transform_indices = @transform_12, window_bounds = array<i64: 1, 32>}, {pipeline_mode = #tpu.pipeline_mode<synchronous>, transform_indices = @transform_13, window_bounds = array<i64: 1, 32>}, {transform_indices = @transform_14, window_bounds = array<i64: 1, 8, 32>}]} {
    %c0 = arith.constant 0 : index
    %c0_0 = arith.constant 0 : index
    %c0_1 = arith.constant 0 : index
    %0 = vector.load %arg1[%c0, %c0_0, %c0_1] : memref<1x8x32xf32, #tpu.memory_space<vmem>>, vector<1x8x32xf32>
    %1 = vector.shape_cast %0 : vector<1x8x32xf32> to vector<8x32xf32>
    %2 = arith.truncf %1 : vector<8x32xf32> to vector<8x32xbf16>
    %c0_2 = arith.constant 0 : index
    %c0_3 = arith.constant 0 : index
    %3 = vector.load %arg2[%c0_2, %c0_3] : memref<8x8xbf16, #tpu.memory_space<vmem>>, vector<8x8xbf16>
    %4 = arith.extf %3 : vector<8x8xbf16> to vector<8x8xf32>
    %5 = vector.shape_cast %4 : vector<8x8xf32> to vector<1x8x8xf32>
    %c0_4 = arith.constant 0 : index
    %c0_5 = arith.constant 0 : index
    %6 = vector.load %arg3[%c0_4, %c0_5] : memref<32x96xbf16, #tpu.memory_space<vmem>>, vector<32x96xbf16>
    %cst = arith.constant dense<0.000000e+00> : vector<8x96xf32>
    %7 = tpu.matmul %2, %6, %cst {dimension_numbers = #tpu.dot_dimension_numbers<[1], [0], [0], [1], [0, 0, 1, 1], [], []>} : vector<8x32xbf16>, vector<32x96xbf16>, vector<8x96xf32> -> vector<8x96xf32>
    %c0_6 = arith.constant 0 : index
    %c0_7 = arith.constant 0 : index
    %8 = vector.load %arg4[%c0_6, %c0_7] : memref<1x96xf32, #tpu.memory_space<vmem>>, vector<1x96xf32>
    %9 = vector.broadcast %8 : vector<1x96xf32> to vector<8x96xf32>
    %10 = arith.addf %7, %9 : vector<8x96xf32>
    %cst_8 = arith.constant 0.000000e+00 : f32
    %11 = vector.broadcast %cst_8 : f32 to vector<8x32xf32>
    %12 = vector.extract_strided_slice %10 {offsets = [0, 0], sizes = [8, 16], strides = [1, 1]} : vector<8x96xf32> to vector<8x16xf32>
    %13 = vector.shape_cast %12 : vector<8x16xf32> to vector<1x8x16xf32>
    %14 = arith.truncf %13 : vector<1x8x16xf32> to vector<1x8x16xbf16>
    %15 = vector.extract_strided_slice %10 {offsets = [0, 32], sizes = [8, 16], strides = [1, 1]} : vector<8x96xf32> to vector<8x16xf32>
    %16 = vector.shape_cast %15 : vector<8x16xf32> to vector<1x8x16xf32>
    %17 = arith.truncf %16 : vector<1x8x16xf32> to vector<1x8x16xbf16>
    %18 = vector.extract_strided_slice %10 {offsets = [0, 64], sizes = [8, 16], strides = [1, 1]} : vector<8x96xf32> to vector<8x16xf32>
    %19 = vector.shape_cast %18 : vector<8x16xf32> to vector<1x8x16xf32>
    %20 = arith.truncf %19 : vector<1x8x16xf32> to vector<1x8x16xbf16>
    "tpu.trace_start"() <{level = 10 : i32, message = "bqd,bkd->bqk"}> : () -> ()
    %cst_9 = arith.constant dense<0.000000e+00> : vector<1x8x8xf32>
    %21 = tpu.matmul %14, %17, %cst_9 {dimension_numbers = #tpu.dot_dimension_numbers<[2], [2], [1], [1], [0, 0, 0, 1, 1, 1], [0], [0]>} : vector<1x8x16xbf16>, vector<1x8x16xbf16>, vector<1x8x8xf32> -> vector<1x8x8xf32>
    "tpu.trace_stop"() : () -> ()
    %22 = arith.addf %21, %5 : vector<1x8x8xf32>
    %cst_10 = arith.constant dense<0xFF800000> : vector<1x8xf32>
    %23 = vector.multi_reduction <maximumf>, %22, %cst_10 [2] : vector<1x8x8xf32> to vector<1x8xf32>
    %24 = vector.shape_cast %23 : vector<1x8xf32> to vector<1x8x1xf32>
    %25 = vector.broadcast %24 : vector<1x8x1xf32> to vector<1x8x8xf32>
    %26 = arith.subf %22, %25 : vector<1x8x8xf32>
    %27 = math.exp %26 : vector<1x8x8xf32>
    %cst_11 = arith.constant dense<0.000000e+00> : vector<1x8xf32>
    %28 = vector.multi_reduction <add>, %27, %cst_11 [2] : vector<1x8x8xf32> to vector<1x8xf32>
    %29 = vector.shape_cast %28 : vector<1x8xf32> to vector<1x8x1xf32>
    %30 = tpu.reciprocal %29 {approx = true} : vector<1x8x1xf32> -> vector<1x8x1xf32>
    %31 = vector.broadcast %30 : vector<1x8x1xf32> to vector<1x8x8xf32>
    %32 = arith.mulf %27, %31 : vector<1x8x8xf32>
    %33 = arith.truncf %32 : vector<1x8x8xf32> to vector<1x8x8xbf16>
    "tpu.trace_start"() <{level = 10 : i32, message = "bqk,bkd->bqd"}> : () -> ()
    %cst_12 = arith.constant dense<0.000000e+00> : vector<1x8x16xf32>
    %34 = tpu.matmul %33, %20, %cst_12 {dimension_numbers = #tpu.dot_dimension_numbers<[2], [1], [1], [2], [0, 0, 0, 1, 1, 2], [0], [0]>} : vector<1x8x8xbf16>, vector<1x8x16xbf16>, vector<1x8x16xf32> -> vector<1x8x16xf32>
    "tpu.trace_stop"() : () -> ()
    %35 = vector.shape_cast %34 : vector<1x8x16xf32> to vector<8x16xf32>
    %36 = arith.truncf %35 : vector<8x16xf32> to vector<8x16xbf16>
    %c0_13 = arith.constant 0 : index
    %c0_14 = arith.constant 0 : index
    %37 = vector.load %arg5[%c0_13, %c0_14] : memref<32x32xbf16, #tpu.memory_space<vmem>>, vector<16x32xbf16>
    %cst_15 = arith.constant dense<0.000000e+00> : vector<8x32xf32>
    %38 = tpu.matmul %36, %37, %cst_15 {dimension_numbers = #tpu.dot_dimension_numbers<[1], [0], [0], [1], [0, 0, 1, 1], [], []>} : vector<8x16xbf16>, vector<16x32xbf16>, vector<8x32xf32> -> vector<8x32xf32>
    %39 = arith.addf %11, %38 : vector<8x32xf32>
    %40 = vector.extract_strided_slice %10 {offsets = [0, 16], sizes = [8, 16], strides = [1, 1]} : vector<8x96xf32> to vector<8x16xf32>
    %41 = vector.shape_cast %40 : vector<8x16xf32> to vector<1x8x16xf32>
    %42 = arith.truncf %41 : vector<1x8x16xf32> to vector<1x8x16xbf16>
    %43 = vector.extract_strided_slice %10 {offsets = [0, 48], sizes = [8, 16], strides = [1, 1]} : vector<8x96xf32> to vector<8x16xf32>
    %44 = vector.shape_cast %43 : vector<8x16xf32> to vector<1x8x16xf32>
    %45 = arith.truncf %44 : vector<1x8x16xf32> to vector<1x8x16xbf16>
    %46 = vector.extract_strided_slice %10 {offsets = [0, 80], sizes = [8, 16], strides = [1, 1]} : vector<8x96xf32> to vector<8x16xf32>
    %47 = vector.shape_cast %46 : vector<8x16xf32> to vector<1x8x16xf32>
    %48 = arith.truncf %47 : vector<1x8x16xf32> to vector<1x8x16xbf16>
    "tpu.trace_start"() <{level = 10 : i32, message = "bqd,bkd->bqk"}> : () -> ()
    %cst_16 = arith.constant dense<0.000000e+00> : vector<1x8x8xf32>
    %49 = tpu.matmul %42, %45, %cst_16 {dimension_numbers = #tpu.dot_dimension_numbers<[2], [2], [1], [1], [0, 0, 0, 1, 1, 1], [0], [0]>} : vector<1x8x16xbf16>, vector<1x8x16xbf16>, vector<1x8x8xf32> -> vector<1x8x8xf32>
    "tpu.trace_stop"() : () -> ()
    %50 = arith.addf %49, %5 : vector<1x8x8xf32>
    %cst_17 = arith.constant dense<0xFF800000> : vector<1x8xf32>
    %51 = vector.multi_reduction <maximumf>, %50, %cst_17 [2] : vector<1x8x8xf32> to vector<1x8xf32>
    %52 = vector.shape_cast %51 : vector<1x8xf32> to vector<1x8x1xf32>
    %53 = vector.broadcast %52 : vector<1x8x1xf32> to vector<1x8x8xf32>
    %54 = arith.subf %50, %53 : vector<1x8x8xf32>
    %55 = math.exp %54 : vector<1x8x8xf32>
    %cst_18 = arith.constant dense<0.000000e+00> : vector<1x8xf32>
    %56 = vector.multi_reduction <add>, %55, %cst_18 [2] : vector<1x8x8xf32> to vector<1x8xf32>
    %57 = vector.shape_cast %56 : vector<1x8xf32> to vector<1x8x1xf32>
    %58 = tpu.reciprocal %57 {approx = true} : vector<1x8x1xf32> -> vector<1x8x1xf32>
    %59 = vector.broadcast %58 : vector<1x8x1xf32> to vector<1x8x8xf32>
    %60 = arith.mulf %55, %59 : vector<1x8x8xf32>
    %61 = arith.truncf %60 : vector<1x8x8xf32> to vector<1x8x8xbf16>
    "tpu.trace_start"() <{level = 10 : i32, message = "bqk,bkd->bqd"}> : () -> ()
    %cst_19 = arith.constant dense<0.000000e+00> : vector<1x8x16xf32>
    %62 = tpu.matmul %61, %48, %cst_19 {dimension_numbers = #tpu.dot_dimension_numbers<[2], [1], [1], [2], [0, 0, 0, 1, 1, 2], [0], [0]>} : vector<1x8x8xbf16>, vector<1x8x16xbf16>, vector<1x8x16xf32> -> vector<1x8x16xf32>
    "tpu.trace_stop"() : () -> ()
    %63 = vector.shape_cast %62 : vector<1x8x16xf32> to vector<8x16xf32>
    %64 = arith.truncf %63 : vector<8x16xf32> to vector<8x16xbf16>
    %c16 = arith.constant 16 : index
    %c0_20 = arith.constant 0 : index
    %65 = vector.load %arg5[%c16, %c0_20] : memref<32x32xbf16, #tpu.memory_space<vmem>>, vector<16x32xbf16>
    %cst_21 = arith.constant dense<0.000000e+00> : vector<8x32xf32>
    %66 = tpu.matmul %64, %65, %cst_21 {dimension_numbers = #tpu.dot_dimension_numbers<[1], [0], [0], [1], [0, 0, 1, 1], [], []>} : vector<8x16xbf16>, vector<16x32xbf16>, vector<8x32xf32> -> vector<8x32xf32>
    %67 = arith.addf %39, %66 : vector<8x32xf32>
    %c0_22 = arith.constant 0 : index
    %c0_23 = arith.constant 0 : index
    %68 = vector.load %arg6[%c0_22, %c0_23] : memref<1x32xf32, #tpu.memory_space<vmem>>, vector<1x32xf32>
    %69 = vector.broadcast %68 : vector<1x32xf32> to vector<8x32xf32>
    %70 = arith.addf %67, %69 : vector<8x32xf32>
    %71 = arith.addf %70, %1 : vector<8x32xf32>
    %c0_24 = arith.constant 0 : index
    %c0_25 = arith.constant 0 : index
    %72 = vector.load %arg7[%c0_24, %c0_25] : memref<1x32xf32, #tpu.memory_space<vmem>>, vector<1x32xf32>
    %c0_26 = arith.constant 0 : index
    %c0_27 = arith.constant 0 : index
    %73 = vector.load %arg8[%c0_26, %c0_27] : memref<1x32xf32, #tpu.memory_space<vmem>>, vector<1x32xf32>
    %cst_28 = arith.constant dense<0.000000e+00> : vector<8xf32>
    %74 = vector.multi_reduction <add>, %71, %cst_28 [1] : vector<8x32xf32> to vector<8xf32>
    %75 = vector.shape_cast %74 : vector<8xf32> to vector<8x1xf32>
    %cst_29 = arith.constant 3.200000e+01 : f32
    %76 = vector.broadcast %cst_29 : f32 to vector<8x1xf32>
    %77 = arith.divf %75, %76 : vector<8x1xf32>
    %78 = vector.broadcast %77 : vector<8x1xf32> to vector<8x32xf32>
    %79 = arith.subf %71, %78 : vector<8x32xf32>
    %80 = arith.mulf %79, %79 : vector<8x32xf32>
    %cst_30 = arith.constant dense<0.000000e+00> : vector<8xf32>
    %81 = vector.multi_reduction <add>, %80, %cst_30 [1] : vector<8x32xf32> to vector<8xf32>
    %82 = vector.shape_cast %81 : vector<8xf32> to vector<8x1xf32>
    %cst_31 = arith.constant 3.200000e+01 : f32
    %83 = vector.broadcast %cst_31 : f32 to vector<8x1xf32>
    %84 = arith.divf %82, %83 : vector<8x1xf32>
    %cst_32 = arith.constant 9.99999996E-13 : f32
    %85 = vector.broadcast %cst_32 : f32 to vector<8x1xf32>
    %86 = arith.addf %84, %85 : vector<8x1xf32>
    %87 = math.rsqrt %86 : vector<8x1xf32>
    %88 = vector.broadcast %87 : vector<8x1xf32> to vector<8x32xf32>
    %89 = arith.mulf %79, %88 : vector<8x32xf32>
    %90 = vector.broadcast %72 : vector<1x32xf32> to vector<8x32xf32>
    %91 = arith.mulf %89, %90 : vector<8x32xf32>
    %92 = vector.broadcast %73 : vector<1x32xf32> to vector<8x32xf32>
    %93 = arith.addf %91, %92 : vector<8x32xf32>
    %94 = arith.truncf %93 : vector<8x32xf32> to vector<8x32xbf16>
    %cst_33 = arith.constant 0.000000e+00 : f32
    %95 = vector.broadcast %cst_33 : f32 to vector<8x32xf32>
    %c0_34 = arith.constant 0 : index
    %c0_35 = arith.constant 0 : index
    %96 = vector.load %arg9[%c0_34, %c0_35] : memref<32x128xbf16, #tpu.memory_space<vmem>>, vector<32x128xbf16>
    %cst_36 = arith.constant dense<0.000000e+00> : vector<8x128xf32>
    %97 = tpu.matmul %94, %96, %cst_36 {dimension_numbers = #tpu.dot_dimension_numbers<[1], [0], [0], [1], [0, 0, 1, 1], [], []>} : vector<8x32xbf16>, vector<32x128xbf16>, vector<8x128xf32> -> vector<8x128xf32>
    %c0_37 = arith.constant 0 : index
    %c0_38 = arith.constant 0 : index
    %98 = vector.load %arg10[%c0_37, %c0_38] : memref<1x128xf32, #tpu.memory_space<vmem>>, vector<1x128xf32>
    %99 = vector.broadcast %98 : vector<1x128xf32> to vector<8x128xf32>
    %100 = arith.addf %97, %99 : vector<8x128xf32>
    %cst_39 = arith.constant 5.000000e-01 : f32
    %101 = vector.broadcast %cst_39 : f32 to vector<8x128xf32>
    %102 = arith.mulf %100, %101 : vector<8x128xf32>
    %cst_40 = arith.constant 1.41421354 : f32
    %103 = vector.broadcast %cst_40 : f32 to vector<8x128xf32>
    %104 = arith.divf %100, %103 : vector<8x128xf32>
    %105 = math.erf %104 : vector<8x128xf32>
    %cst_41 = arith.constant 1.000000e+00 : f32
    %106 = vector.broadcast %cst_41 : f32 to vector<8x128xf32>
    %107 = arith.addf %106, %105 : vector<8x128xf32>
    %108 = arith.mulf %102, %107 : vector<8x128xf32>
    %109 = arith.truncf %108 : vector<8x128xf32> to vector<8x128xbf16>
    %c0_42 = arith.constant 0 : index
    %c0_43 = arith.constant 0 : index
    %110 = vector.load %arg11[%c0_42, %c0_43] : memref<128x32xbf16, #tpu.memory_space<vmem>>, vector<128x32xbf16>
    %cst_44 = arith.constant dense<0.000000e+00> : vector<8x32xf32>
    %111 = tpu.matmul %109, %110, %cst_44 {dimension_numbers = #tpu.dot_dimension_numbers<[1], [0], [0], [1], [0, 0, 1, 1], [], []>} : vector<8x128xbf16>, vector<128x32xbf16>, vector<8x32xf32> -> vector<8x32xf32>
    %112 = arith.addf %95, %111 : vector<8x32xf32>
    %c0_45 = arith.constant 0 : index
    %c0_46 = arith.constant 0 : index
    %113 = vector.load %arg12[%c0_45, %c0_46] : memref<1x32xf32, #tpu.memory_space<vmem>>, vector<1x32xf32>
    %114 = vector.broadcast %113 : vector<1x32xf32> to vector<8x32xf32>
    %115 = arith.addf %112, %114 : vector<8x32xf32>
    %116 = arith.addf %115, %93 : vector<8x32xf32>
    %c0_47 = arith.constant 0 : index
    %c0_48 = arith.constant 0 : index
    %117 = vector.load %arg13[%c0_47, %c0_48] : memref<1x32xf32, #tpu.memory_space<vmem>>, vector<1x32xf32>
    %c0_49 = arith.constant 0 : index
    %c0_50 = arith.constant 0 : index
    %118 = vector.load %arg14[%c0_49, %c0_50] : memref<1x32xf32, #tpu.memory_space<vmem>>, vector<1x32xf32>
    %cst_51 = arith.constant dense<0.000000e+00> : vector<8xf32>
    %119 = vector.multi_reduction <add>, %116, %cst_51 [1] : vector<8x32xf32> to vector<8xf32>
    %120 = vector.shape_cast %119 : vector<8xf32> to vector<8x1xf32>
    %cst_52 = arith.constant 3.200000e+01 : f32
    %121 = vector.broadcast %cst_52 : f32 to vector<8x1xf32>
    %122 = arith.divf %120, %121 : vector<8x1xf32>
    %123 = vector.broadcast %122 : vector<8x1xf32> to vector<8x32xf32>
    %124 = arith.subf %116, %123 : vector<8x32xf32>
    %125 = arith.mulf %124, %124 : vector<8x32xf32>
    %cst_53 = arith.constant dense<0.000000e+00> : vector<8xf32>
    %126 = vector.multi_reduction <add>, %125, %cst_53 [1] : vector<8x32xf32> to vector<8xf32>
    %127 = vector.shape_cast %126 : vector<8xf32> to vector<8x1xf32>
    %cst_54 = arith.constant 3.200000e+01 : f32
    %128 = vector.broadcast %cst_54 : f32 to vector<8x1xf32>
    %129 = arith.divf %127, %128 : vector<8x1xf32>
    %cst_55 = arith.constant 9.99999996E-13 : f32
    %130 = vector.broadcast %cst_55 : f32 to vector<8x1xf32>
    %131 = arith.addf %129, %130 : vector<8x1xf32>
    %132 = math.rsqrt %131 : vector<8x1xf32>
    %133 = vector.broadcast %132 : vector<8x1xf32> to vector<8x32xf32>
    %134 = arith.mulf %124, %133 : vector<8x32xf32>
    %135 = vector.broadcast %117 : vector<1x32xf32> to vector<8x32xf32>
    %136 = arith.mulf %134, %135 : vector<8x32xf32>
    %137 = vector.broadcast %118 : vector<1x32xf32> to vector<8x32xf32>
    %138 = arith.addf %136, %137 : vector<8x32xf32>
    %139 = vector.shape_cast %138 : vector<8x32xf32> to vector<1x8x32xf32>
    %c0_56 = arith.constant 0 : index
    %c0_57 = arith.constant 0 : index
    %c0_58 = arith.constant 0 : index
    %140 = vector.load %arg15[%c0_56, %c0_57, %c0_58] : memref<1x8x32xf32, #tpu.memory_space<vmem>>, vector<1x8x32xf32>
    tpu.vector_store %arg15[%c0_56, %c0_57, %c0_58], %139 {strides = array<i32>} : memref<1x8x32xf32, #tpu.memory_space<vmem>>, vector<1x8x32xf32>,
    return
  }
  func.func @transform_0(%arg0: i32) -> (i32, i32, i32) {
    %c0_i32 = arith.constant 0 : i32
    %c0_i32_0 = arith.constant 0 : i32
    %c0_i32_1 = arith.constant 0 : i32
    return %arg0, %c0_i32, %c0_i32_0 : i32, i32, i32
  }
  func.func @transform_1(%arg0: i32) -> (i32, i32) {
    %c0_i32 = arith.constant 0 : i32
    %c0_i32_0 = arith.constant 0 : i32
    %c0_i32_1 = arith.constant 0 : i32
    return %c0_i32, %c0_i32_0 : i32, i32
  }
  func.func @transform_2(%arg0: i32) -> (i32, i32) {
    %c0_i32 = arith.constant 0 : i32
    %c0_i32_0 = arith.constant 0 : i32
    %c0_i32_1 = arith.constant 0 : i32
    return %c0_i32, %c0_i32_0 : i32, i32
  }
  func.func @transform_3(%arg0: i32) -> (i32, i32) {
    %c0_i32 = arith.constant 0 : i32
    %c0_i32_0 = arith.constant 0 : i32
    %c0_i32_1 = arith.constant 0 : i32
    return %c0_i32, %c0_i32_0 : i32, i32
  }
  func.func @transform_4(%arg0: i32) -> (i32, i32) {
    %c0_i32 = arith.constant 0 : i32
    %c0_i32_0 = arith.constant 0 : i32
    %c0_i32_1 = arith.constant 0 : i32
    return %c0_i32, %c0_i32_0 : i32, i32
  }
  func.func @transform_5(%arg0: i32) -> (i32, i32) {
    %c0_i32 = arith.constant 0 : i32
    %c0_i32_0 = arith.constant 0 : i32
    %c0_i32_1 = arith.constant 0 : i32
    return %c0_i32, %c0_i32_0 : i32, i32
  }
  func.func @transform_6(%arg0: i32) -> (i32, i32) {
    %c0_i32 = arith.constant 0 : i32
    %c0_i32_0 = arith.constant 0 : i32
    %c0_i32_1 = arith.constant 0 : i32
    return %c0_i32, %c0_i32_0 : i32, i32
  }
  func.func @transform_7(%arg0: i32) -> (i32, i32) {
    %c0_i32 = arith.constant 0 : i32
    %c0_i32_0 = arith.constant 0 : i32
    %c0_i32_1 = arith.constant 0 : i32
    return %c0_i32, %c0_i32_0 : i32, i32
  }
  func.func @transform_8(%arg0: i32) -> (i32, i32) {
    %c0_i32 = arith.constant 0 : i32
    %c0_i32_0 = arith.constant 0 : i32
    %c0_i32_1 = arith.constant 0 : i32
    return %c0_i32, %c0_i32_0 : i32, i32
  }
  func.func @transform_9(%arg0: i32) -> (i32, i32) {
    %c0_i32 = arith.constant 0 : i32
    %c0_i32_0 = arith.constant 0 : i32
    %c0_i32_1 = arith.constant 0 : i32
    return %c0_i32, %c0_i32_0 : i32, i32
  }
  func.func @transform_10(%arg0: i32) -> (i32, i32) {
    %c0_i32 = arith.constant 0 : i32
    %c0_i32_0 = arith.constant 0 : i32
    %c0_i32_1 = arith.constant 0 : i32
    return %c0_i32, %c0_i32_0 : i32, i32
  }
  func.func @transform_11(%arg0: i32) -> (i32, i32) {
    %c0_i32 = arith.constant 0 : i32
    %c0_i32_0 = arith.constant 0 : i32
    %c0_i32_1 = arith.constant 0 : i32
    return %c0_i32, %c0_i32_0 : i32, i32
  }
  func.func @transform_12(%arg0: i32) -> (i32, i32) {
    %c0_i32 = arith.constant 0 : i32
    %c0_i32_0 = arith.constant 0 : i32
    %c0_i32_1 = arith.constant 0 : i32
    return %c0_i32, %c0_i32_0 : i32, i32
  }
  func.func @transform_13(%arg0: i32) -> (i32, i32) {
    %c0_i32 = arith.constant 0 : i32
    %c0_i32_0 = arith.constant 0 : i32
    %c0_i32_1 = arith.constant 0 : i32
    return %c0_i32, %c0_i32_0 : i32, i32
  }
  func.func @transform_14(%arg0: i32) -> (i32, i32, i32) {
    %c0_i32 = arith.constant 0 : i32
    %c0_i32_0 = arith.constant 0 : i32
    %c0_i32_1 = arith.constant 0 : i32
    return %arg0, %c0_i32, %c0_i32_0 : i32, i32, i32
  }
}

module attributes {stable_mosaic.version = 11 : i64} {
  func.func @layer_kernel(%arg0: i32, %arg1: memref<1x8x32xf32, #tpu.memory_space<vmem>>, %arg2: memref<8x8xbf16, #tpu.memory_space<vmem>>, %arg3: memref<32x96xbf16, #tpu.memory_space<vmem>>, %arg4: memref<1x96xf32, #tpu.memory_space<vmem>>, %arg5: memref<32x32xbf16, #tpu.memory_space<vmem>>, %arg6: memref<1x32xf32, #tpu.memory_space<vmem>>, %arg7: memref<1x32xf32, #tpu.memory_space<vmem>>, %arg8: memref<1x32xf32, #tpu.memory_space<vmem>>, %arg9: memref<32x128xbf16, #tpu.memory_space<vmem>>, %arg10: memref<1x128xf32, #tpu.memory_space<vmem>>, %arg11: memref<128x32xbf16, #tpu.memory_space<vmem>>, %arg12: memref<1x32xf32, #tpu.memory_space<vmem>>, %arg13: memref<1x32xf32, #tpu.memory_space<vmem>>, %arg14: memref<1x32xf32, #tpu.memory_space<vmem>>, %arg15: memref<1x8x32xf32, #tpu.memory_space<vmem>>) attributes {dimension_semantics = [#tpu.dimension_semantics<parallel>], iteration_bounds = array<i64: 2>, scalar_prefetch = 0 : i64, scratch_operands = 0 : i64, tpu.core_type = #tpu.core_type<tc>, window_params = [{transform_indices = @transform_0, window_bounds = array<i64: 1, 8, 32>}, {pipeline_mode = #tpu.pipeline_mode<synchronous>, transform_indices = @transform_1, window_bounds = array<i64: 8, 8>}, {pipeline_mode = #tpu.pipeline_mode<synchronous>, transform_indices = @transform_2, window_bounds = array<i64: 32, 96>}, {pipeline_mode = #tpu.pipeline_mode<synchronous>, transform_indices = @transform_3, window_bounds = array<i64: 1, 96>}, {pipeline_mode = #tpu.pipeline_mode<synchronous>, transform_indices = @transform_4, window_bounds = array<i64: 32, 32>}, {pipeline_mode = #tpu.pipeline_mode<synchronous>, transform_indices = @transform_5, window_bounds = array<i64: 1, 32>}, {pipeline_mode = #tpu.pipeline_mode<synchronous>, transform_indices = @transform_6, window_bounds = array<i64: 1, 32>}, {pipeline_mode = #tpu.pipeline_mode<synchronous>, transform_indices = @transform_7, window_bounds = array<i64: 1, 32>}, {pipeline_mode = #tpu.pipeline_mode<synchronous>, transform_indices = @transform_8, window_bounds = array<i64: 32, 128>}, {pipeline_mode = #tpu.pipeline_mode<synchronous>, transform_indices = @transform_9, window_bounds = array<i64: 1, 128>}, {pipeline_mode = #tpu.pipeline_mode<synchronous>, transform_indices = @transform_10, window_bounds = array<i64: 128, 32>}, {pipeline_mode = #tpu.pipeline_mode<synchronous>, transform_indices = @transform_11, window_bounds = array<i64: 1, 32>}, {pipeline_mode = #tpu.pipeline_mode<synchronous>, transform_indices = @transform_12, window_bounds = array<i64: 1, 32>}, {pipeline_mode = #tpu.pipeline_mode<synchronous>, transform_indices = @transform_13, window_bounds = array<i64: 1, 32>}, {transform_indices = @transform_14, window_bounds = array<i64: 1, 8, 32>}]} {
    %c0 = arith.constant 0 : index
    %c0_0 = arith.constant 0 : index
    %c0_1 = arith.constant 0 : index
    %0 = vector.load %arg1[%c0, %c0_0, %c0_1] : memref<1x8x32xf32, #tpu.memory_space<vmem>>, vector<1x8x32xf32>
    %1 = vector.shape_cast %0 : vector<1x8x32xf32> to vector<8x32xf32>
    %2 = arith.truncf %1 : vector<8x32xf32> to vector<8x32xbf16>
    %c0_2 = arith.constant 0 : index
    %c0_3 = arith.constant 0 : index
    %3 = vector.load %arg2[%c0_2, %c0_3] : memref<8x8xbf16, #tpu.memory_space<vmem>>, vector<8x8xbf16>
    %4 = arith.extf %3 : vector<8x8xbf16> to vector<8x8xf32>
    %5 = vector.shape_cast %4 : vector<8x8xf32> to vector<1x8x8xf32>
    %c0_4 = arith.constant 0 : index
    %c0_5 = arith.constant 0 : index
    %6 = vector.load %arg3[%c0_4, %c0_5] : memref<32x96xbf16, #tpu.memory_space<vmem>>, vector<32x96xbf16>
    %cst = arith.constant dense<0.000000e+00> : vector<8x96xf32>
    %7 = tpu.matmul %2, %6, %cst {dimension_numbers = #tpu.dot_dimension_numbers<[1], [0], [0], [1], [0, 0, 1, 1], [], []>} : vector<8x32xbf16>, vector<32x96xbf16>, vector<8x96xf32> -> vector<8x96xf32>
    %c0_6 = arith.constant 0 : index
    %c0_7 = arith.constant 0 : index
    %8 = vector.load %arg4[%c0_6, %c0_7] : memref<1x96xf32, #tpu.memory_space<vmem>>, vector<1x96xf32>
    %9 = vector.broadcast %8 : vector<1x96xf32> to vector<8x96xf32>
    %10 = arith.addf %7, %9 : vector<8x96xf32>
    %cst_8 = arith.constant 0.000000e+00 : f32
    %11 = vector.broadcast %cst_8 : f32 to vector<8x32xf32>
    %12 = vector.extract_strided_slice %10 {offsets = [0, 0], sizes = [8, 16], strides = [1, 1]} : vector<8x96xf32> to vector<8x16xf32>
    %13 = vector.shape_cast %12 : vector<8x16xf32> to vector<1x8x16xf32>
    %14 = arith.truncf %13 : vector<1x8x16xf32> to vector<1x8x16xbf16>
    %15 = vector.extract_strided_slice %10 {offsets = [0, 32], sizes = [8, 16], strides = [1, 1]} : vector<8x96xf32> to vector<8x16xf32>
    %16 = vector.shape_cast %15 : vector<8x16xf32> to vector<1x8x16xf32>
    %17 = arith.truncf %16 : vector<1x8x16xf32> to vector<1x8x16xbf16>
    %18 = vector.extract_strided_slice %10 {offsets = [0, 64], sizes = [8, 16], strides = [1, 1]} : vector<8x96xf32> to vector<8x16xf32>
    %19 = vector.shape_cast %18 : vector<8x16xf32> to vector<1x8x16xf32>
    %20 = arith.truncf %19 : vector<1x8x16xf32> to vector<1x8x16xbf16>
    "tpu.trace_start"() <{level = 10 : i32, message = "bqd,bkd->bqk"}> : () -> ()
    %cst_9 = arith.constant dense<0.000000e+00> : vector<1x8x8xf32>
    %21 = tpu.matmul %14, %17, %cst_9 {dimension_numbers = #tpu.dot_dimension_numbers<[2], [2], [1], [1], [0, 0, 0, 1, 1, 1], [0], [0]>} : vector<1x8x16xbf16>, vector<1x8x16xbf16>, vector<1x8x8xf32> -> vector<1x8x8xf32>
    "tpu.trace_stop"() : () -> ()
    %22 = arith.addf %21, %5 : vector<1x8x8xf32>
    %cst_10 = arith.constant dense<0xFF800000> : vector<1x8xf32>
    %23 = vector.multi_reduction <maximumf>, %22, %cst_10 [2] : vector<1x8x8xf32> to vector<1x8xf32>
    %24 = vector.shape_cast %23 : vector<1x8xf32> to vector<1x8x1xf32>
    %25 = vector.broadcast %24 : vector<1x8x1xf32> to vector<1x8x8xf32>
    %26 = arith.subf %22, %25 : vector<1x8x8xf32>
    %27 = math.exp %26 : vector<1x8x8xf32>
    %cst_11 = arith.constant dense<0.000000e+00> : vector<1x8xf32>
    %28 = vector.multi_reduction <add>, %27, %cst_11 [2] : vector<1x8x8xf32> to vector<1x8xf32>
    %29 = vector.shape_cast %28 : vector<1x8xf32> to vector<1x8x1xf32>
    %30 = tpu.reciprocal %29 {approx = true} : vector<1x8x1xf32> -> vector<1x8x1xf32>
    %31 = vector.broadcast %30 : vector<1x8x1xf32> to vector<1x8x8xf32>
    %32 = arith.mulf %27, %31 : vector<1x8x8xf32>
    %33 = arith.truncf %32 : vector<1x8x8xf32> to vector<1x8x8xbf16>
    "tpu.trace_start"() <{level = 10 : i32, message = "bqk,bkd->bqd"}> : () -> ()
    %cst_12 = arith.constant dense<0.000000e+00> : vector<1x8x16xf32>
    %34 = tpu.matmul %33, %20, %cst_12 {dimension_numbers = #tpu.dot_dimension_numbers<[2], [1], [1], [2], [0, 0, 0, 1, 1, 2], [0], [0]>} : vector<1x8x8xbf16>, vector<1x8x16xbf16>, vector<1x8x16xf32> -> vector<1x8x16xf32>
    "tpu.trace_stop"() : () -> ()
    %35 = vector.shape_cast %34 : vector<1x8x16xf32> to vector<8x16xf32>
    %36 = arith.truncf %35 : vector<8x16xf32> to vector<8x16xbf16>
    %c0_13 = arith.constant 0 : index
    %c0_14 = arith.constant 0 : index
    %37 = vector.load %arg5[%c0_13, %c0_14] : memref<32x32xbf16, #tpu.memory_space<vmem>>, vector<16x32xbf16>
    %cst_15 = arith.constant dense<0.000000e+00> : vector<8x32xf32>
    %38 = tpu.matmul %36, %37, %cst_15 {dimension_numbers = #tpu.dot_dimension_numbers<[1], [0], [0], [1], [0, 0, 1, 1], [], []>} : vector<8x16xbf16>, vector<16x32xbf16>, vector<8x32xf32> -> vector<8x32xf32>
    %39 = arith.addf %11, %38 : vector<8x32xf32>
    %40 = vector.extract_strided_slice %10 {offsets = [0, 16], sizes = [8, 16], strides = [1, 1]} : vector<8x96xf32> to vector<8x16xf32>
    %41 = vector.shape_cast %40 : vector<8x16xf32> to vector<1x8x16xf32>
    %42 = arith.truncf %41 : vector<1x8x16xf32> to vector<1x8x16xbf16>
    %43 = vector.extract_strided_slice %10 {offsets = [0, 48], sizes = [8, 16], strides = [1, 1]} : vector<8x96xf32> to vector<8x16xf32>
    %44 = vector.shape_cast %43 : vector<8x16xf32> to vector<1x8x16xf32>
    %45 = arith.truncf %44 : vector<1x8x16xf32> to vector<1x8x16xbf16>
    %46 = vector.extract_strided_slice %10 {offsets = [0, 80], sizes = [8, 16], strides = [1, 1]} : vector<8x96xf32> to vector<8x16xf32>
    %47 = vector.shape_cast %46 : vector<8x16xf32> to vector<1x8x16xf32>
    %48 = arith.truncf %47 : vector<1x8x16xf32> to vector<1x8x16xbf16>
    "tpu.trace_start"() <{level = 10 : i32, message = "bqd,bkd->bqk"}> : () -> ()
    %cst_16 = arith.constant dense<0.000000e+00> : vector<1x8x8xf32>
    %49 = tpu.matmul %42, %45, %cst_16 {dimension_numbers = #tpu.dot_dimension_numbers<[2], [2], [1], [1], [0, 0, 0, 1, 1, 1], [0], [0]>} : vector<1x8x16xbf16>, vector<1x8x16xbf16>, vector<1x8x8xf32> -> vector<1x8x8xf32>
    "tpu.trace_stop"() : () -> ()
    %50 = arith.addf %49, %5 : vector<1x8x8xf32>
    %cst_17 = arith.constant dense<0xFF800000> : vector<1x8xf32>
    %51 = vector.multi_reduction <maximumf>, %50, %cst_17 [2] : vector<1x8x8xf32> to vector<1x8xf32>
    %52 = vector.shape_cast %51 : vector<1x8xf32> to vector<1x8x1xf32>
    %53 = vector.broadcast %52 : vector<1x8x1xf32> to vector<1x8x8xf32>
    %54 = arith.subf %50, %53 : vector<1x8x8xf32>
    %55 = math.exp %54 : vector<1x8x8xf32>
    %cst_18 = arith.constant dense<0.000000e+00> : vector<1x8xf32>
    %56 = vector.multi_reduction <add>, %55, %cst_18 [2] : vector<1x8x8xf32> to vector<1x8xf32>
    %57 = vector.shape_cast %56 : vector<1x8xf32> to vector<1x8x1xf32>
    %58 = tpu.reciprocal %57 {approx = true} : vector<1x8x1xf32> -> vector<1x8x1xf32>
    %59 = vector.broadcast %58 : vector<1x8x1xf32> to vector<1x8x8xf32>
    %60 = arith.mulf %55, %59 : vector<1x8x8xf32>
    %61 = arith.truncf %60 : vector<1x8x8xf32> to vector<1x8x8xbf16>
    "tpu.trace_start"() <{level = 10 : i32, message = "bqk,bkd->bqd"}> : () -> ()
    %cst_19 = arith.constant dense<0.000000e+00> : vector<1x8x16xf32>
    %62 = tpu.matmul %61, %48, %cst_19 {dimension_numbers = #tpu.dot_dimension_numbers<[2], [1], [1], [2], [0, 0, 0, 1, 1, 2], [0], [0]>} : vector<1x8x8xbf16>, vector<1x8x16xbf16>, vector<1x8x16xf32> -> vector<1x8x16xf32>
    "tpu.trace_stop"() : () -> ()
    %63 = vector.shape_cast %62 : vector<1x8x16xf32> to vector<8x16xf32>
    %64 = arith.truncf %63 : vector<8x16xf32> to vector<8x16xbf16>
    %c16 = arith.constant 16 : index
    %c0_20 = arith.constant 0 : index
    %65 = vector.load %arg5[%c16, %c0_20] : memref<32x32xbf16, #tpu.memory_space<vmem>>, vector<16x32xbf16>
    %cst_21 = arith.constant dense<0.000000e+00> : vector<8x32xf32>
    %66 = tpu.matmul %64, %65, %cst_21 {dimension_numbers = #tpu.dot_dimension_numbers<[1], [0], [0], [1], [0, 0, 1, 1], [], []>} : vector<8x16xbf16>, vector<16x32xbf16>, vector<8x32xf32> -> vector<8x32xf32>
    %67 = arith.addf %39, %66 : vector<8x32xf32>
    %c0_22 = arith.constant 0 : index
    %c0_23 = arith.constant 0 : index
    %68 = vector.load %arg6[%c0_22, %c0_23] : memref<1x32xf32, #tpu.memory_space<vmem>>, vector<1x32xf32>
    %69 = vector.broadcast %68 : vector<1x32xf32> to vector<8x32xf32>
    %70 = arith.addf %67, %69 : vector<8x32xf32>
    %71 = arith.addf %70, %1 : vector<8x32xf32>
    %c0_24 = arith.constant 0 : index
    %c0_25 = arith.constant 0 : index
    %72 = vector.load %arg7[%c0_24, %c0_25] : memref<1x32xf32, #tpu.memory_space<vmem>>, vector<1x32xf32>
    %c0_26 = arith.constant 0 : index
    %c0_27 = arith.constant 0 : index
    %73 = vector.load %arg8[%c0_26, %c0_27] : memref<1x32xf32, #tpu.memory_space<vmem>>, vector<1x32xf32>
    %cst_28 = arith.constant dense<0.000000e+00> : vector<8xf32>
    %74 = vector.multi_reduction <add>, %71, %cst_28 [1] : vector<8x32xf32> to vector<8xf32>
    %75 = vector.shape_cast %74 : vector<8xf32> to vector<8x1xf32>
    %cst_29 = arith.constant 3.200000e+01 : f32
    %76 = vector.broadcast %cst_29 : f32 to vector<8x1xf32>
    %77 = arith.divf %75, %76 : vector<8x1xf32>
    %78 = vector.broadcast %77 : vector<8x1xf32> to vector<8x32xf32>
    %79 = arith.subf %71, %78 : vector<8x32xf32>
    %80 = arith.mulf %79, %79 : vector<8x32xf32>
    %cst_30 = arith.constant dense<0.000000e+00> : vector<8xf32>
    %81 = vector.multi_reduction <add>, %80, %cst_30 [1] : vector<8x32xf32> to vector<8xf32>
    %82 = vector.shape_cast %81 : vector<8xf32> to vector<8x1xf32>
    %cst_31 = arith.constant 3.200000e+01 : f32
    %83 = vector.broadcast %cst_31 : f32 to vector<8x1xf32>
    %84 = arith.divf %82, %83 : vector<8x1xf32>
    %cst_32 = arith.constant 9.99999996E-13 : f32
    %85 = vector.broadcast %cst_32 : f32 to vector<8x1xf32>
    %86 = arith.addf %84, %85 : vector<8x1xf32>
    %87 = math.rsqrt %86 : vector<8x1xf32>
    %88 = vector.broadcast %87 : vector<8x1xf32> to vector<8x32xf32>
    %89 = arith.mulf %79, %88 : vector<8x32xf32>
    %90 = vector.broadcast %72 : vector<1x32xf32> to vector<8x32xf32>
    %91 = arith.mulf %89, %90 : vector<8x32xf32>
    %92 = vector.broadcast %73 : vector<1x32xf32> to vector<8x32xf32>
    %93 = arith.addf %91, %92 : vector<8x32xf32>
    %94 = arith.truncf %93 : vector<8x32xf32> to vector<8x32xbf16>
    %cst_33 = arith.constant 0.000000e+00 : f32
    %95 = vector.broadcast %cst_33 : f32 to vector<8x32xf32>
    %c0_34 = arith.constant 0 : index
    %c0_35 = arith.constant 0 : index
    %96 = vector.load %arg9[%c0_34, %c0_35] : memref<32x128xbf16, #tpu.memory_space<vmem>>, vector<32x128xbf16>
    %cst_36 = arith.constant dense<0.000000e+00> : vector<8x128xf32>
    %97 = tpu.matmul %94, %96, %cst_36 {dimension_numbers = #tpu.dot_dimension_numbers<[1], [0], [0], [1], [0, 0, 1, 1], [], []>} : vector<8x32xbf16>, vector<32x128xbf16>, vector<8x128xf32> -> vector<8x128xf32>
    %c0_37 = arith.constant 0 : index
    %c0_38 = arith.constant 0 : index
    %98 = vector.load %arg10[%c0_37, %c0_38] : memref<1x128xf32, #tpu.memory_space<vmem>>, vector<1x128xf32>
    %99 = vector.broadcast %98 : vector<1x128xf32> to vector<8x128xf32>
    %100 = arith.addf %97, %99 : vector<8x128xf32>
    %cst_39 = arith.constant 5.000000e-01 : f32
    %101 = vector.broadcast %cst_39 : f32 to vector<8x128xf32>
    %102 = arith.mulf %101, %100 : vector<8x128xf32>
    %cst_40 = arith.constant 4.471500e-02 : f32
    %103 = vector.broadcast %cst_40 : f32 to vector<8x128xf32>
    %104 = arith.mulf %103, %100 : vector<8x128xf32>
    %105 = arith.mulf %104, %100 : vector<8x128xf32>
    %106 = arith.mulf %105, %100 : vector<8x128xf32>
    %107 = arith.addf %100, %106 : vector<8x128xf32>
    %cst_41 = arith.constant 0.797884583 : f32
    %108 = vector.broadcast %cst_41 : f32 to vector<8x128xf32>
    %109 = arith.mulf %108, %107 : vector<8x128xf32>
    %110 = math.tanh %109 : vector<8x128xf32>
    %cst_42 = arith.constant 1.000000e+00 : f32
    %111 = vector.broadcast %cst_42 : f32 to vector<8x128xf32>
    %112 = arith.addf %111, %110 : vector<8x128xf32>
    %113 = arith.mulf %102, %112 : vector<8x128xf32>
    %114 = arith.truncf %113 : vector<8x128xf32> to vector<8x128xbf16>
    %c0_43 = arith.constant 0 : index
    %c0_44 = arith.constant 0 : index
    %115 = vector.load %arg11[%c0_43, %c0_44] : memref<128x32xbf16, #tpu.memory_space<vmem>>, vector<128x32xbf16>
    %cst_45 = arith.constant dense<0.000000e+00> : vector<8x32xf32>
    %116 = tpu.matmul %114, %115, %cst_45 {dimension_numbers = #tpu.dot_dimension_numbers<[1], [0], [0], [1], [0, 0, 1, 1], [], []>} : vector<8x128xbf16>, vector<128x32xbf16>, vector<8x32xf32> -> vector<8x32xf32>
    %117 = arith.addf %95, %116 : vector<8x32xf32>
    %c0_46 = arith.constant 0 : index
    %c0_47 = arith.constant 0 : index
    %118 = vector.load %arg12[%c0_46, %c0_47] : memref<1x32xf32, #tpu.memory_space<vmem>>, vector<1x32xf32>
    %119 = vector.broadcast %118 : vector<1x32xf32> to vector<8x32xf32>
    %120 = arith.addf %117, %119 : vector<8x32xf32>
    %121 = arith.addf %120, %93 : vector<8x32xf32>
    %c0_48 = arith.constant 0 : index
    %c0_49 = arith.constant 0 : index
    %122 = vector.load %arg13[%c0_48, %c0_49] : memref<1x32xf32, #tpu.memory_space<vmem>>, vector<1x32xf32>
    %c0_50 = arith.constant 0 : index
    %c0_51 = arith.constant 0 : index
    %123 = vector.load %arg14[%c0_50, %c0_51] : memref<1x32xf32, #tpu.memory_space<vmem>>, vector<1x32xf32>
    %cst_52 = arith.constant dense<0.000000e+00> : vector<8xf32>
    %124 = vector.multi_reduction <add>, %121, %cst_52 [1] : vector<8x32xf32> to vector<8xf32>
    %125 = vector.shape_cast %124 : vector<8xf32> to vector<8x1xf32>
    %cst_53 = arith.constant 3.200000e+01 : f32
    %126 = vector.broadcast %cst_53 : f32 to vector<8x1xf32>
    %127 = arith.divf %125, %126 : vector<8x1xf32>
    %128 = vector.broadcast %127 : vector<8x1xf32> to vector<8x32xf32>
    %129 = arith.subf %121, %128 : vector<8x32xf32>
    %130 = arith.mulf %129, %129 : vector<8x32xf32>
    %cst_54 = arith.constant dense<0.000000e+00> : vector<8xf32>
    %131 = vector.multi_reduction <add>, %130, %cst_54 [1] : vector<8x32xf32> to vector<8xf32>
    %132 = vector.shape_cast %131 : vector<8xf32> to vector<8x1xf32>
    %cst_55 = arith.constant 3.200000e+01 : f32
    %133 = vector.broadcast %cst_55 : f32 to vector<8x1xf32>
    %134 = arith.divf %132, %133 : vector<8x1xf32>
    %cst_56 = arith.constant 9.99999996E-13 : f32
    %135 = vector.broadcast %cst_56 : f32 to vector<8x1xf32>
    %136 = arith.addf %134, %135 : vector<8x1xf32>
    %137 = math.rsqrt %136 : vector<8x1xf32>
    %138 = vector.broadcast %137 : vector<8x1xf32> to vector<8x32xf32>
    %139 = arith.mulf %129, %138 : vector<8x32xf32>
    %140 = vector.broadcast %122 : vector<1x32xf32> to vector<8x32xf32>
    %141 = arith.mulf %139, %140 : vector<8x32xf32>
    %142 = vector.broadcast %123 : vector<1x32xf32> to vector<8x32xf32>
    %143 = arith.addf %141, %142 : vector<8x32xf32>
    %144 = vector.shape_cast %143 : vector<8x32xf32> to vector<1x8x32xf32>
    %c0_57 = arith.constant 0 : index
    %c0_58 = arith.constant 0 : index
    %c0_59 = arith.constant 0 : index
    %145 = vector.load %arg15[%c0_57, %c0_58, %c0_59] : memref<1x8x32xf32, #tpu.memory_space<vmem>>, vector<1x8x32xf32>
    tpu.vector_store %arg15[%c0_57, %c0_58, %c0_59], %144 {strides = array<i32>} : memref<1x8x32xf32, #tpu.memory_space<vmem>>, vector<1x8x32xf32>,
    return
  }
  func.func @transform_0(%arg0: i32) -> (i32, i32, i32) {
    %c0_i32 = arith.constant 0 : i32
    %c0_i32_0 = arith.constant 0 : i32
    %c0_i32_1 = arith.constant 0 : i32
    return %arg0, %c0_i32, %c0_i32_0 : i32, i32, i32
  }
  func.func @transform_1(%arg0: i32) -> (i32, i32) {
    %c0_i32 = arith.constant 0 : i32
    %c0_i32_0 = arith.constant 0 : i32
    %c0_i32_1 = arith.constant 0 : i32
    return %c0_i32, %c0_i32_0 : i32, i32
  }
  func.func @transform_2(%arg0: i32) -> (i32, i32) {
    %c0_i32 = arith.constant 0 : i32
    %c0_i32_0 = arith.constant 0 : i32
    %c0_i32_1 = arith.constant 0 : i32
    return %c0_i32, %c0_i32_0 : i32, i32
  }
  func.func @transform_3(%arg0: i32) -> (i32, i32) {
    %c0_i32 = arith.constant 0 : i32
    %c0_i32_0 = arith.constant 0 : i32
    %c0_i32_1 = arith.constant 0 : i32
    return %c0_i32, %c0_i32_0 : i32, i32
  }
  func.func @transform_4(%arg0: i32) -> (i32, i32) {
    %c0_i32 = arith.constant 0 : i32
    %c0_i32_0 = arith.constant 0 : i32
    %c0_i32_1 = arith.constant 0 : i32
    return %c0_i32, %c0_i32_0 : i32, i32
  }
  func.func @transform_5(%arg0: i32) -> (i32, i32) {
    %c0_i32 = arith.constant 0 : i32
    %c0_i32_0 = arith.constant 0 : i32
    %c0_i32_1 = arith.constant 0 : i32
    return %c0_i32, %c0_i32_0 : i32, i32
  }
  func.func @transform_6(%arg0: i32) -> (i32, i32) {
    %c0_i32 = arith.constant 0 : i32
    %c0_i32_0 = arith.constant 0 : i32
    %c0_i32_1 = arith.constant 0 : i32
    return %c0_i32, %c0_i32_0 : i32, i32
  }
  func.func @transform_7(%arg0: i32) -> (i32, i32) {
    %c0_i32 = arith.constant 0 : i32
    %c0_i32_0 = arith.constant 0 : i32
    %c0_i32_1 = arith.constant 0 : i32
    return %c0_i32, %c0_i32_0 : i32, i32
  }
  func.func @transform_8(%arg0: i32) -> (i32, i32) {
    %c0_i32 = arith.constant 0 : i32
    %c0_i32_0 = arith.constant 0 : i32
    %c0_i32_1 = arith.constant 0 : i32
    return %c0_i32, %c0_i32_0 : i32, i32
  }
  func.func @transform_9(%arg0: i32) -> (i32, i32) {
    %c0_i32 = arith.constant 0 : i32
    %c0_i32_0 = arith.constant 0 : i32
    %c0_i32_1 = arith.constant 0 : i32
    return %c0_i32, %c0_i32_0 : i32, i32
  }
  func.func @transform_10(%arg0: i32) -> (i32, i32) {
    %c0_i32 = arith.constant 0 : i32
    %c0_i32_0 = arith.constant 0 : i32
    %c0_i32_1 = arith.constant 0 : i32
    return %c0_i32, %c0_i32_0 : i32, i32
  }
  func.func @transform_11(%arg0: i32) -> (i32, i32) {
    %c0_i32 = arith.constant 0 : i32
    %c0_i32_0 = arith.constant 0 : i32
    %c0_i32_1 = arith.constant 0 : i32
    return %c0_i32, %c0_i32_0 : i32, i32
  }
  func.func @transform_12(%arg0: i32) -> (i32, i32) {
    %c0_i32 = arith.constant 0 : i32
    %c0_i32_0 = arith.constant 0 : i32
    %c0_i32_1 = arith.constant 0 : i32
    return %c0_i32, %c0_i32_0 : i32, i32
  }
  func.func @transform_13(%arg0: i32) -> (i32, i32) {
    %c0_i32 = arith.constant 0 : i32
    %c0_i32_0 = arith.constant 0 : i32
    %c0_i32_1 = arith.constant 0 : i32
    return %c0_i32, %c0_i32_0 : i32, i32
  }
  func.func @transform_14(%arg0: i32) -> (i32, i32, i32) {
    %c0_i32 = arith.constant 0 : i32
    %c0_i32_0 = arith.constant 0 : i32
    %c0_i32_1 = arith.constant 0 : i32
    return %arg0, %c0_i32, %c0_i32_0 : i32, i32, i32
  }
}

module attributes {stable_mosaic.version = 11 : i64} {
  func.func @layer_kernel(%arg0: i32, %arg1: memref<1x8x32xf32, #tpu.memory_space<vmem>>, %arg2: memref<8x8xbf16, #tpu.memory_space<vmem>>, %arg3: memref<32x96xbf16, #tpu.memory_space<vmem>>, %arg4: memref<1x96xf32, #tpu.memory_space<vmem>>, %arg5: memref<32x32xbf16, #tpu.memory_space<vmem>>, %arg6: memref<1x32xf32, #tpu.memory_space<vmem>>, %arg7: memref<1x32xf32, #tpu.memory_space<vmem>>, %arg8: memref<1x32xf32, #tpu.memory_space<vmem>>, %arg9: memref<32x128xbf16, #tpu.memory_space<vmem>>, %arg10: memref<1x128xf32, #tpu.memory_space<vmem>>, %arg11: memref<128x32xbf16, #tpu.memory_space<vmem>>, %arg12: memref<1x32xf32, #tpu.memory_space<vmem>>, %arg13: memref<1x32xf32, #tpu.memory_space<vmem>>, %arg14: memref<1x32xf32, #tpu.memory_space<vmem>>, %arg15: memref<1x8x32xf32, #tpu.memory_space<vmem>>) attributes {dimension_semantics = [#tpu.dimension_semantics<parallel>], iteration_bounds = array<i64: 2>, scalar_prefetch = 0 : i64, scratch_operands = 0 : i64, tpu.core_type = #tpu.core_type<tc>, window_params = [{transform_indices = @transform_0, window_bounds = array<i64: 1, 8, 32>}, {pipeline_mode = #tpu.pipeline_mode<synchronous>, transform_indices = @transform_1, window_bounds = array<i64: 8, 8>}, {pipeline_mode = #tpu.pipeline_mode<synchronous>, transform_indices = @transform_2, window_bounds = array<i64: 32, 96>}, {pipeline_mode = #tpu.pipeline_mode<synchronous>, transform_indices = @transform_3, window_bounds = array<i64: 1, 96>}, {pipeline_mode = #tpu.pipeline_mode<synchronous>, transform_indices = @transform_4, window_bounds = array<i64: 32, 32>}, {pipeline_mode = #tpu.pipeline_mode<synchronous>, transform_indices = @transform_5, window_bounds = array<i64: 1, 32>}, {pipeline_mode = #tpu.pipeline_mode<synchronous>, transform_indices = @transform_6, window_bounds = array<i64: 1, 32>}, {pipeline_mode = #tpu.pipeline_mode<synchronous>, transform_indices = @transform_7, window_bounds = array<i64: 1, 32>}, {pipeline_mode = #tpu.pipeline_mode<synchronous>, transform_indices = @transform_8, window_bounds = array<i64: 32, 128>}, {pipeline_mode = #tpu.pipeline_mode<synchronous>, transform_indices = @transform_9, window_bounds = array<i64: 1, 128>}, {pipeline_mode = #tpu.pipeline_mode<synchronous>, transform_indices = @transform_10, window_bounds = array<i64: 128, 32>}, {pipeline_mode = #tpu.pipeline_mode<synchronous>, transform_indices = @transform_11, window_bounds = array<i64: 1, 32>}, {pipeline_mode = #tpu.pipeline_mode<synchronous>, transform_indices = @transform_12, window_bounds = array<i64: 1, 32>}, {pipeline_mode = #tpu.pipeline_mode<synchronous>, transform_indices = @transform_13, window_bounds = array<i64: 1, 32>}, {transform_indices = @transform_14, window_bounds = array<i64: 1, 8, 32>}]} {
    %c0 = arith.constant 0 : index
    %c0_0 = arith.constant 0 : index
    %c0_1 = arith.constant 0 : index
    %0 = vector.load %arg1[%c0, %c0_0, %c0_1] : memref<1x8x32xf32, #tpu.memory_space<vmem>>, vector<1x8x32xf32>
    %1 = vector.shape_cast %0 : vector<1x8x32xf32> to vector<8x32xf32>
    %2 = arith.truncf %1 : vector<8x32xf32> to vector<8x32xbf16>
    %c0_2 = arith.constant 0 : index
    %c0_3 = arith.constant 0 : index
    %3 = vector.load %arg2[%c0_2, %c0_3] : memref<8x8xbf16, #tpu.memory_space<vmem>>, vector<8x8xbf16>
    %4 = arith.extf %3 : vector<8x8xbf16> to vector<8x8xf32>
    %5 = vector.shape_cast %4 : vector<8x8xf32> to vector<1x8x8xf32>
    %c0_4 = arith.constant 0 : index
    %c0_5 = arith.constant 0 : index
    %6 = vector.load %arg3[%c0_4, %c0_5] : memref<32x96xbf16, #tpu.memory_space<vmem>>, vector<32x96xbf16>
    %cst = arith.constant dense<0.000000e+00> : vector<8x96xf32>
    %7 = tpu.matmul %2, %6, %cst {dimension_numbers = #tpu.dot_dimension_numbers<[1], [0], [0], [1], [0, 0, 1, 1], [], []>} : vector<8x32xbf16>, vector<32x96xbf16>, vector<8x96xf32> -> vector<8x96xf32>
    %c0_6 = arith.constant 0 : index
    %c0_7 = arith.constant 0 : index
    %8 = vector.load %arg4[%c0_6, %c0_7] : memref<1x96xf32, #tpu.memory_space<vmem>>, vector<1x96xf32>
    %9 = vector.broadcast %8 : vector<1x96xf32> to vector<8x96xf32>
    %10 = arith.addf %7, %9 : vector<8x96xf32>
    %cst_8 = arith.constant 0.000000e+00 : f32
    %11 = vector.broadcast %cst_8 : f32 to vector<8x32xf32>
    %12 = vector.extract_strided_slice %10 {offsets = [0, 0], sizes = [8, 16], strides = [1, 1]} : vector<8x96xf32> to vector<8x16xf32>
    %13 = vector.shape_cast %12 : vector<8x16xf32> to vector<1x8x16xf32>
    %14 = arith.truncf %13 : vector<1x8x16xf32> to vector<1x8x16xbf16>
    %15 = vector.extract_strided_slice %10 {offsets = [0, 32], sizes = [8, 16], strides = [1, 1]} : vector<8x96xf32> to vector<8x16xf32>
    %16 = vector.shape_cast %15 : vector<8x16xf32> to vector<1x8x16xf32>
    %17 = arith.truncf %16 : vector<1x8x16xf32> to vector<1x8x16xbf16>
    %18 = vector.extract_strided_slice %10 {offsets = [0, 64], sizes = [8, 16], strides = [1, 1]} : vector<8x96xf32> to vector<8x16xf32>
    %19 = vector.shape_cast %18 : vector<8x16xf32> to vector<1x8x16xf32>
    %20 = arith.truncf %19 : vector<1x8x16xf32> to vector<1x8x16xbf16>
    "tpu.trace_start"() <{level = 10 : i32, message = "bqd,bkd->bqk"}> : () -> ()
    %cst_9 = arith.constant dense<0.000000e+00> : vector<1x8x8xf32>
    %21 = tpu.matmul %14, %17, %cst_9 {dimension_numbers = #tpu.dot_dimension_numbers<[2], [2], [1], [1], [0, 0, 0, 1, 1, 1], [0], [0]>} : vector<1x8x16xbf16>, vector<1x8x16xbf16>, vector<1x8x8xf32> -> vector<1x8x8xf32>
    "tpu.trace_stop"() : () -> ()
    %22 = arith.addf %21, %5 : vector<1x8x8xf32>
    %cst_10 = arith.constant dense<0xFF800000> : vector<1x8xf32>
    %23 = vector.multi_reduction <maximumf>, %22, %cst_10 [2] : vector<1x8x8xf32> to vector<1x8xf32>
    %24 = vector.shape_cast %23 : vector<1x8xf32> to vector<1x8x1xf32>
    %25 = vector.broadcast %24 : vector<1x8x1xf32> to vector<1x8x8xf32>
    %26 = arith.subf %22, %25 : vector<1x8x8xf32>
    %27 = math.exp %26 : vector<1x8x8xf32>
    %cst_11 = arith.constant dense<0.000000e+00> : vector<1x8xf32>
    %28 = vector.multi_reduction <add>, %27, %cst_11 [2] : vector<1x8x8xf32> to vector<1x8xf32>
    %29 = vector.shape_cast %28 : vector<1x8xf32> to vector<1x8x1xf32>
    %30 = tpu.reciprocal %29 {approx = true} : vector<1x8x1xf32> -> vector<1x8x1xf32>
    %31 = vector.broadcast %30 : vector<1x8x1xf32> to vector<1x8x8xf32>
    %32 = arith.mulf %27, %31 : vector<1x8x8xf32>
    %33 = arith.truncf %32 : vector<1x8x8xf32> to vector<1x8x8xbf16>
    "tpu.trace_start"() <{level = 10 : i32, message = "bqk,bkd->bqd"}> : () -> ()
    %cst_12 = arith.constant dense<0.000000e+00> : vector<1x8x16xf32>
    %34 = tpu.matmul %33, %20, %cst_12 {dimension_numbers = #tpu.dot_dimension_numbers<[2], [1], [1], [2], [0, 0, 0, 1, 1, 2], [0], [0]>} : vector<1x8x8xbf16>, vector<1x8x16xbf16>, vector<1x8x16xf32> -> vector<1x8x16xf32>
    "tpu.trace_stop"() : () -> ()
    %35 = vector.shape_cast %34 : vector<1x8x16xf32> to vector<8x16xf32>
    %36 = arith.truncf %35 : vector<8x16xf32> to vector<8x16xbf16>
    %c0_13 = arith.constant 0 : index
    %c0_14 = arith.constant 0 : index
    %37 = vector.load %arg5[%c0_13, %c0_14] : memref<32x32xbf16, #tpu.memory_space<vmem>>, vector<16x32xbf16>
    %cst_15 = arith.constant dense<0.000000e+00> : vector<8x32xf32>
    %38 = tpu.matmul %36, %37, %cst_15 {dimension_numbers = #tpu.dot_dimension_numbers<[1], [0], [0], [1], [0, 0, 1, 1], [], []>} : vector<8x16xbf16>, vector<16x32xbf16>, vector<8x32xf32> -> vector<8x32xf32>
    %39 = arith.addf %11, %38 : vector<8x32xf32>
    %40 = vector.extract_strided_slice %10 {offsets = [0, 16], sizes = [8, 16], strides = [1, 1]} : vector<8x96xf32> to vector<8x16xf32>
    %41 = vector.shape_cast %40 : vector<8x16xf32> to vector<1x8x16xf32>
    %42 = arith.truncf %41 : vector<1x8x16xf32> to vector<1x8x16xbf16>
    %43 = vector.extract_strided_slice %10 {offsets = [0, 48], sizes = [8, 16], strides = [1, 1]} : vector<8x96xf32> to vector<8x16xf32>
    %44 = vector.shape_cast %43 : vector<8x16xf32> to vector<1x8x16xf32>
    %45 = arith.truncf %44 : vector<1x8x16xf32> to vector<1x8x16xbf16>
    %46 = vector.extract_strided_slice %10 {offsets = [0, 80], sizes = [8, 16], strides = [1, 1]} : vector<8x96xf32> to vector<8x16xf32>
    %47 = vector.shape_cast %46 : vector<8x16xf32> to vector<1x8x16xf32>
    %48 = arith.truncf %47 : vector<1x8x16xf32> to vector<1x8x16xbf16>
    "tpu.trace_start"() <{level = 10 : i32, message = "bqd,bkd->bqk"}> : () -> ()
    %cst_16 = arith.constant dense<0.000000e+00> : vector<1x8x8xf32>
    %49 = tpu.matmul %42, %45, %cst_16 {dimension_numbers = #tpu.dot_dimension_numbers<[2], [2], [1], [1], [0, 0, 0, 1, 1, 1], [0], [0]>} : vector<1x8x16xbf16>, vector<1x8x16xbf16>, vector<1x8x8xf32> -> vector<1x8x8xf32>
    "tpu.trace_stop"() : () -> ()
    %50 = arith.addf %49, %5 : vector<1x8x8xf32>
    %cst_17 = arith.constant dense<0xFF800000> : vector<1x8xf32>
    %51 = vector.multi_reduction <maximumf>, %50, %cst_17 [2] : vector<1x8x8xf32> to vector<1x8xf32>
    %52 = vector.shape_cast %51 : vector<1x8xf32> to vector<1x8x1xf32>
    %53 = vector.broadcast %52 : vector<1x8x1xf32> to vector<1x8x8xf32>
    %54 = arith.subf %50, %53 : vector<1x8x8xf32>
    %55 = math.exp %54 : vector<1x8x8xf32>
    %cst_18 = arith.constant dense<0.000000e+00> : vector<1x8xf32>
    %56 = vector.multi_reduction <add>, %55, %cst_18 [2] : vector<1x8x8xf32> to vector<1x8xf32>
    %57 = vector.shape_cast %56 : vector<1x8xf32> to vector<1x8x1xf32>
    %58 = tpu.reciprocal %57 {approx = true} : vector<1x8x1xf32> -> vector<1x8x1xf32>
    %59 = vector.broadcast %58 : vector<1x8x1xf32> to vector<1x8x8xf32>
    %60 = arith.mulf %55, %59 : vector<1x8x8xf32>
    %61 = arith.truncf %60 : vector<1x8x8xf32> to vector<1x8x8xbf16>
    "tpu.trace_start"() <{level = 10 : i32, message = "bqk,bkd->bqd"}> : () -> ()
    %cst_19 = arith.constant dense<0.000000e+00> : vector<1x8x16xf32>
    %62 = tpu.matmul %61, %48, %cst_19 {dimension_numbers = #tpu.dot_dimension_numbers<[2], [1], [1], [2], [0, 0, 0, 1, 1, 2], [0], [0]>} : vector<1x8x8xbf16>, vector<1x8x16xbf16>, vector<1x8x16xf32> -> vector<1x8x16xf32>
    "tpu.trace_stop"() : () -> ()
    %63 = vector.shape_cast %62 : vector<1x8x16xf32> to vector<8x16xf32>
    %64 = arith.truncf %63 : vector<8x16xf32> to vector<8x16xbf16>
    %c16 = arith.constant 16 : index
    %c0_20 = arith.constant 0 : index
    %65 = vector.load %arg5[%c16, %c0_20] : memref<32x32xbf16, #tpu.memory_space<vmem>>, vector<16x32xbf16>
    %cst_21 = arith.constant dense<0.000000e+00> : vector<8x32xf32>
    %66 = tpu.matmul %64, %65, %cst_21 {dimension_numbers = #tpu.dot_dimension_numbers<[1], [0], [0], [1], [0, 0, 1, 1], [], []>} : vector<8x16xbf16>, vector<16x32xbf16>, vector<8x32xf32> -> vector<8x32xf32>
    %67 = arith.addf %39, %66 : vector<8x32xf32>
    %c0_22 = arith.constant 0 : index
    %c0_23 = arith.constant 0 : index
    %68 = vector.load %arg6[%c0_22, %c0_23] : memref<1x32xf32, #tpu.memory_space<vmem>>, vector<1x32xf32>
    %69 = vector.broadcast %68 : vector<1x32xf32> to vector<8x32xf32>
    %70 = arith.addf %67, %69 : vector<8x32xf32>
    %71 = arith.addf %70, %1 : vector<8x32xf32>
    %c0_24 = arith.constant 0 : index
    %c0_25 = arith.constant 0 : index
    %72 = vector.load %arg7[%c0_24, %c0_25] : memref<1x32xf32, #tpu.memory_space<vmem>>, vector<1x32xf32>
    %c0_26 = arith.constant 0 : index
    %c0_27 = arith.constant 0 : index
    %73 = vector.load %arg8[%c0_26, %c0_27] : memref<1x32xf32, #tpu.memory_space<vmem>>, vector<1x32xf32>
    %cst_28 = arith.constant dense<0.000000e+00> : vector<8xf32>
    %74 = vector.multi_reduction <add>, %71, %cst_28 [1] : vector<8x32xf32> to vector<8xf32>
    %75 = vector.shape_cast %74 : vector<8xf32> to vector<8x1xf32>
    %cst_29 = arith.constant 3.200000e+01 : f32
    %76 = vector.broadcast %cst_29 : f32 to vector<8x1xf32>
    %77 = arith.divf %75, %76 : vector<8x1xf32>
    %78 = vector.broadcast %77 : vector<8x1xf32> to vector<8x32xf32>
    %79 = arith.subf %71, %78 : vector<8x32xf32>
    %80 = arith.mulf %79, %79 : vector<8x32xf32>
    %cst_30 = arith.constant dense<0.000000e+00> : vector<8xf32>
    %81 = vector.multi_reduction <add>, %80, %cst_30 [1] : vector<8x32xf32> to vector<8xf32>
    %82 = vector.shape_cast %81 : vector<8xf32> to vector<8x1xf32>
    %cst_31 = arith.constant 3.200000e+01 : f32
    %83 = vector.broadcast %cst_31 : f32 to vector<8x1xf32>
    %84 = arith.divf %82, %83 : vector<8x1xf32>
    %cst_32 = arith.constant 9.99999996E-13 : f32
    %85 = vector.broadcast %cst_32 : f32 to vector<8x1xf32>
    %86 = arith.addf %84, %85 : vector<8x1xf32>
    %87 = math.rsqrt %86 : vector<8x1xf32>
    %88 = vector.broadcast %87 : vector<8x1xf32> to vector<8x32xf32>
    %89 = arith.mulf %79, %88 : vector<8x32xf32>
    %90 = vector.broadcast %72 : vector<1x32xf32> to vector<8x32xf32>
    %91 = arith.mulf %89, %90 : vector<8x32xf32>
    %92 = vector.broadcast %73 : vector<1x32xf32> to vector<8x32xf32>
    %93 = arith.addf %91, %92 : vector<8x32xf32>
    %94 = arith.truncf %93 : vector<8x32xf32> to vector<8x32xbf16>
    %cst_33 = arith.constant 0.000000e+00 : f32
    %95 = vector.broadcast %cst_33 : f32 to vector<8x32xf32>
    %c0_34 = arith.constant 0 : index
    %c0_35 = arith.constant 0 : index
    %96 = vector.load %arg9[%c0_34, %c0_35] : memref<32x128xbf16, #tpu.memory_space<vmem>>, vector<32x128xbf16>
    %cst_36 = arith.constant dense<0.000000e+00> : vector<8x128xf32>
    %97 = tpu.matmul %94, %96, %cst_36 {dimension_numbers = #tpu.dot_dimension_numbers<[1], [0], [0], [1], [0, 0, 1, 1], [], []>} : vector<8x32xbf16>, vector<32x128xbf16>, vector<8x128xf32> -> vector<8x128xf32>
    %c0_37 = arith.constant 0 : index
    %c0_38 = arith.constant 0 : index
    %98 = vector.load %arg10[%c0_37, %c0_38] : memref<1x128xf32, #tpu.memory_space<vmem>>, vector<1x128xf32>
    %99 = vector.broadcast %98 : vector<1x128xf32> to vector<8x128xf32>
    %100 = arith.addf %97, %99 : vector<8x128xf32>
    %cst_39 = arith.constant 5.000000e-01 : f32
    %101 = vector.broadcast %cst_39 : f32 to vector<8x128xf32>
    %102 = arith.mulf %100, %101 : vector<8x128xf32>
    %cst_40 = arith.constant 1.41421354 : f32
    %103 = vector.broadcast %cst_40 : f32 to vector<8x128xf32>
    %104 = arith.divf %100, %103 : vector<8x128xf32>
    %105 = math.erf %104 : vector<8x128xf32>
    %cst_41 = arith.constant 1.000000e+00 : f32
    %106 = vector.broadcast %cst_41 : f32 to vector<8x128xf32>
    %107 = arith.addf %106, %105 : vector<8x128xf32>
    %108 = arith.mulf %102, %107 : vector<8x128xf32>
    %109 = arith.truncf %108 : vector<8x128xf32> to vector<8x128xbf16>
    %c0_42 = arith.constant 0 : index
    %c0_43 = arith.constant 0 : index
    %110 = vector.load %arg11[%c0_42, %c0_43] : memref<128x32xbf16, #tpu.memory_space<vmem>>, vector<128x32xbf16>
    %cst_44 = arith.constant dense<0.000000e+00> : vector<8x32xf32>
    %111 = tpu.matmul %109, %110, %cst_44 {dimension_numbers = #tpu.dot_dimension_numbers<[1], [0], [0], [1], [0, 0, 1, 1], [], []>} : vector<8x128xbf16>, vector<128x32xbf16>, vector<8x32xf32> -> vector<8x32xf32>
    %112 = arith.addf %95, %111 : vector<8x32xf32>
    %c0_45 = arith.constant 0 : index
    %c0_46 = arith.constant 0 : index
    %113 = vector.load %arg12[%c0_45, %c0_46] : memref<1x32xf32, #tpu.memory_space<vmem>>, vector<1x32xf32>
    %114 = vector.broadcast %113 : vector<1x32xf32> to vector<8x32xf32>
    %115 = arith.addf %112, %114 : vector<8x32xf32>
    %116 = arith.addf %115, %93 : vector<8x32xf32>
    %c0_47 = arith.constant 0 : index
    %c0_48 = arith.constant 0 : index
    %117 = vector.load %arg13[%c0_47, %c0_48] : memref<1x32xf32, #tpu.memory_space<vmem>>, vector<1x32xf32>
    %c0_49 = arith.constant 0 : index
    %c0_50 = arith.constant 0 : index
    %118 = vector.load %arg14[%c0_49, %c0_50] : memref<1x32xf32, #tpu.memory_space<vmem>>, vector<1x32xf32>
    %cst_51 = arith.constant dense<0.000000e+00> : vector<8xf32>
    %119 = vector.multi_reduction <add>, %116, %cst_51 [1] : vector<8x32xf32> to vector<8xf32>
    %120 = vector.shape_cast %119 : vector<8xf32> to vector<8x1xf32>
    %cst_52 = arith.constant 3.200000e+01 : f32
    %121 = vector.broadcast %cst_52 : f32 to vector<8x1xf32>
    %122 = arith.divf %120, %121 : vector<8x1xf32>
    %123 = vector.broadcast %122 : vector<8x1xf32> to vector<8x32xf32>
    %124 = arith.subf %116, %123 : vector<8x32xf32>
    %125 = arith.mulf %124, %124 : vector<8x32xf32>
    %cst_53 = arith.constant dense<0.000000e+00> : vector<8xf32>
    %126 = vector.multi_reduction <add>, %125, %cst_53 [1] : vector<8x32xf32> to vector<8xf32>
    %127 = vector.shape_cast %126 : vector<8xf32> to vector<8x1xf32>
    %cst_54 = arith.constant 3.200000e+01 : f32
    %128 = vector.broadcast %cst_54 : f32 to vector<8x1xf32>
    %129 = arith.divf %127, %128 : vector<8x1xf32>
    %cst_55 = arith.constant 9.99999996E-13 : f32
    %130 = vector.broadcast %cst_55 : f32 to vector<8x1xf32>
    %131 = arith.addf %129, %130 : vector<8x1xf32>
    %132 = math.rsqrt %131 : vector<8x1xf32>
    %133 = vector.broadcast %132 : vector<8x1xf32> to vector<8x32xf32>
    %134 = arith.mulf %124, %133 : vector<8x32xf32>
    %135 = vector.broadcast %117 : vector<1x32xf32> to vector<8x32xf32>
    %136 = arith.mulf %134, %135 : vector<8x32xf32>
    %137 = vector.broadcast %118 : vector<1x32xf32> to vector<8x32xf32>
    %138 = arith.addf %136, %137 : vector<8x32xf32>
    %139 = vector.shape_cast %138 : vector<8x32xf32> to vector<1x8x32xf32>
    %c0_56 = arith.constant 0 : index
    %c0_57 = arith.constant 0 : index
    %c0_58 = arith.constant 0 : index
    %140 = vector.load %arg15[%c0_56, %c0_57, %c0_58] : memref<1x8x32xf32, #tpu.memory_space<vmem>>, vector<1x8x32xf32>
    tpu.vector_store %arg15[%c0_56, %c0_57, %c0_58], %139 {strides = array<i32>} : memref<1x8x32xf32, #tpu.memory_space<vmem>>, vector<1x8x32xf32>,
    return
  }
  func.func @transform_0(%arg0: i32) -> (i32, i32, i32) {
    %c0_i32 = arith.constant 0 : i32
    %c0_i32_0 = arith.constant 0 : i32
    %c0_i32_1 = arith.constant 0 : i32
    return %arg0, %c0_i32, %c0_i32_0 : i32, i32, i32
  }
  func.func @transform_1(%arg0: i32) -> (i32, i32) {
    %c0_i32 = arith.constant 0 : i32
    %c0_i32_0 = arith.constant 0 : i32
    %c0_i32_1 = arith.constant 0 : i32
    return %c0_i32, %c0_i32_0 : i32, i32
  }
  func.func @transform_2(%arg0: i32) -> (i32, i32) {
    %c0_i32 = arith.constant 0 : i32
    %c0_i32_0 = arith.constant 0 : i32
    %c0_i32_1 = arith.constant 0 : i32
    return %c0_i32, %c0_i32_0 : i32, i32
  }
  func.func @transform_3(%arg0: i32) -> (i32, i32) {
    %c0_i32 = arith.constant 0 : i32
    %c0_i32_0 = arith.constant 0 : i32
    %c0_i32_1 = arith.constant 0 : i32
    return %c0_i32, %c0_i32_0 : i32, i32
  }
  func.func @transform_4(%arg0: i32) -> (i32, i32) {
    %c0_i32 = arith.constant 0 : i32
    %c0_i32_0 = arith.constant 0 : i32
    %c0_i32_1 = arith.constant 0 : i32
    return %c0_i32, %c0_i32_0 : i32, i32
  }
  func.func @transform_5(%arg0: i32) -> (i32, i32) {
    %c0_i32 = arith.constant 0 : i32
    %c0_i32_0 = arith.constant 0 : i32
    %c0_i32_1 = arith.constant 0 : i32
    return %c0_i32, %c0_i32_0 : i32, i32
  }
  func.func @transform_6(%arg0: i32) -> (i32, i32) {
    %c0_i32 = arith.constant 0 : i32
    %c0_i32_0 = arith.constant 0 : i32
    %c0_i32_1 = arith.constant 0 : i32
    return %c0_i32, %c0_i32_0 : i32, i32
  }
  func.func @transform_7(%arg0: i32) -> (i32, i32) {
    %c0_i32 = arith.constant 0 : i32
    %c0_i32_0 = arith.constant 0 : i32
    %c0_i32_1 = arith.constant 0 : i32
    return %c0_i32, %c0_i32_0 : i32, i32
  }
  func.func @transform_8(%arg0: i32) -> (i32, i32) {
    %c0_i32 = arith.constant 0 : i32
    %c0_i32_0 = arith.constant 0 : i32
    %c0_i32_1 = arith.constant 0 : i32
    return %c0_i32, %c0_i32_0 : i32, i32
  }
  func.func @transform_9(%arg0: i32) -> (i32, i32) {
    %c0_i32 = arith.constant 0 : i32
    %c0_i32_0 = arith.constant 0 : i32
    %c0_i32_1 = arith.constant 0 : i32
    return %c0_i32, %c0_i32_0 : i32, i32
  }
  func.func @transform_10(%arg0: i32) -> (i32, i32) {
    %c0_i32 = arith.constant 0 : i32
    %c0_i32_0 = arith.constant 0 : i32
    %c0_i32_1 = arith.constant 0 : i32
    return %c0_i32, %c0_i32_0 : i32, i32
  }
  func.func @transform_11(%arg0: i32) -> (i32, i32) {
    %c0_i32 = arith.constant 0 : i32
    %c0_i32_0 = arith.constant 0 : i32
    %c0_i32_1 = arith.constant 0 : i32
    return %c0_i32, %c0_i32_0 : i32, i32
  }
  func.func @transform_12(%arg0: i32) -> (i32, i32) {
    %c0_i32 = arith.constant 0 : i32
    %c0_i32_0 = arith.constant 0 : i32
    %c0_i32_1 = arith.constant 0 : i32
    return %c0_i32, %c0_i32_0 : i32, i32
  }
  func.func @transform_13(%arg0: i32) -> (i32, i32) {
    %c0_i32 = arith.constant 0 : i32
    %c0_i32_0 = arith.constant 0 : i32
    %c0_i32_1 = arith.constant 0 : i32
    return %c0_i32, %c0_i32_0 : i32, i32
  }
  func.func @transform_14(%arg0: i32) -> (i32, i32, i32) {
    %c0_i32 = arith.constant 0 : i32
    %c0_i32_0 = arith.constant 0 : i32
    %c0_i32_1 = arith.constant 0 : i32
    return %arg0, %c0_i32, %c0_i32_0 : i32, i32, i32
  }
}

module attributes {stable_mosaic.version = 11 : i64} {
  func.func @layer_kernel(%arg0: i32, %arg1: memref<1x8x32xf32, #tpu.memory_space<vmem>>, %arg2: memref<8x8xbf16, #tpu.memory_space<vmem>>, %arg3: memref<32x96xbf16, #tpu.memory_space<vmem>>, %arg4: memref<1x96xf32, #tpu.memory_space<vmem>>, %arg5: memref<32x32xbf16, #tpu.memory_space<vmem>>, %arg6: memref<1x32xf32, #tpu.memory_space<vmem>>, %arg7: memref<1x32xf32, #tpu.memory_space<vmem>>, %arg8: memref<1x32xf32, #tpu.memory_space<vmem>>, %arg9: memref<32x128xbf16, #tpu.memory_space<vmem>>, %arg10: memref<1x128xf32, #tpu.memory_space<vmem>>, %arg11: memref<128x32xbf16, #tpu.memory_space<vmem>>, %arg12: memref<1x32xf32, #tpu.memory_space<vmem>>, %arg13: memref<1x32xf32, #tpu.memory_space<vmem>>, %arg14: memref<1x32xf32, #tpu.memory_space<vmem>>, %arg15: memref<1x8x32xf32, #tpu.memory_space<vmem>>) attributes {dimension_semantics = [#tpu.dimension_semantics<parallel>], iteration_bounds = array<i64: 2>, scalar_prefetch = 0 : i64, scratch_operands = 0 : i64, tpu.core_type = #tpu.core_type<tc>, window_params = [{transform_indices = @transform_0, window_bounds = array<i64: 1, 8, 32>}, {pipeline_mode = #tpu.pipeline_mode<synchronous>, transform_indices = @transform_1, window_bounds = array<i64: 8, 8>}, {pipeline_mode = #tpu.pipeline_mode<synchronous>, transform_indices = @transform_2, window_bounds = array<i64: 32, 96>}, {pipeline_mode = #tpu.pipeline_mode<synchronous>, transform_indices = @transform_3, window_bounds = array<i64: 1, 96>}, {pipeline_mode = #tpu.pipeline_mode<synchronous>, transform_indices = @transform_4, window_bounds = array<i64: 32, 32>}, {pipeline_mode = #tpu.pipeline_mode<synchronous>, transform_indices = @transform_5, window_bounds = array<i64: 1, 32>}, {pipeline_mode = #tpu.pipeline_mode<synchronous>, transform_indices = @transform_6, window_bounds = array<i64: 1, 32>}, {pipeline_mode = #tpu.pipeline_mode<synchronous>, transform_indices = @transform_7, window_bounds = array<i64: 1, 32>}, {pipeline_mode = #tpu.pipeline_mode<synchronous>, transform_indices = @transform_8, window_bounds = array<i64: 32, 128>}, {pipeline_mode = #tpu.pipeline_mode<synchronous>, transform_indices = @transform_9, window_bounds = array<i64: 1, 128>}, {pipeline_mode = #tpu.pipeline_mode<synchronous>, transform_indices = @transform_10, window_bounds = array<i64: 128, 32>}, {pipeline_mode = #tpu.pipeline_mode<synchronous>, transform_indices = @transform_11, window_bounds = array<i64: 1, 32>}, {pipeline_mode = #tpu.pipeline_mode<synchronous>, transform_indices = @transform_12, window_bounds = array<i64: 1, 32>}, {pipeline_mode = #tpu.pipeline_mode<synchronous>, transform_indices = @transform_13, window_bounds = array<i64: 1, 32>}, {transform_indices = @transform_14, window_bounds = array<i64: 1, 8, 32>}]} {
    %c0 = arith.constant 0 : index
    %c0_0 = arith.constant 0 : index
    %c0_1 = arith.constant 0 : index
    %0 = vector.load %arg1[%c0, %c0_0, %c0_1] : memref<1x8x32xf32, #tpu.memory_space<vmem>>, vector<1x8x32xf32>
    %1 = vector.shape_cast %0 : vector<1x8x32xf32> to vector<8x32xf32>
    %2 = arith.truncf %1 : vector<8x32xf32> to vector<8x32xbf16>
    %c0_2 = arith.constant 0 : index
    %c0_3 = arith.constant 0 : index
    %3 = vector.load %arg2[%c0_2, %c0_3] : memref<8x8xbf16, #tpu.memory_space<vmem>>, vector<8x8xbf16>
    %4 = arith.extf %3 : vector<8x8xbf16> to vector<8x8xf32>
    %5 = vector.shape_cast %4 : vector<8x8xf32> to vector<1x8x8xf32>
    %c0_4 = arith.constant 0 : index
    %c0_5 = arith.constant 0 : index
    %6 = vector.load %arg3[%c0_4, %c0_5] : memref<32x96xbf16, #tpu.memory_space<vmem>>, vector<32x96xbf16>
    %cst = arith.constant dense<0.000000e+00> : vector<8x96xf32>
    %7 = tpu.matmul %2, %6, %cst {dimension_numbers = #tpu.dot_dimension_numbers<[1], [0], [0], [1], [0, 0, 1, 1], [], []>} : vector<8x32xbf16>, vector<32x96xbf16>, vector<8x96xf32> -> vector<8x96xf32>
    %c0_6 = arith.constant 0 : index
    %c0_7 = arith.constant 0 : index
    %8 = vector.load %arg4[%c0_6, %c0_7] : memref<1x96xf32, #tpu.memory_space<vmem>>, vector<1x96xf32>
    %9 = vector.broadcast %8 : vector<1x96xf32> to vector<8x96xf32>
    %10 = arith.addf %7, %9 : vector<8x96xf32>
    %cst_8 = arith.constant 0.000000e+00 : f32
    %11 = vector.broadcast %cst_8 : f32 to vector<8x32xf32>
    %12 = vector.extract_strided_slice %10 {offsets = [0, 0], sizes = [8, 16], strides = [1, 1]} : vector<8x96xf32> to vector<8x16xf32>
    %13 = vector.shape_cast %12 : vector<8x16xf32> to vector<1x8x16xf32>
    %14 = arith.truncf %13 : vector<1x8x16xf32> to vector<1x8x16xbf16>
    %15 = vector.extract_strided_slice %10 {offsets = [0, 32], sizes = [8, 16], strides = [1, 1]} : vector<8x96xf32> to vector<8x16xf32>
    %16 = vector.shape_cast %15 : vector<8x16xf32> to vector<1x8x16xf32>
    %17 = arith.truncf %16 : vector<1x8x16xf32> to vector<1x8x16xbf16>
    %18 = vector.extract_strided_slice %10 {offsets = [0, 64], sizes = [8, 16], strides = [1, 1]} : vector<8x96xf32> to vector<8x16xf32>
    %19 = vector.shape_cast %18 : vector<8x16xf32> to vector<1x8x16xf32>
    %20 = arith.truncf %19 : vector<1x8x16xf32> to vector<1x8x16xbf16>
    "tpu.trace_start"() <{level = 10 : i32, message = "bqd,bkd->bqk"}> : () -> ()
    %cst_9 = arith.constant dense<0.000000e+00> : vector<1x8x8xf32>
    %21 = tpu.matmul %14, %17, %cst_9 {dimension_numbers = #tpu.dot_dimension_numbers<[2], [2], [1], [1], [0, 0, 0, 1, 1, 1], [0], [0]>} : vector<1x8x16xbf16>, vector<1x8x16xbf16>, vector<1x8x8xf32> -> vector<1x8x8xf32>
    "tpu.trace_stop"() : () -> ()
    %22 = arith.addf %21, %5 : vector<1x8x8xf32>
    %cst_10 = arith.constant dense<0xFF800000> : vector<1x8xf32>
    %23 = vector.multi_reduction <maximumf>, %22, %cst_10 [2] : vector<1x8x8xf32> to vector<1x8xf32>
    %24 = vector.shape_cast %23 : vector<1x8xf32> to vector<1x8x1xf32>
    %25 = vector.broadcast %24 : vector<1x8x1xf32> to vector<1x8x8xf32>
    %26 = arith.subf %22, %25 : vector<1x8x8xf32>
    %27 = math.exp %26 : vector<1x8x8xf32>
    %cst_11 = arith.constant dense<0.000000e+00> : vector<1x8xf32>
    %28 = vector.multi_reduction <add>, %27, %cst_11 [2] : vector<1x8x8xf32> to vector<1x8xf32>
    %29 = vector.shape_cast %28 : vector<1x8xf32> to vector<1x8x1xf32>
    %30 = tpu.reciprocal %29 {approx = true} : vector<1x8x1xf32> -> vector<1x8x1xf32>
    %31 = vector.broadcast %30 : vector<1x8x1xf32> to vector<1x8x8xf32>
    %32 = arith.mulf %27, %31 : vector<1x8x8xf32>
    %33 = arith.truncf %32 : vector<1x8x8xf32> to vector<1x8x8xbf16>
    "tpu.trace_start"() <{level = 10 : i32, message = "bqk,bkd->bqd"}> : () -> ()
    %cst_12 = arith.constant dense<0.000000e+00> : vector<1x8x16xf32>
    %34 = tpu.matmul %33, %20, %cst_12 {dimension_numbers = #tpu.dot_dimension_numbers<[2], [1], [1], [2], [0, 0, 0, 1, 1, 2], [0], [0]>} : vector<1x8x8xbf16>, vector<1x8x16xbf16>, vector<1x8x16xf32> -> vector<1x8x16xf32>
    "tpu.trace_stop"() : () -> ()
    %35 = vector.shape_cast %34 : vector<1x8x16xf32> to vector<8x16xf32>
    %36 = arith.truncf %35 : vector<8x16xf32> to vector<8x16xbf16>
    %c0_13 = arith.constant 0 : index
    %c0_14 = arith.constant 0 : index
    %37 = vector.load %arg5[%c0_13, %c0_14] : memref<32x32xbf16, #tpu.memory_space<vmem>>, vector<16x32xbf16>
    %cst_15 = arith.constant dense<0.000000e+00> : vector<8x32xf32>
    %38 = tpu.matmul %36, %37, %cst_15 {dimension_numbers = #tpu.dot_dimension_numbers<[1], [0], [0], [1], [0, 0, 1, 1], [], []>} : vector<8x16xbf16>, vector<16x32xbf16>, vector<8x32xf32> -> vector<8x32xf32>
    %39 = arith.addf %11, %38 : vector<8x32xf32>
    %40 = vector.extract_strided_slice %10 {offsets = [0, 16], sizes = [8, 16], strides = [1, 1]} : vector<8x96xf32> to vector<8x16xf32>
    %41 = vector.shape_cast %40 : vector<8x16xf32> to vector<1x8x16xf32>
    %42 = arith.truncf %41 : vector<1x8x16xf32> to vector<1x8x16xbf16>
    %43 = vector.extract_strided_slice %10 {offsets = [0, 48], sizes = [8, 16], strides = [1, 1]} : vector<8x96xf32> to vector<8x16xf32>
    %44 = vector.shape_cast %43 : vector<8x16xf32> to vector<1x8x16xf32>
    %45 = arith.truncf %44 : vector<1x8x16xf32> to vector<1x8x16xbf16>
    %46 = vector.extract_strided_slice %10 {offsets = [0, 80], sizes = [8, 16], strides = [1, 1]} : vector<8x96xf32> to vector<8x16xf32>
    %47 = vector.shape_cast %46 : vector<8x16xf32> to vector<1x8x16xf32>
    %48 = arith.truncf %47 : vector<1x8x16xf32> to vector<1x8x16xbf16>
    "tpu.trace_start"() <{level = 10 : i32, message = "bqd,bkd->bqk"}> : () -> ()
    %cst_16 = arith.constant dense<0.000000e+00> : vector<1x8x8xf32>
    %49 = tpu.matmul %42, %45, %cst_16 {dimension_numbers = #tpu.dot_dimension_numbers<[2], [2], [1], [1], [0, 0, 0, 1, 1, 1], [0], [0]>} : vector<1x8x16xbf16>, vector<1x8x16xbf16>, vector<1x8x8xf32> -> vector<1x8x8xf32>
    "tpu.trace_stop"() : () -> ()
    %50 = arith.addf %49, %5 : vector<1x8x8xf32>
    %cst_17 = arith.constant dense<0xFF800000> : vector<1x8xf32>
    %51 = vector.multi_reduction <maximumf>, %50, %cst_17 [2] : vector<1x8x8xf32> to vector<1x8xf32>
    %52 = vector.shape_cast %51 : vector<1x8xf32> to vector<1x8x1xf32>
    %53 = vector.broadcast %52 : vector<1x8x1xf32> to vector<1x8x8xf32>
    %54 = arith.subf %50, %53 : vector<1x8x8xf32>
    %55 = math.exp %54 : vector<1x8x8xf32>
    %cst_18 = arith.constant dense<0.000000e+00> : vector<1x8xf32>
    %56 = vector.multi_reduction <add>, %55, %cst_18 [2] : vector<1x8x8xf32> to vector<1x8xf32>
    %57 = vector.shape_cast %56 : vector<1x8xf32> to vector<1x8x1xf32>
    %58 = tpu.reciprocal %57 {approx = true} : vector<1x8x1xf32> -> vector<1x8x1xf32>
    %59 = vector.broadcast %58 : vector<1x8x1xf32> to vector<1x8x8xf32>
    %60 = arith.mulf %55, %59 : vector<1x8x8xf32>
    %61 = arith.truncf %60 : vector<1x8x8xf32> to vector<1x8x8xbf16>
    "tpu.trace_start"() <{level = 10 : i32, message = "bqk,bkd->bqd"}> : () -> ()
    %cst_19 = arith.constant dense<0.000000e+00> : vector<1x8x16xf32>
    %62 = tpu.matmul %61, %48, %cst_19 {dimension_numbers = #tpu.dot_dimension_numbers<[2], [1], [1], [2], [0, 0, 0, 1, 1, 2], [0], [0]>} : vector<1x8x8xbf16>, vector<1x8x16xbf16>, vector<1x8x16xf32> -> vector<1x8x16xf32>
    "tpu.trace_stop"() : () -> ()
    %63 = vector.shape_cast %62 : vector<1x8x16xf32> to vector<8x16xf32>
    %64 = arith.truncf %63 : vector<8x16xf32> to vector<8x16xbf16>
    %c16 = arith.constant 16 : index
    %c0_20 = arith.constant 0 : index
    %65 = vector.load %arg5[%c16, %c0_20] : memref<32x32xbf16, #tpu.memory_space<vmem>>, vector<16x32xbf16>
    %cst_21 = arith.constant dense<0.000000e+00> : vector<8x32xf32>
    %66 = tpu.matmul %64, %65, %cst_21 {dimension_numbers = #tpu.dot_dimension_numbers<[1], [0], [0], [1], [0, 0, 1, 1], [], []>} : vector<8x16xbf16>, vector<16x32xbf16>, vector<8x32xf32> -> vector<8x32xf32>
    %67 = arith.addf %39, %66 : vector<8x32xf32>
    %c0_22 = arith.constant 0 : index
    %c0_23 = arith.constant 0 : index
    %68 = vector.load %arg6[%c0_22, %c0_23] : memref<1x32xf32, #tpu.memory_space<vmem>>, vector<1x32xf32>
    %69 = vector.broadcast %68 : vector<1x32xf32> to vector<8x32xf32>
    %70 = arith.addf %67, %69 : vector<8x32xf32>
    %71 = arith.addf %70, %1 : vector<8x32xf32>
    %c0_24 = arith.constant 0 : index
    %c0_25 = arith.constant 0 : index
    %72 = vector.load %arg7[%c0_24, %c0_25] : memref<1x32xf32, #tpu.memory_space<vmem>>, vector<1x32xf32>
    %c0_26 = arith.constant 0 : index
    %c0_27 = arith.constant 0 : index
    %73 = vector.load %arg8[%c0_26, %c0_27] : memref<1x32xf32, #tpu.memory_space<vmem>>, vector<1x32xf32>
    %cst_28 = arith.constant dense<0.000000e+00> : vector<8xf32>
    %74 = vector.multi_reduction <add>, %71, %cst_28 [1] : vector<8x32xf32> to vector<8xf32>
    %75 = vector.shape_cast %74 : vector<8xf32> to vector<8x1xf32>
    %cst_29 = arith.constant 3.200000e+01 : f32
    %76 = vector.broadcast %cst_29 : f32 to vector<8x1xf32>
    %77 = arith.divf %75, %76 : vector<8x1xf32>
    %78 = vector.broadcast %77 : vector<8x1xf32> to vector<8x32xf32>
    %79 = arith.subf %71, %78 : vector<8x32xf32>
    %80 = arith.mulf %79, %79 : vector<8x32xf32>
    %cst_30 = arith.constant dense<0.000000e+00> : vector<8xf32>
    %81 = vector.multi_reduction <add>, %80, %cst_30 [1] : vector<8x32xf32> to vector<8xf32>
    %82 = vector.shape_cast %81 : vector<8xf32> to vector<8x1xf32>
    %cst_31 = arith.constant 3.200000e+01 : f32
    %83 = vector.broadcast %cst_31 : f32 to vector<8x1xf32>
    %84 = arith.divf %82, %83 : vector<8x1xf32>
    %cst_32 = arith.constant 9.99999996E-13 : f32
    %85 = vector.broadcast %cst_32 : f32 to vector<8x1xf32>
    %86 = arith.addf %84, %85 : vector<8x1xf32>
    %87 = math.rsqrt %86 : vector<8x1xf32>
    %88 = vector.broadcast %87 : vector<8x1xf32> to vector<8x32xf32>
    %89 = arith.mulf %79, %88 : vector<8x32xf32>
    %90 = vector.broadcast %72 : vector<1x32xf32> to vector<8x32xf32>
    %91 = arith.mulf %89, %90 : vector<8x32xf32>
    %92 = vector.broadcast %73 : vector<1x32xf32> to vector<8x32xf32>
    %93 = arith.addf %91, %92 : vector<8x32xf32>
    %94 = arith.truncf %93 : vector<8x32xf32> to vector<8x32xbf16>
    %cst_33 = arith.constant 0.000000e+00 : f32
    %95 = vector.broadcast %cst_33 : f32 to vector<8x32xf32>
    %c0_34 = arith.constant 0 : index
    %c0_35 = arith.constant 0 : index
    %96 = vector.load %arg9[%c0_34, %c0_35] : memref<32x128xbf16, #tpu.memory_space<vmem>>, vector<32x128xbf16>
    %cst_36 = arith.constant dense<0.000000e+00> : vector<8x128xf32>
    %97 = tpu.matmul %94, %96, %cst_36 {dimension_numbers = #tpu.dot_dimension_numbers<[1], [0], [0], [1], [0, 0, 1, 1], [], []>} : vector<8x32xbf16>, vector<32x128xbf16>, vector<8x128xf32> -> vector<8x128xf32>
    %c0_37 = arith.constant 0 : index
    %c0_38 = arith.constant 0 : index
    %98 = vector.load %arg10[%c0_37, %c0_38] : memref<1x128xf32, #tpu.memory_space<vmem>>, vector<1x128xf32>
    %99 = vector.broadcast %98 : vector<1x128xf32> to vector<8x128xf32>
    %100 = arith.addf %97, %99 : vector<8x128xf32>
    %cst_39 = arith.constant 5.000000e-01 : f32
    %101 = vector.broadcast %cst_39 : f32 to vector<8x128xf32>
    %102 = arith.mulf %101, %100 : vector<8x128xf32>
    %cst_40 = arith.constant 4.471500e-02 : f32
    %103 = vector.broadcast %cst_40 : f32 to vector<8x128xf32>
    %104 = arith.mulf %103, %100 : vector<8x128xf32>
    %105 = arith.mulf %104, %100 : vector<8x128xf32>
    %106 = arith.mulf %105, %100 : vector<8x128xf32>
    %107 = arith.addf %100, %106 : vector<8x128xf32>
    %cst_41 = arith.constant 0.797884583 : f32
    %108 = vector.broadcast %cst_41 : f32 to vector<8x128xf32>
    %109 = arith.mulf %108, %107 : vector<8x128xf32>
    %110 = math.tanh %109 : vector<8x128xf32>
    %cst_42 = arith.constant 1.000000e+00 : f32
    %111 = vector.broadcast %cst_42 : f32 to vector<8x128xf32>
    %112 = arith.addf %111, %110 : vector<8x128xf32>
    %113 = arith.mulf %102, %112 : vector<8x128xf32>
    %114 = arith.truncf %113 : vector<8x128xf32> to vector<8x128xbf16>
    %c0_43 = arith.constant 0 : index
    %c0_44 = arith.constant 0 : index
    %115 = vector.load %arg11[%c0_43, %c0_44] : memref<128x32xbf16, #tpu.memory_space<vmem>>, vector<128x32xbf16>
    %cst_45 = arith.constant dense<0.000000e+00> : vector<8x32xf32>
    %116 = tpu.matmul %114, %115, %cst_45 {dimension_numbers = #tpu.dot_dimension_numbers<[1], [0], [0], [1], [0, 0, 1, 1], [], []>} : vector<8x128xbf16>, vector<128x32xbf16>, vector<8x32xf32> -> vector<8x32xf32>
    %117 = arith.addf %95, %116 : vector<8x32xf32>
    %c0_46 = arith.constant 0 : index
    %c0_47 = arith.constant 0 : index
    %118 = vector.load %arg12[%c0_46, %c0_47] : memref<1x32xf32, #tpu.memory_space<vmem>>, vector<1x32xf32>
    %119 = vector.broadcast %118 : vector<1x32xf32> to vector<8x32xf32>
    %120 = arith.addf %117, %119 : vector<8x32xf32>
    %121 = arith.addf %120, %93 : vector<8x32xf32>
    %c0_48 = arith.constant 0 : index
    %c0_49 = arith.constant 0 : index
    %122 = vector.load %arg13[%c0_48, %c0_49] : memref<1x32xf32, #tpu.memory_space<vmem>>, vector<1x32xf32>
    %c0_50 = arith.constant 0 : index
    %c0_51 = arith.constant 0 : index
    %123 = vector.load %arg14[%c0_50, %c0_51] : memref<1x32xf32, #tpu.memory_space<vmem>>, vector<1x32xf32>
    %cst_52 = arith.constant dense<0.000000e+00> : vector<8xf32>
    %124 = vector.multi_reduction <add>, %121, %cst_52 [1] : vector<8x32xf32> to vector<8xf32>
    %125 = vector.shape_cast %124 : vector<8xf32> to vector<8x1xf32>
    %cst_53 = arith.constant 3.200000e+01 : f32
    %126 = vector.broadcast %cst_53 : f32 to vector<8x1xf32>
    %127 = arith.divf %125, %126 : vector<8x1xf32>
    %128 = vector.broadcast %127 : vector<8x1xf32> to vector<8x32xf32>
    %129 = arith.subf %121, %128 : vector<8x32xf32>
    %130 = arith.mulf %129, %129 : vector<8x32xf32>
    %cst_54 = arith.constant dense<0.000000e+00> : vector<8xf32>
    %131 = vector.multi_reduction <add>, %130, %cst_54 [1] : vector<8x32xf32> to vector<8xf32>
    %132 = vector.shape_cast %131 : vector<8xf32> to vector<8x1xf32>
    %cst_55 = arith.constant 3.200000e+01 : f32
    %133 = vector.broadcast %cst_55 : f32 to vector<8x1xf32>
    %134 = arith.divf %132, %133 : vector<8x1xf32>
    %cst_56 = arith.constant 9.99999996E-13 : f32
    %135 = vector.broadcast %cst_56 : f32 to vector<8x1xf32>
    %136 = arith.addf %134, %135 : vector<8x1xf32>
    %137 = math.rsqrt %136 : vector<8x1xf32>
    %138 = vector.broadcast %137 : vector<8x1xf32> to vector<8x32xf32>
    %139 = arith.mulf %129, %138 : vector<8x32xf32>
    %140 = vector.broadcast %122 : vector<1x32xf32> to vector<8x32xf32>
    %141 = arith.mulf %139, %140 : vector<8x32xf32>
    %142 = vector.broadcast %123 : vector<1x32xf32> to vector<8x32xf32>
    %143 = arith.addf %141, %142 : vector<8x32xf32>
    %144 = vector.shape_cast %143 : vector<8x32xf32> to vector<1x8x32xf32>
    %c0_57 = arith.constant 0 : index
    %c0_58 = arith.constant 0 : index
    %c0_59 = arith.constant 0 : index
    %145 = vector.load %arg15[%c0_57, %c0_58, %c0_59] : memref<1x8x32xf32, #tpu.memory_space<vmem>>, vector<1x8x32xf32>
    tpu.vector_store %arg15[%c0_57, %c0_58, %c0_59], %144 {strides = array<i32>} : memref<1x8x32xf32, #tpu.memory_space<vmem>>, vector<1x8x32xf32>,
    return
  }
  func.func @transform_0(%arg0: i32) -> (i32, i32, i32) {
    %c0_i32 = arith.constant 0 : i32
    %c0_i32_0 = arith.constant 0 : i32
    %c0_i32_1 = arith.constant 0 : i32
    return %arg0, %c0_i32, %c0_i32_0 : i32, i32, i32
  }
  func.func @transform_1(%arg0: i32) -> (i32, i32) {
    %c0_i32 = arith.constant 0 : i32
    %c0_i32_0 = arith.constant 0 : i32
    %c0_i32_1 = arith.constant 0 : i32
    return %c0_i32, %c0_i32_0 : i32, i32
  }
  func.func @transform_2(%arg0: i32) -> (i32, i32) {
    %c0_i32 = arith.constant 0 : i32
    %c0_i32_0 = arith.constant 0 : i32
    %c0_i32_1 = arith.constant 0 : i32
    return %c0_i32, %c0_i32_0 : i32, i32
  }
  func.func @transform_3(%arg0: i32) -> (i32, i32) {
    %c0_i32 = arith.constant 0 : i32
    %c0_i32_0 = arith.constant 0 : i32
    %c0_i32_1 = arith.constant 0 : i32
    return %c0_i32, %c0_i32_0 : i32, i32
  }
  func.func @transform_4(%arg0: i32) -> (i32, i32) {
    %c0_i32 = arith.constant 0 : i32
    %c0_i32_0 = arith.constant 0 : i32
    %c0_i32_1 = arith.constant 0 : i32
    return %c0_i32, %c0_i32_0 : i32, i32
  }
  func.func @transform_5(%arg0: i32) -> (i32, i32) {
    %c0_i32 = arith.constant 0 : i32
    %c0_i32_0 = arith.constant 0 : i32
    %c0_i32_1 = arith.constant 0 : i32
    return %c0_i32, %c0_i32_0 : i32, i32
  }
  func.func @transform_6(%arg0: i32) -> (i32, i32) {
    %c0_i32 = arith.constant 0 : i32
    %c0_i32_0 = arith.constant 0 : i32
    %c0_i32_1 = arith.constant 0 : i32
    return %c0_i32, %c0_i32_0 : i32, i32
  }
  func.func @transform_7(%arg0: i32) -> (i32, i32) {
    %c0_i32 = arith.constant 0 : i32
    %c0_i32_0 = arith.constant 0 : i32
    %c0_i32_1 = arith.constant 0 : i32
    return %c0_i32, %c0_i32_0 : i32, i32
  }
  func.func @transform_8(%arg0: i32) -> (i32, i32) {
    %c0_i32 = arith.constant 0 : i32
    %c0_i32_0 = arith.constant 0 : i32
    %c0_i32_1 = arith.constant 0 : i32
    return %c0_i32, %c0_i32_0 : i32, i32
  }
  func.func @transform_9(%arg0: i32) -> (i32, i32) {
    %c0_i32 = arith.constant 0 : i32
    %c0_i32_0 = arith.constant 0 : i32
    %c0_i32_1 = arith.constant 0 : i32
    return %c0_i32, %c0_i32_0 : i32, i32
  }
  func.func @transform_10(%arg0: i32) -> (i32, i32) {
    %c0_i32 = arith.constant 0 : i32
    %c0_i32_0 = arith.constant 0 : i32
    %c0_i32_1 = arith.constant 0 : i32
    return %c0_i32, %c0_i32_0 : i32, i32
  }
  func.func @transform_11(%arg0: i32) -> (i32, i32) {
    %c0_i32 = arith.constant 0 : i32
    %c0_i32_0 = arith.constant 0 : i32
    %c0_i32_1 = arith.constant 0 : i32
    return %c0_i32, %c0_i32_0 : i32, i32
  }
  func.func @transform_12(%arg0: i32) -> (i32, i32) {
    %c0_i32 = arith.constant 0 : i32
    %c0_i32_0 = arith.constant 0 : i32
    %c0_i32_1 = arith.constant 0 : i32
    return %c0_i32, %c0_i32_0 : i32, i32
  }
  func.func @transform_13(%arg0: i32) -> (i32, i32) {
    %c0_i32 = arith.constant 0 : i32
    %c0_i32_0 = arith.constant 0 : i32
    %c0_i32_1 = arith.constant 0 : i32
    return %c0_i32, %c0_i32_0 : i32, i32
  }
  func.func @transform_14(%arg0: i32) -> (i32, i32, i32) {
    %c0_i32 = arith.constant 0 : i32
    %c0_i32_0 = arith.constant 0 : i32
    %c0_i32_1 = arith.constant 0 : i32
    return %arg0, %c0_i32, %c0_i32_0 : i32, i32, i32
  }
}

</mosaic_0001>

<bundles_post_ra>
// kernel: tpu_custom_call.1
= control target key start
LH: loop header
LB: loop body
LE: loop exit
PB: predicated region body
PF: predicated region fallthrough
CT: control target
= control target key end

     0   :  { %s1789_s0 = inlined_call_operand.vmem [shape: f32[2,8,32], index: 0, kind: input, shape index: {}]   ;;  %s1790_s1 = inlined_call_operand.vmem [shape: bf16[8,8], index: 1, kind: input, shape index: {}]   ;;  %s1791_s2 = inlined_call_operand.vmem [shape: bf16[32,96], index: 2, kind: input, shape index: {}]   ;;  %s1792_s3 = inlined_call_operand.vmem [shape: f32[1,96], index: 3, kind: input, shape index: {}]   ;;  %s1793_s4 = inlined_call_operand.vmem [shape: bf16[32,32], index: 4, kind: input, shape index: {}]   ;;  %s1794_s5 = inlined_call_operand.vmem [shape: f32[1,32], index: 5, kind: input, shape index: {}]   ;;  %s1795_s6 = inlined_call_operand.vmem [shape: f32[1,32], index: 6, kind: input, shape index: {}]   ;;  %s1796_s7 = inlined_call_operand.vmem [shape: f32[1,32], index: 7, kind: input, shape index: {}]   ;;  %s1797_s8 = inlined_call_operand.vmem [shape: bf16[32,128], index: 8, kind: input, shape index: {}]   ;;  %s1798_s9 = inlined_call_operand.vmem [shape: f32[1,128], index: 9, kind: input, shape index: {}]   ;;  %s1799_s10 = inlined_call_operand.vmem [shape: bf16[128,32], index: 10, kind: input, shape index: {}]   ;;  %s1800_s11 = inlined_call_operand.vmem [shape: f32[1,32], index: 11, kind: input, shape index: {}]   ;;  %s1801_s12 = inlined_call_operand.vmem [shape: f32[1,32], index: 12, kind: input, shape index: {}]   ;;  %s1802_s13 = inlined_call_operand.vmem [shape: f32[1,32], index: 13, kind: input, shape index: {}]   ;;  %s1803_s14 = inlined_call_operand.hbm [shape: f32[2,8,32], index: 14, kind: output, shape index: {}]  }
   0x1   :  { %1804 = sst [smem:[#allocation5_spill]] %s1789_s0 }
   0x2   :  { %1805 = sst [smem:[#allocation6_spill]] %s1790_s1 }
   0x3   :  { %1806 = sst [smem:[#allocation7_spill]] %s1791_s2 }
   0x4   :  { %1807 = sst [smem:[#allocation8_spill]] %s1792_s3 }
   0x5   :  { %1808 = sst [smem:[#allocation9_spill]] %s1793_s4 }
   0x6   :  { %19 = vsyncpa [#allocation3], 0 }
   0x7   :  { %21 = vsyncpa [#allocation3 + $0x1], 0  ;;  %s1550_s29 = smov 0   ;;  %s1552_s30 = smov 0  }
   0x8   :  { %s1554_s15 = smov 0   ;;  %s1556_s16 = smov 0  }
   0x9 LB: > { %s1571_s17 = sadd.s32 4294967295, %s1465_s16   ;;  %s1190_s18 = sadd.s32 4294967294, %s1465_s16   ;;  %s1465_s16 = sphi %s1556_s16, %s1819_s16   ;;  %s1461_s15 = sphi %s1554_s15, %s1818_s15   ;;  %s1457_s30 = sphi %s1552_s30, %s1817_s30   ;;  %s1453_s29 = sphi %s1550_s29, %s1816_s29  }
   0xa   : > { %s1575_s19 = sadd.s32 1, %s1465_s16   ;;  %s333_s20 = sadd.s32 1, %s1461_s15 }
   0xb   : > { %s330_s21 = ssub.s32 %s1465_s16, %s1575_s19  ;;  %p343_p0 = scmp.ne.s32.totalorder %s1461_s15, %s1457_s30 }
   0xc   : > { %p331_p1 = scmp.eq.s32.totalorder %s330_s21, 0  ;;  %p344_p2 = scmp.eq.s32.totalorder %s1571_s17, 1 }
   0xd   : > { %p349_p3 = scmp.ne.s32.totalorder %s1457_s30, %s1453_s29  ;;  %p350_p4 = scmp.eq.s32.totalorder %s1190_s18, 1 }
   0xe   : > { %s1586_s22 = scalar_select %p331_p1, %s1461_s15, %s333_s20  }
   0xf   : > { %p1588_p5 = por %p344_p2, %p343_p0  ;;  %p1592_p6 = por %p350_p4, %p349_p3 }
  0x10   : > { %p1193_p7 = scmp.ge.s32.totalorder %s1465_s16, 1  ;;  %p414_p8 = scmp.lt.s32.totalorder %s1465_s16, 3 }
  0x12   : > { %p415_p9 = pnand %p1193_p7, %p414_p8 }
  0x13   : > { %s1811_s2 = sld [smem:[#allocation7_spill]] (!%p415_p9)  ;;  %v1467_v1 = vmov (!%p415_p9), 0.0   ;;  %vm1468_vm0 = vmmov (!%p415_p9), 0   ;;  %p459_p10 = scmp.lt.s32.totalorder (!%p415_p9), %s1571_s17, 1  ;;  %vm491_vm1 = vcmask (!%p415_p9), 261120   ;;  %vm539_vm2 = vcmask (!%p415_p9), 130048  }
  0x14   : > { %418 = sbr.rel (%p415_p9) target bundleno = 2964 (0xb94), region = 76  ;;  %1257 = vmatprep.subr.bf16.mxu1 (!%p415_p9), %v1467_v1  ;;  %1283 = vmatprep.subr.bf16.mxu0 (!%p415_p9), %v1467_v1  ;;  %s1812_s0 = sld [smem:[#allocation5_spill]] (!%p415_p9)  ;;  %vm604_vm3 = vcmask (!%p415_p9), 1043456   ;;  %vm586_vm4 = vcmask (!%p415_p9), 64512  }
  0x15   : > { %1261 = vmatprep.mubr.msk.bf16.mxu1 (!%p415_p9), %vm1468_vm0, %v1467_v1  ;;  %1285 = vmatprep.mubr.msk.bf16.mxu0 (!%p415_p9), %vm1468_vm0, %v1467_v1  ;;  %s1813_s3 = sld [smem:[#allocation8_spill]] (!%p415_p9)  ;;  %s1814_s1 = sld [smem:[#allocation6_spill]] (!%p415_p9) }
  0x16   : > { %s1472_s27 = smov (!%p415_p9), 112   ;;  %s1473_s28 = smov (!%p415_p9), 48  }
  0x17   : > { %s1815_s4 = sld [smem:[#allocation9_spill]] (!%p415_p9)  ;;  %s456_s21 = sand.u32 (!%p415_p9), 1, %s1457_s30  }
  0x18   : > { %s1194_s25 = sshll.u32 (!%p415_p9), %s456_s21, 3 }
  0x19   : > { %v1375_v0 = vld [vmem:[%s1811_s2] sm:$0xff] (!%p415_p9)   ;;  %v1376_v2 = vld [vmem:[%s1811_s2 + $0x8] sm:$0xff] (!%p415_p9)  }
  0x1a   : > { %1258 = vmatpush3.bf16.msra.mxu1 (!%p415_p9), %v1375_v0 }
  0x1b   : > { %1259 = vmatprep.subr.bf16.mxu1 %v1467_v1  ;;  %s460_s18 = scalar_select %p459_p10, %s1571_s17, 1  ;;  %v1196_v5 = vld [vmem:[%s1813_s3] ss:$0 sm:$0xff] }
  0x1c   : > { %v466_v16 = vld [vmem:[%s1814_s1] sm:$0xf] }
  0x1d   : > { %s1195_s20 = sshll.u32 %s460_s18, 3  ;;  %s1469_s18 = smov 64   ;;  %v467_v17 = vunpack.c.l.bf16 %v466_v16  ;;  %v1378_v51 = vld [vmem:[%s1815_s4 + $0x8] sm:$0xff]   ;;  %v1377_v57 = vld [vmem:[%s1815_s4] sm:$0xff]  }
  0x1e   : > { %1260 = vmatpush3.bf16.msra.mxu1 %v1376_v2  ;;  %s462_s26 = scalar_lea.vmem %s1812_s0, %s1195_s20  ;;  %s1470_s20 = smov 96  }
  0x1f   : > { %1265 = vmatprep.subr.bf16.mxu1 %v1467_v1  ;;  %v1617_v3 = vld [vmem:[%s462_s26] sm:$0xff]  ;;  %s1471_s26 = smov 80   ;;  %s458_s0 = scalar_lea.vmem [#allocation2], %s1194_s25 }
  0x20   : > { %v465_v4 = vpack.c.bf16 %v1617_v3, %v1617_v3  ;;  %s1131_s1 = sshll.u32 %s458_s0, 4  ;;  %s1748_s1 = int_to_ptr.vmem [resolvable:$true] %s1131_s1 }
  0x22   : > { %1262 = vmatmul.mubr.msk.bf16.vlgmr.msra.gmra.mrb[0].mxu1 %vm491_vm1, %v465_v4 }
  0x23   : > { %1267 = vmatprep.mubr.msk.bf16.mxu1 %vm1468_vm0, %v1467_v1 }
  0xf5   : > { %v529_v6 = vpop.f32.mrb[0].mxu1 }
  0xf6   : > { %v530_v7 = vadd.f32 %v1196_v5, %v529_v6  ;;  %v1263_v8 = vpop.f32.mrb[1].mxu1 }
  0xf7   : > { %v532_v9 = vpop.f32.mrb[2].mxu1  ;;  %v1208_v8 = vld [vmem:[%s1794_s5] ss:$0 sm:$0xff] }
  0xf8   : > { %v1627_v10 = vpack.c.bf16 %v530_v7, %v530_v7  ;;  %v1264_v11 = vpop.f32.mrb[3].mxu1 }
  0xfa   : > { %599 = vrot.lane.b32.xlu1 %v1627_v10, %s1469_s18  ;;  %537 = vrot.lane.b32.xlu0 %v1627_v10, %s1470_s20  ;;  %s1227_s20 = sshll.u32 %s1571_s17, 7  ;;  %s1474_s17 = smov [#allocation2]  }
  0xfb   : > { %s1746_s4 = scalar_lea.hbm %s1803_s14, %s1227_s20  ;;  %s1407_s25 = sshll.u32 %s1474_s17, 4  ;;  %s1408_s25 = int_to_ptr.vmem [resolvable:$false] %s1407_s25 }
  0xfc   : > { %p1410_p0 = scmp.lt.s32.totalorder %s1748_s1, %s1408_s25 }
 0x16c   : > { %v538_v12 = vpop.permute.xlu0 %537  ;;  %v600_v14 = vpop.permute.xlu1 %599 }
 0x16d   : > { %v544_v13 = vsel %vm539_vm2, %v538_v12, 0  ;;  %v606_v15 = vsel %vm604_vm3, %v600_v14, 0 }
 0x16e   : > { %1266 = vmatpush3.bf16.xpose.msra.mxu1 %v544_v13 }
 0x16f   : > { %1271 = vmatprep.subr.bf16.mxu1 %v1467_v1 }
 0x175   : > { %1268 = vmatmul.mubr.msk.bf16.vlgmr.msra.gmra.mrb[4].mxu1 %vm539_vm2, %v1627_v10 }
 0x176   : > { %1272 = vmatpush3.bf16.msra.mxu1 %v606_v15  ;;  %1273 = vmatprep.mubr.msk.bf16.mxu1 %vm1468_vm0, %v1467_v1 }
 0x177   : > { %1277 = vmatprep.subr.bf16.mxu1 %v1467_v1 }
 0x248   : > { %v580_v18 = vpop.f32.mrb[4].mxu1 }
 0x249   : > { %v581_v19 = vadd.f32 %v580_v18, %v467_v17  ;;  %v1269_v20 = vpop.f32.mrb[5].mxu1 }
 0x24a   : > { %v583_v21 = vpop.f32.mrb[6].mxu1 }
 0x24b   : > { %v1270_v22 = vpop.f32.mrb[7].mxu1  ;;  %v587_v23 = vsel %vm586_vm4, %v581_v19, -inf  ;;  %v1379_v21 = vld [vmem:[%s1797_s8] sm:$0xff]  }
 0x24c   : > { %588 = vmax.xlane.f32.xlu0 %v587_v23  ;;  %v1380_v22 = vld [vmem:[%s1797_s8 + $0x8] sm:$0xff]  }
 0x24d   : > { %v1382_v23 = vld [vmem:[%s1799_s10 + $0x8] sm:$0xff]  }
 0x2d9   : > { %v589_v24 = vpop.xlane.xlu0 %588 }
 0x2da   : > { %v590_v25 = vsub.f32 %v581_v19, %v589_v24  ;;  %v1383_v24 = vld [vmem:[%s1799_s10 + $0x10] sm:$0xff]  }
 0x2dc   : > { %v591_v26 = vmul.f32 1.442695, %v590_v25 }
 0x2de   : > { %1389 = vpow2.f32 %v591_v26 }
 0x2e8   : > { %v1390_v27 = vpop.eup %1389 }
 0x2e9   : > { %v593_v28 = vsel %vm586_vm4, %v1390_v27, 0.0 }
 0x2ea   : > { %594 = vadd.xlane.f32.xlu1 %v593_v28 }
 0x2fb   : > { %653 = vrot.lane.b32.xlu1 %v1627_v10, %s1471_s26  ;;  %s1118_s26 = scalar_lea.sflag [#allocation3], %s456_s21 }
 0x2ff   : > { %651 = vrot.lane.b32.xlu1 %v1627_v10, %s1472_s27  ;;  %s1403_s27 = scalar_lea.vmem %s1748_s1, 128 }
 0x300   : > { %p1404_p11 = scmp.ne.s32.totalorder %s1748_s1, %s1403_s27 }
 0x302   : > { %p1405_p12 = pnand %p1404_p11, %p1588_p5 }
 0x304   : > { %p1406_p13 = pneg %p1405_p12 }
 0x377   : > { %v595_v29 = vpop.xlane.xlu1 %594 }
 0x378   : > { %1391 = vrcp.f32 %v595_v29  ;;  %v1209_v29 = vld [vmem:[%s1795_s6] ss:$0 sm:$0xff] }
 0x37b   : > { %v654_v32 = vpop.permute.xlu1 %653 }
 0x37c   : > { %v659_v34 = vsel %vm539_vm2, %v654_v32, 0 }
 0x37f   : > { %v652_v35 = vpop.permute.xlu1 %651 }
 0x382   : > { %v1392_v30 = vpop.eup %1391 }
 0x383   : > { %v597_v31 = vmul.f32 %v1392_v30, %v1390_v27 }
 0x385   : > { %v598_v33 = vpack.c.bf16 %v597_v31, %v597_v31  ;;  %v1210_v31 = vld [vmem:[%s1796_s7] ss:$0 sm:$0xff] }
 0x387   : > { %1274 = vmatmul.mubr.msk.bf16.vlgmr.msra.gmra.mrb[8].mxu1 %vm586_vm4, %v598_v33 }
 0x388   : > { %1278 = vmatpush3.bf16.xpose.msra.mxu1 %v659_v34  ;;  %1279 = vmatprep.mubr.msk.bf16.mxu1 %vm1468_vm0, %v1467_v1 }
 0x389   : > { %1289 = vmatprep.subr.bf16.mxu1 %v1467_v1 }
 0x38f   : > { %1280 = vmatmul.mubr.msk.bf16.vlgmr.msra.gmra.mrb[12].mxu1 %vm539_vm2, %v652_v35  ;;  %v1384_v35 = vld [vmem:[%s1799_s10 + $0x18] sm:$0xff]  }
 0x390   : > { %1291 = vmatprep.mubr.msk.bf16.mxu1 %vm1468_vm0, %v1467_v1  ;;  %1290 = vmatpush3.bf16.msra.mxu1 %v1378_v51  ;;  %v1215_v51 = vld [vmem:[%s1800_s11] ss:$0 sm:$0xff] }
 0x391   : > { %1301 = vmatprep.subr.bf16.mxu1 %v1467_v1 }
 0x45a   : > { %v642_v36 = vpop.f32.mrb[8].mxu1 }
 0x45b   : > { %v1275_v37 = vpop.f32.mrb[9].mxu1  ;;  %v648_v59 = vpack.c.bf16 %v642_v36, %v642_v36  ;;  %v1385_v36 = vld [vmem:[%s1799_s10 + $0x20] sm:$0xff]  }
 0x45c   : > { %v645_v38 = vpop.f32.mrb[10].mxu1  ;;  %v1386_v37 = vld [vmem:[%s1799_s10 + $0x28] sm:$0xff]  }
 0x45d   : > { %v1276_v39 = vpop.f32.mrb[11].mxu1  ;;  %v1387_v38 = vld [vmem:[%s1799_s10 + $0x30] sm:$0xff]  }
 0x45e   : > { %v1388_v39 = vld [vmem:[%s1799_s10 + $0x38] sm:$0xff]  }
 0x462   : > { %v695_v40 = vpop.f32.mrb[12].mxu1 }
 0x463   : > { %v696_v41 = vadd.f32 %v695_v40, %v467_v17  ;;  %v1281_v42 = vpop.f32.mrb[13].mxu1  ;;  %v1211_v40 = vld [vmem:[%s1798_s9] ss:$0 sm:$0xff] }
 0x464   : > { %v698_v43 = vpop.f32.mrb[14].mxu1 }
 0x465   : > { %v1282_v44 = vpop.f32.mrb[15].mxu1  ;;  %v701_v45 = vsel %vm586_vm4, %v696_v41, -inf }
 0x466   : > { %702 = vmax.xlane.f32.xlu1 %v701_v45 }
 0x4f3   : > { %v703_v46 = vpop.xlane.xlu1 %702 }
 0x4f4   : > { %v704_v47 = vsub.f32 %v696_v41, %v703_v46 }
 0x4f6   : > { %v705_v48 = vmul.f32 1.442695, %v704_v47 }
 0x4f8   : > { %1393 = vpow2.f32 %v705_v48 }
 0x502   : > { %v1394_v49 = vpop.eup %1393 }
 0x503   : > { %v707_v50 = vsel %vm586_vm4, %v1394_v49, 0.0 }
 0x504   : > { %708 = vadd.xlane.f32.xlu0 %v707_v50 }
 0x51a   : > { %713 = vrot.lane.b32.xlu0 %v1627_v10, %s1473_s28  ;;  %s1409_s28 = scalar_lea.vmem %s1408_s25, 256 }
 0x51b   : > { %p1411_p1 = scmp.lt.s32.totalorder %s1409_s28, %s1403_s27 }
 0x51d   : > { %p1412_p2 = por %p1411_p1, %p1410_p0 }
 0x51f   : > { %p1413_p3 = pnand %p1412_p2, %p1406_p13 }
 0x591   : > { %v709_v52 = vpop.xlane.xlu0 %708 }
 0x592   : > { %1395 = vrcp.f32 %v709_v52 }
 0x595   : > { %v714_v53 = vpop.permute.xlu0 %713 }
 0x596   : > { %v719_v54 = vsel %vm604_vm3, %v714_v53, 0 }
 0x597   : > { %1284 = vmatpush3.bf16.msra.mxu0 %v719_v54 }
 0x598   : > { %1295 = vmatprep.subr.bf16.mxu0 %v1467_v1 }
 0x59c   : > { %v1396_v55 = vpop.eup %1395 }
 0x59d   : > { %v711_v56 = vmul.f32 %v1396_v55, %v1394_v49 }
 0x59f   : > { %v712_v58 = vpack.c.bf16 %v711_v56, %v711_v56 }
 0x5a1   : > { %1286 = vmatmul.mubr.msk.bf16.vlgmr.msra.gmra.mrb[0].mxu0 %vm586_vm4, %v712_v58 }
 0x5a2   : > { %1296 = vmatpush3.bf16.msra.mxu0 %v1377_v57  ;;  %1297 = vmatprep.mubr.msk.bf16.mxu0 %vm1468_vm0, %v1467_v1 }
 0x5a3   : > { %1309 = vmatprep.subr.bf16.mxu0 %v1467_v1 }
 0x5a9   : > { %1298 = vmatmul.mubr.msk.bf16.vlgmr.msra.gmra.mrb[4].mxu0 %vm539_vm2, %v648_v59 }
 0x5aa   : > { %1325 = vmatprep.mubr.msk.bf16.mxu0 %vm1468_vm0, %v1467_v1 }
 0x674   : > { %v755_v60 = vpop.f32.mrb[0].mxu0 }
 0x675   : > { %v761_v61 = vpack.c.bf16 %v755_v60, %v755_v60  ;;  %v1287_v62 = vpop.f32.mrb[1].mxu0 }
 0x676   : > { %v758_v63 = vpop.f32.mrb[2].mxu0 }
 0x677   : > { %v1288_v0 = vpop.f32.mrb[3].mxu0  ;;  %1292 = vmatmul.mubr.msk.bf16.vlgmr.msra.gmra.mrb[16].mxu1 %vm539_vm2, %v761_v61 }
 0x678   : > { %1305 = vmatprep.mubr.msk.bf16.mxu1 %vm1468_vm0, %v1467_v1  ;;  %1302 = vmatpush3.bf16.msra.mxu1 %v1379_v21 }
 0x679   : > { %1303 = vmatprep.subr.bf16.mxu1 %v1467_v1 }
 0x67c   : > { %v856_v2 = vpop.f32.mrb[4].mxu0  ;;  %1304 = vmatpush3.bf16.msra.mxu1 %v1380_v22 }
 0x67d   : > { %v1299_v4 = vpop.f32.mrb[5].mxu0 }
 0x67e   : > { %v859_v5 = vpop.f32.mrb[6].mxu0 }
 0x67f   : > { %v1300_v6 = vpop.f32.mrb[7].mxu0 }
 0x680   : > { %v1224_v6 = vld [vmem:[%s1801_s12] ss:$0 sm:$0xff] }
 0x74a   : > { %v807_v7 = vpop.f32.mrb[16].mxu1 }
 0x74b   : > { %v857_v9 = vadd.f32 %v856_v2, %v807_v7  ;;  %v1293_v10 = vpop.f32.mrb[17].mxu1 }
 0x74c   : > { %v810_v11 = vpop.f32.mrb[18].mxu1 }
 0x74d   : > { %v869_v12 = vadd.f32 %v1208_v8, %v857_v9  ;;  %v1294_v13 = vpop.f32.mrb[19].mxu1  ;;  %v1225_v8 = vld [vmem:[%s1802_s13] ss:$0 sm:$0xff] }
 0x74f   : > { %v870_v14 = vadd.f32 %v869_v12, %v1617_v3  ;;  %v1381_v3 = vld [vmem:[%s1799_s10] sm:$0xff]  }
 0x750   : > { %1310 = vmatpush3.bf16.msra.mxu0 %v1381_v3 }
 0x751   : > { %v873_v15 = vsel %vm491_vm1, %v870_v14, 0.0  ;;  %1311 = vmatprep.subr.bf16.mxu0 %v1467_v1 }
 0x752   : > { %874 = vadd.xlane.f32.xlu0 %v873_v15 }
 0x754   : > { %1312 = vmatpush3.bf16.msra.mxu0 %v1382_v23 }
 0x755   : > { %1313 = vmatprep.subr.bf16.mxu0 %v1467_v1 }
 0x758   : > { %1314 = vmatpush3.bf16.msra.mxu0 %v1383_v24 }
 0x759   : > { %1315 = vmatprep.subr.bf16.mxu0 %v1467_v1 }
 0x75c   : > { %1316 = vmatpush3.bf16.msra.mxu0 %v1384_v35 }
 0x75d   : > { %1317 = vmatprep.subr.bf16.mxu0 %v1467_v1 }
 0x760   : > { %1318 = vmatpush3.bf16.msra.mxu0 %v1385_v36 }
 0x761   : > { %1319 = vmatprep.subr.bf16.mxu0 %v1467_v1 }
 0x764   : > { %1320 = vmatpush3.bf16.msra.mxu0 %v1386_v37 }
 0x765   : > { %1321 = vmatprep.subr.bf16.mxu0 %v1467_v1 }
 0x768   : > { %1322 = vmatpush3.bf16.msra.mxu0 %v1387_v38 }
 0x769   : > { %1323 = vmatprep.subr.bf16.mxu0 %v1467_v1 }
 0x76c   : > { %1324 = vmatpush3.bf16.msra.mxu0 %v1388_v39 }
 0x7df   : > { %v875_v16 = vpop.xlane.xlu0 %874 }
 0x7e0   : > { %v877_v17 = vmul.f32 0.03125, %v875_v16 }
 0x7e2   : > { %v878_v18 = vsub.f32 %v870_v14, %v877_v17 }
 0x7e4   : > { %v879_v19 = vmul.f32 %v878_v18, %v878_v18 }
 0x7e6   : > { %v880_v20 = vsel %vm491_vm1, %v879_v19, 0.0 }
 0x7e7   : > { %881 = vadd.xlane.f32.xlu1 %v880_v20 }
 0x874   : > { %v882_v25 = vpop.xlane.xlu1 %881 }
 0x875   : > { %v883_v26 = vmul.f32 0.03125, %v882_v25 }
 0x877   : > { %v884_v27 = vadd.f32 1e-12, %v883_v26 }
 0x879   : > { %1397 = vrsqrt.f32 %v884_v27 }
 0x883   : > { %v1398_v28 = vpop.eup %1397 }
 0x884   : > { %v886_v30 = vmul.f32 %v1398_v28, %v878_v18 }
 0x886   : > { %v893_v32 = vmul.f32 %v1209_v29, %v886_v30 }
 0x888   : > { %v900_v33 = vadd.f32 %v1210_v31, %v893_v32 }
 0x88a   : > { %v901_v34 = vpack.c.bf16 %v900_v33, %v900_v33 }
 0x88c   : > { %1306 = vmatmul.mubr.msk.bf16.vlgmr.msra.gmra.mrb[20].mxu1 %vm491_vm1, %v901_v34 }
 0x95f   : > { %v962_v41 = vpop.f32.mrb[20].mxu1 }
 0x960   : > { %v963_v42 = vadd.f32 %v1211_v40, %v962_v41  ;;  %v1307_v43 = vpop.f32.mrb[21].mxu1 }
 0x961   : > { %v965_v44 = vpop.f32.mrb[22].mxu1 }
 0x962   : > { %v970_v45 = vmul.f32 0.70710677, %v963_v42  ;;  %v1308_v46 = vpop.f32.mrb[23].mxu1  ;;  %v968_v48 = vmul.f32 0.5, %v963_v42 }
 0x964   : > { %1399 = verf.f32 %v970_v45 }
 0x96e   : > { %v1400_v47 = vpop.eup %1399 }
 0x96f   : > { %v972_v49 = vadd.f32 1.0, %v1400_v47 }
 0x971   : > { %v973_v1 = vmul.f32 %v972_v49, %v968_v48 }
 0x973   : > { %v974_v50 = vpack.c.bf16 %v973_v1, %v973_v1 }
 0x975   : > { %1326 = vmatmul.mubr.bf16.vlgmr.msra.gmra.mrb[8].mxu0 %v974_v50 }
 0xa48   : > { %v1080_v52 = vpop.f32.mrb[8].mxu0 }
 0xa49   : > { %v1081_v53 = vadd.f32 %v1215_v51, %v1080_v52  ;;  %v1327_v54 = vpop.f32.mrb[9].mxu0 }
 0xa4a   : > { %v1083_v55 = vpop.f32.mrb[10].mxu0 }
 0xa4b   : > { %v1328_v56 = vpop.f32.mrb[11].mxu0  ;;  %v1086_v57 = vadd.f32 %v1081_v53, %v900_v33 }
 0xa4d   : > { %v1089_v58 = vsel %vm491_vm1, %v1086_v57, 0.0 }
 0xa4e   : > { %1090 = vadd.xlane.f32.xlu1 %v1089_v58 }
 0xadb   : > { %v1091_v59 = vpop.xlane.xlu1 %1090 }
 0xadc   : > { %v1092_v60 = vmul.f32 0.03125, %v1091_v59 }
 0xade   : > { %v1093_v61 = vsub.f32 %v1086_v57, %v1092_v60 }
 0xae0   : > { %v1094_v62 = vmul.f32 %v1093_v61, %v1093_v61 }
 0xae2   : > { %v1095_v63 = vsel %vm491_vm1, %v1094_v62, 0.0 }
 0xae3   : > { %1096 = vadd.xlane.f32.xlu1 %v1095_v63 }
 0xb70   : > { %v1097_v0 = vpop.xlane.xlu1 %1096 }
 0xb71   : > { %v1098_v2 = vmul.f32 0.03125, %v1097_v0 }
 0xb73   : > { %v1099_v4 = vadd.f32 1e-12, %v1098_v2 }
 0xb75   : > { %1401 = vrsqrt.f32 %v1099_v4 }
 0xb7f   : > { %v1402_v5 = vpop.eup %1401 }
 0xb80   : > { %v1101_v7 = vmul.f32 %v1402_v5, %v1093_v61 }
 0xb82   : > { %v1108_v9 = vmul.f32 %v1224_v6, %v1101_v7 }
 0xb84   : > { %v1115_v10 = vadd.f32 %v1225_v8, %v1108_v9 }
 0xb86   : > { %1116 = vst.msk [vmem:[%s458_s0] sm:$0xff] %vm491_vm1, %v1115_v10 }
 0xb87   : > { %1416 = shalt.err (!%p1413_p3)
}
 0xb88   : > { %s1417_s2 = scalar_lea.hbm %s1746_s4, 128  ;;  %s1421_s18 = scalar_lea.hbm %s1803_s14, 256 }
 0xb89   : > { %p1418_p4 = scmp.ne.s32.totalorder %s1746_s4, %s1417_s2  ;;  %p1422_p9 = scmp.lt.u32.totalorder %s1746_s4, %s1803_s14 }
 0xb8a   : > { %p1423_p10 = scmp.lt.u32.totalorder %s1421_s18, %s1417_s2  ;;  %p1425_p12 = scmp.lt.u32.totalorder %s1417_s2, %s1746_s4 }
 0xb8b   : > { %p1419_p7 = pnand %p1418_p4, %p1588_p5 }
 0xb8c   : > { %p1424_p11 = por %p1423_p10, %p1422_p9 }
 0xb8d   : > { %p1420_p8 = pneg %p1419_p7 }
 0xb8e   : > { %p1426_p13 = por %p1425_p12, %p1424_p11 }
 0xb90   : > { %p1427_p0 = pnand %p1426_p13, %p1420_p8 }
 0xb92   : > { %1430 = shalt.err (!%p1427_p0)
}
 0xb93   : > { %1329 = dma.vmem_to_hbm [thread:$0]  (%p1588_p5), %s1748_s1, 128, %s1746_s4, %s1118_s26  }
 0xb94 PF: > { %p1335_p1 = scmp.ge.s32.totalorder %s1465_s16, 2  ;;  %s1143_s27 = sand.u32 1, %s1453_s29  }
 0xb95   : > { %s1144_s17 = scalar_lea.sflag [#allocation3], %s1143_s27 }
 0xb96   : > { %p1332_p2 = pnand %p1335_p1, %p1592_p6 }
 0xb98   : > { %1448 = dma.done.wait (!%p1332_p2), %s1144_s17, 128  }
 0xb99   : > { %1450 = vsyncadd (!%p1332_p2), %s1144_s17, 4294967168  ;;  %p24_p3 = scmp.ge.s32.totalorder %s1575_s19, 4   ;;  %s1816_s29 = smov %s1457_s30 }
 0xb9a   : > { %s1817_s30 = smov %s1461_s15  ;;  %s1818_s15 = smov %s1586_s22 }
 0xb9b   : > { %s1819_s16 = smov %s1575_s19  ;;  %26 = sbr.rel (!%p24_p3) target bundleno = 9 (0x9), region = 111 }
 0xba2   :  { %1149 = vsyncpa [#allocation3], 1 }
 0xba3   :  { %1151 = vsyncpa [#allocation3 + $0x1], 1 }

// kernel: tpu_custom_call.1
= control target key start
LH: loop header
LB: loop body
LE: loop exit
PB: predicated region body
PF: predicated region fallthrough
CT: control target
= control target key end

     0   :  { %s1792_s0 = inlined_call_operand.vmem [shape: f32[2,8,32], index: 0, kind: input, shape index: {}]   ;;  %s1793_s1 = inlined_call_operand.vmem [shape: bf16[8,8], index: 1, kind: input, shape index: {}]   ;;  %s1794_s2 = inlined_call_operand.vmem [shape: bf16[32,96], index: 2, kind: input, shape index: {}]   ;;  %s1795_s3 = inlined_call_operand.vmem [shape: f32[1,96], index: 3, kind: input, shape index: {}]   ;;  %s1796_s4 = inlined_call_operand.vmem [shape: bf16[32,32], index: 4, kind: input, shape index: {}]   ;;  %s1797_s5 = inlined_call_operand.vmem [shape: f32[1,32], index: 5, kind: input, shape index: {}]   ;;  %s1798_s6 = inlined_call_operand.vmem [shape: f32[1,32], index: 6, kind: input, shape index: {}]   ;;  %s1799_s7 = inlined_call_operand.vmem [shape: f32[1,32], index: 7, kind: input, shape index: {}]   ;;  %s1800_s8 = inlined_call_operand.vmem [shape: bf16[32,128], index: 8, kind: input, shape index: {}]   ;;  %s1801_s9 = inlined_call_operand.vmem [shape: f32[1,128], index: 9, kind: input, shape index: {}]   ;;  %s1802_s10 = inlined_call_operand.vmem [shape: bf16[128,32], index: 10, kind: input, shape index: {}]   ;;  %s1803_s11 = inlined_call_operand.vmem [shape: f32[1,32], index: 11, kind: input, shape index: {}]   ;;  %s1804_s12 = inlined_call_operand.vmem [shape: f32[1,32], index: 12, kind: input, shape index: {}]   ;;  %s1805_s13 = inlined_call_operand.vmem [shape: f32[1,32], index: 13, kind: input, shape index: {}]   ;;  %s1806_s14 = inlined_call_operand.hbm [shape: f32[2,8,32], index: 14, kind: output, shape index: {}]  }
   0x1   :  { %1807 = sst [smem:[#allocation5_spill]] %s1792_s0 }
   0x2   :  { %1808 = sst [smem:[#allocation6_spill]] %s1793_s1 }
   0x3   :  { %1809 = sst [smem:[#allocation7_spill]] %s1794_s2 }
   0x4   :  { %1810 = sst [smem:[#allocation8_spill]] %s1795_s3 }
   0x5   :  { %1811 = sst [smem:[#allocation9_spill]] %s1796_s4 }
   0x6   :  { %19 = vsyncpa [#allocation3], 0 }
   0x7   :  { %21 = vsyncpa [#allocation3 + $0x1], 0  ;;  %s1553_s29 = smov 0   ;;  %s1555_s30 = smov 0  }
   0x8   :  { %s1557_s15 = smov 0   ;;  %s1559_s16 = smov 0  }
   0x9 LB: > { %s1574_s17 = sadd.s32 4294967295, %s1468_s16   ;;  %s1193_s18 = sadd.s32 4294967294, %s1468_s16   ;;  %s1468_s16 = sphi %s1559_s16, %s1822_s16   ;;  %s1464_s15 = sphi %s1557_s15, %s1821_s15   ;;  %s1460_s30 = sphi %s1555_s30, %s1820_s30   ;;  %s1456_s29 = sphi %s1553_s29, %s1819_s29  }
   0xa   : > { %s1578_s19 = sadd.s32 1, %s1468_s16   ;;  %s333_s20 = sadd.s32 1, %s1464_s15 }
   0xb   : > { %s330_s21 = ssub.s32 %s1468_s16, %s1578_s19  ;;  %p343_p0 = scmp.ne.s32.totalorder %s1464_s15, %s1460_s30 }
   0xc   : > { %p331_p1 = scmp.eq.s32.totalorder %s330_s21, 0  ;;  %p344_p2 = scmp.eq.s32.totalorder %s1574_s17, 1 }
   0xd   : > { %p349_p3 = scmp.ne.s32.totalorder %s1460_s30, %s1456_s29  ;;  %p350_p4 = scmp.eq.s32.totalorder %s1193_s18, 1 }
   0xe   : > { %s1589_s22 = scalar_select %p331_p1, %s1464_s15, %s333_s20  }
   0xf   : > { %p1591_p5 = por %p344_p2, %p343_p0  ;;  %p1595_p6 = por %p350_p4, %p349_p3 }
  0x10   : > { %p1196_p7 = scmp.ge.s32.totalorder %s1468_s16, 1  ;;  %p414_p8 = scmp.lt.s32.totalorder %s1468_s16, 3 }
  0x12   : > { %p415_p9 = pnand %p1196_p7, %p414_p8 }
  0x13   : > { %s1814_s2 = sld [smem:[#allocation7_spill]] (!%p415_p9)  ;;  %v1470_v1 = vmov (!%p415_p9), 0.0   ;;  %vm1471_vm0 = vmmov (!%p415_p9), 0   ;;  %p459_p10 = scmp.lt.s32.totalorder (!%p415_p9), %s1574_s17, 1  ;;  %vm491_vm1 = vcmask (!%p415_p9), 261120   ;;  %vm539_vm2 = vcmask (!%p415_p9), 130048  }
  0x14   : > { %418 = sbr.rel (%p415_p9) target bundleno = 2972 (0xb9c), region = 76  ;;  %1260 = vmatprep.subr.bf16.mxu1 (!%p415_p9), %v1470_v1  ;;  %1286 = vmatprep.subr.bf16.mxu0 (!%p415_p9), %v1470_v1  ;;  %s1815_s0 = sld [smem:[#allocation5_spill]] (!%p415_p9)  ;;  %vm604_vm3 = vcmask (!%p415_p9), 1043456   ;;  %vm586_vm4 = vcmask (!%p415_p9), 64512  }
  0x15   : > { %1264 = vmatprep.mubr.msk.bf16.mxu1 (!%p415_p9), %vm1471_vm0, %v1470_v1  ;;  %1288 = vmatprep.mubr.msk.bf16.mxu0 (!%p415_p9), %vm1471_vm0, %v1470_v1  ;;  %s1816_s3 = sld [smem:[#allocation8_spill]] (!%p415_p9)  ;;  %s1817_s1 = sld [smem:[#allocation6_spill]] (!%p415_p9) }
  0x16   : > { %s1475_s27 = smov (!%p415_p9), 112   ;;  %s1476_s28 = smov (!%p415_p9), 48  }
  0x17   : > { %s1818_s4 = sld [smem:[#allocation9_spill]] (!%p415_p9)  ;;  %s1230_s21 = sshll.u32 (!%p415_p9), %s1574_s17, 7 }
  0x19   : > { %v1378_v0 = vld [vmem:[%s1814_s2] sm:$0xff] (!%p415_p9)   ;;  %v1379_v2 = vld [vmem:[%s1814_s2 + $0x8] sm:$0xff] (!%p415_p9)  }
  0x1a   : > { %1261 = vmatpush3.bf16.msra.mxu1 (!%p415_p9), %v1378_v0 }
  0x1b   : > { %1262 = vmatprep.subr.bf16.mxu1 %v1470_v1  ;;  %s460_s18 = scalar_select %p459_p10, %s1574_s17, 1  ;;  %v1199_v5 = vld [vmem:[%s1816_s3] ss:$0 sm:$0xff] }
  0x1c   : > { %v466_v16 = vld [vmem:[%s1817_s1] sm:$0xf]  ;;  %s1477_s17 = smov [#allocation2]  }
  0x1d   : > { %s1198_s20 = sshll.u32 %s460_s18, 3  ;;  %s1472_s18 = smov 64   ;;  %v467_v17 = vunpack.c.l.bf16 %v466_v16  ;;  %v1381_v51 = vld [vmem:[%s1818_s4 + $0x8] sm:$0xff]   ;;  %v1380_v57 = vld [vmem:[%s1818_s4] sm:$0xff]  }
  0x1e   : > { %1263 = vmatpush3.bf16.msra.mxu1 %v1379_v2  ;;  %s462_s26 = scalar_lea.vmem %s1815_s0, %s1198_s20  ;;  %s1473_s20 = smov 96  }
  0x1f   : > { %1268 = vmatprep.subr.bf16.mxu1 %v1470_v1  ;;  %v1620_v3 = vld [vmem:[%s462_s26] sm:$0xff]  ;;  %s1474_s26 = smov 80   ;;  %s1749_s4 = scalar_lea.hbm %s1806_s14, %s1230_s21 }
  0x20   : > { %v465_v4 = vpack.c.bf16 %v1620_v3, %v1620_v3 }
  0x22   : > { %1265 = vmatmul.mubr.msk.bf16.vlgmr.msra.gmra.mrb[0].mxu1 %vm491_vm1, %v465_v4 }
  0x23   : > { %1270 = vmatprep.mubr.msk.bf16.mxu1 %vm1471_vm0, %v1470_v1 }
  0xf5   : > { %v529_v6 = vpop.f32.mrb[0].mxu1 }
  0xf6   : > { %v530_v7 = vadd.f32 %v1199_v5, %v529_v6  ;;  %v1266_v8 = vpop.f32.mrb[1].mxu1 }
  0xf7   : > { %v532_v9 = vpop.f32.mrb[2].mxu1  ;;  %v1211_v8 = vld [vmem:[%s1797_s5] ss:$0 sm:$0xff] }
  0xf8   : > { %v1630_v10 = vpack.c.bf16 %v530_v7, %v530_v7  ;;  %v1267_v11 = vpop.f32.mrb[3].mxu1 }
  0xfa   : > { %599 = vrot.lane.b32.xlu1 %v1630_v10, %s1472_s18  ;;  %537 = vrot.lane.b32.xlu0 %v1630_v10, %s1473_s20 }
 0x16c   : > { %v538_v12 = vpop.permute.xlu0 %537  ;;  %v600_v14 = vpop.permute.xlu1 %599 }
 0x16d   : > { %v544_v13 = vsel %vm539_vm2, %v538_v12, 0  ;;  %v606_v15 = vsel %vm604_vm3, %v600_v14, 0 }
 0x16e   : > { %1269 = vmatpush3.bf16.xpose.msra.mxu1 %v544_v13 }
 0x16f   : > { %1274 = vmatprep.subr.bf16.mxu1 %v1470_v1 }
 0x175   : > { %1271 = vmatmul.mubr.msk.bf16.vlgmr.msra.gmra.mrb[4].mxu1 %vm539_vm2, %v1630_v10 }
 0x176   : > { %1275 = vmatpush3.bf16.msra.mxu1 %v606_v15  ;;  %1276 = vmatprep.mubr.msk.bf16.mxu1 %vm1471_vm0, %v1470_v1 }
 0x177   : > { %1280 = vmatprep.subr.bf16.mxu1 %v1470_v1 }
 0x248   : > { %v580_v18 = vpop.f32.mrb[4].mxu1 }
 0x249   : > { %v581_v19 = vadd.f32 %v580_v18, %v467_v17  ;;  %v1272_v20 = vpop.f32.mrb[5].mxu1 }
 0x24a   : > { %v583_v21 = vpop.f32.mrb[6].mxu1 }
 0x24b   : > { %v1273_v22 = vpop.f32.mrb[7].mxu1  ;;  %v587_v23 = vsel %vm586_vm4, %v581_v19, -inf  ;;  %v1382_v21 = vld [vmem:[%s1800_s8] sm:$0xff]  }
 0x24c   : > { %588 = vmax.xlane.f32.xlu0 %v587_v23  ;;  %v1383_v22 = vld [vmem:[%s1800_s8 + $0x8] sm:$0xff]  }
 0x2d9   : > { %v589_v24 = vpop.xlane.xlu0 %588 }
 0x2da   : > { %v590_v25 = vsub.f32 %v581_v19, %v589_v24 }
 0x2dc   : > { %v591_v26 = vmul.f32 1.442695, %v590_v25 }
 0x2de   : > { %1392 = vpow2.f32 %v591_v26 }
 0x2e8   : > { %v1393_v27 = vpop.eup %1392 }
 0x2e9   : > { %v593_v28 = vsel %vm586_vm4, %v1393_v27, 0.0 }
 0x2ea   : > { %594 = vadd.xlane.f32.xlu1 %v593_v28 }
 0x2fb   : > { %653 = vrot.lane.b32.xlu1 %v1630_v10, %s1474_s26  ;;  %s456_s26 = sand.u32 1, %s1460_s30  }
 0x2ff   : > { %651 = vrot.lane.b32.xlu1 %v1630_v10, %s1475_s27  ;;  %s1197_s27 = sshll.u32 %s456_s26, 3 }
 0x300   : > { %s458_s25 = scalar_lea.vmem [#allocation2], %s1197_s27  ;;  %s1410_s27 = sshll.u32 %s1477_s17, 4  ;;  %s1411_s27 = int_to_ptr.vmem [resolvable:$false] %s1410_s27 }
 0x301   : > { %s1134_s1 = sshll.u32 %s458_s25, 4  ;;  %s1412_s18 = scalar_lea.vmem %s1411_s27, 256  ;;  %s1751_s1 = int_to_ptr.vmem [resolvable:$true] %s1134_s1 }
 0x302   : > { %s1406_s0 = scalar_lea.vmem %s1751_s1, 128  ;;  %p1413_p0 = scmp.lt.s32.totalorder %s1751_s1, %s1411_s27 }
 0x303   : > { %p1407_p11 = scmp.ne.s32.totalorder %s1751_s1, %s1406_s0  ;;  %p1414_p1 = scmp.lt.s32.totalorder %s1412_s18, %s1406_s0 }
 0x305   : > { %p1408_p12 = pnand %p1407_p11, %p1591_p5  ;;  %p1415_p2 = por %p1414_p1, %p1413_p0 }
 0x307   : > { %p1409_p13 = pneg %p1408_p12 }
 0x309   : > { %p1416_p3 = pnand %p1415_p2, %p1409_p13 }
 0x377   : > { %v595_v29 = vpop.xlane.xlu1 %594 }
 0x378   : > { %1394 = vrcp.f32 %v595_v29  ;;  %v1213_v29 = vld [vmem:[%s1799_s7] ss:$0 sm:$0xff] }
 0x37b   : > { %v654_v32 = vpop.permute.xlu1 %653 }
 0x37c   : > { %v659_v34 = vsel %vm539_vm2, %v654_v32, 0 }
 0x37f   : > { %v652_v35 = vpop.permute.xlu1 %651 }
 0x382   : > { %v1395_v30 = vpop.eup %1394 }
 0x383   : > { %v597_v31 = vmul.f32 %v1395_v30, %v1393_v27  ;;  %v1212_v27 = vld [vmem:[%s1798_s6] ss:$0 sm:$0xff] }
 0x385   : > { %v598_v33 = vpack.c.bf16 %v597_v31, %v597_v31 }
 0x387   : > { %1277 = vmatmul.mubr.msk.bf16.vlgmr.msra.gmra.mrb[8].mxu1 %vm586_vm4, %v598_v33  ;;  %v1385_v33 = vld [vmem:[%s1802_s10 + $0x8] sm:$0xff]  }
 0x388   : > { %1281 = vmatpush3.bf16.xpose.msra.mxu1 %v659_v34  ;;  %1282 = vmatprep.mubr.msk.bf16.mxu1 %vm1471_vm0, %v1470_v1  ;;  %v1386_v34 = vld [vmem:[%s1802_s10 + $0x10] sm:$0xff]  }
 0x389   : > { %1292 = vmatprep.subr.bf16.mxu1 %v1470_v1 }
 0x38f   : > { %1283 = vmatmul.mubr.msk.bf16.vlgmr.msra.gmra.mrb[12].mxu1 %vm539_vm2, %v652_v35  ;;  %v1387_v35 = vld [vmem:[%s1802_s10 + $0x18] sm:$0xff]  }
 0x390   : > { %1294 = vmatprep.mubr.msk.bf16.mxu1 %vm1471_vm0, %v1470_v1  ;;  %1293 = vmatpush3.bf16.msra.mxu1 %v1381_v51 }
 0x391   : > { %1304 = vmatprep.subr.bf16.mxu1 %v1470_v1 }
 0x45a   : > { %v642_v36 = vpop.f32.mrb[8].mxu1 }
 0x45b   : > { %v1278_v37 = vpop.f32.mrb[9].mxu1  ;;  %v648_v59 = vpack.c.bf16 %v642_v36, %v642_v36  ;;  %v1388_v36 = vld [vmem:[%s1802_s10 + $0x20] sm:$0xff]  }
 0x45c   : > { %v645_v38 = vpop.f32.mrb[10].mxu1  ;;  %v1389_v37 = vld [vmem:[%s1802_s10 + $0x28] sm:$0xff]  }
 0x45d   : > { %v1279_v39 = vpop.f32.mrb[11].mxu1  ;;  %v1390_v38 = vld [vmem:[%s1802_s10 + $0x30] sm:$0xff]  }
 0x45e   : > { %v1391_v39 = vld [vmem:[%s1802_s10 + $0x38] sm:$0xff]  }
 0x462   : > { %v695_v40 = vpop.f32.mrb[12].mxu1 }
 0x463   : > { %v696_v41 = vadd.f32 %v695_v40, %v467_v17  ;;  %v1284_v42 = vpop.f32.mrb[13].mxu1  ;;  %v1214_v40 = vld [vmem:[%s1801_s9] ss:$0 sm:$0xff] }
 0x464   : > { %v698_v43 = vpop.f32.mrb[14].mxu1 }
 0x465   : > { %v1285_v44 = vpop.f32.mrb[15].mxu1  ;;  %v701_v45 = vsel %vm586_vm4, %v696_v41, -inf }
 0x466   : > { %702 = vmax.xlane.f32.xlu1 %v701_v45 }
 0x4f3   : > { %v703_v46 = vpop.xlane.xlu1 %702 }
 0x4f4   : > { %v704_v47 = vsub.f32 %v696_v41, %v703_v46 }
 0x4f6   : > { %v705_v48 = vmul.f32 1.442695, %v704_v47 }
 0x4f8   : > { %1396 = vpow2.f32 %v705_v48 }
 0x502   : > { %v1397_v49 = vpop.eup %1396 }
 0x503   : > { %v707_v50 = vsel %vm586_vm4, %v1397_v49, 0.0 }
 0x504   : > { %708 = vadd.xlane.f32.xlu0 %v707_v50 }
 0x51a   : > { %713 = vrot.lane.b32.xlu0 %v1630_v10, %s1476_s28  ;;  %s1121_s28 = scalar_lea.sflag [#allocation3], %s456_s26 }
 0x591   : > { %v709_v52 = vpop.xlane.xlu0 %708 }
 0x592   : > { %1398 = vrcp.f32 %v709_v52 }
 0x595   : > { %v714_v53 = vpop.permute.xlu0 %713 }
 0x596   : > { %v719_v54 = vsel %vm604_vm3, %v714_v53, 0 }
 0x597   : > { %1287 = vmatpush3.bf16.msra.mxu0 %v719_v54 }
 0x598   : > { %1298 = vmatprep.subr.bf16.mxu0 %v1470_v1 }
 0x59c   : > { %v1399_v55 = vpop.eup %1398 }
 0x59d   : > { %v711_v56 = vmul.f32 %v1399_v55, %v1397_v49  ;;  %v1218_v55 = vld [vmem:[%s1803_s11] ss:$0 sm:$0xff] }
 0x59f   : > { %v712_v58 = vpack.c.bf16 %v711_v56, %v711_v56 }
 0x5a1   : > { %1289 = vmatmul.mubr.msk.bf16.vlgmr.msra.gmra.mrb[0].mxu0 %vm586_vm4, %v712_v58 }
 0x5a2   : > { %1299 = vmatpush3.bf16.msra.mxu0 %v1380_v57  ;;  %1300 = vmatprep.mubr.msk.bf16.mxu0 %vm1471_vm0, %v1470_v1 }
 0x5a3   : > { %1312 = vmatprep.subr.bf16.mxu0 %v1470_v1 }
 0x5a9   : > { %1301 = vmatmul.mubr.msk.bf16.vlgmr.msra.gmra.mrb[4].mxu0 %vm539_vm2, %v648_v59 }
 0x5aa   : > { %1328 = vmatprep.mubr.msk.bf16.mxu0 %vm1471_vm0, %v1470_v1 }
 0x674   : > { %v755_v60 = vpop.f32.mrb[0].mxu0 }
 0x675   : > { %v761_v61 = vpack.c.bf16 %v755_v60, %v755_v60  ;;  %v1290_v62 = vpop.f32.mrb[1].mxu0 }
 0x676   : > { %v758_v63 = vpop.f32.mrb[2].mxu0 }
 0x677   : > { %v1291_v0 = vpop.f32.mrb[3].mxu0  ;;  %1295 = vmatmul.mubr.msk.bf16.vlgmr.msra.gmra.mrb[16].mxu1 %vm539_vm2, %v761_v61 }
 0x678   : > { %1308 = vmatprep.mubr.msk.bf16.mxu1 %vm1471_vm0, %v1470_v1  ;;  %1305 = vmatpush3.bf16.msra.mxu1 %v1382_v21 }
 0x679   : > { %1306 = vmatprep.subr.bf16.mxu1 %v1470_v1 }
 0x67c   : > { %v856_v2 = vpop.f32.mrb[4].mxu0  ;;  %1307 = vmatpush3.bf16.msra.mxu1 %v1383_v22 }
 0x67d   : > { %v1302_v4 = vpop.f32.mrb[5].mxu0 }
 0x67e   : > { %v859_v5 = vpop.f32.mrb[6].mxu0 }
 0x67f   : > { %v1303_v6 = vpop.f32.mrb[7].mxu0 }
 0x74a   : > { %v807_v7 = vpop.f32.mrb[16].mxu1 }
 0x74b   : > { %v857_v9 = vadd.f32 %v856_v2, %v807_v7  ;;  %v1296_v10 = vpop.f32.mrb[17].mxu1 }
 0x74c   : > { %v810_v11 = vpop.f32.mrb[18].mxu1  ;;  %v1227_v10 = vld [vmem:[%s1804_s12] ss:$0 sm:$0xff] }
 0x74d   : > { %v869_v12 = vadd.f32 %v1211_v8, %v857_v9  ;;  %v1297_v13 = vpop.f32.mrb[19].mxu1 }
 0x74f   : > { %v870_v14 = vadd.f32 %v869_v12, %v1620_v3  ;;  %v1384_v3 = vld [vmem:[%s1802_s10] sm:$0xff]  }
 0x750   : > { %1313 = vmatpush3.bf16.msra.mxu0 %v1384_v3  ;;  %v1228_v12 = vld [vmem:[%s1805_s13] ss:$0 sm:$0xff] }
 0x751   : > { %v873_v15 = vsel %vm491_vm1, %v870_v14, 0.0  ;;  %1314 = vmatprep.subr.bf16.mxu0 %v1470_v1 }
 0x752   : > { %874 = vadd.xlane.f32.xlu0 %v873_v15 }
 0x754   : > { %1315 = vmatpush3.bf16.msra.mxu0 %v1385_v33 }
 0x755   : > { %1316 = vmatprep.subr.bf16.mxu0 %v1470_v1 }
 0x758   : > { %1317 = vmatpush3.bf16.msra.mxu0 %v1386_v34 }
 0x759   : > { %1318 = vmatprep.subr.bf16.mxu0 %v1470_v1 }
 0x75c   : > { %1319 = vmatpush3.bf16.msra.mxu0 %v1387_v35 }
 0x75d   : > { %1320 = vmatprep.subr.bf16.mxu0 %v1470_v1 }
 0x760   : > { %1321 = vmatpush3.bf16.msra.mxu0 %v1388_v36 }
 0x761   : > { %1322 = vmatprep.subr.bf16.mxu0 %v1470_v1 }
 0x764   : > { %1323 = vmatpush3.bf16.msra.mxu0 %v1389_v37 }
 0x765   : > { %1324 = vmatprep.subr.bf16.mxu0 %v1470_v1 }
 0x768   : > { %1325 = vmatpush3.bf16.msra.mxu0 %v1390_v38 }
 0x769   : > { %1326 = vmatprep.subr.bf16.mxu0 %v1470_v1 }
 0x76c   : > { %1327 = vmatpush3.bf16.msra.mxu0 %v1391_v39 }
 0x7df   : > { %v875_v16 = vpop.xlane.xlu0 %874 }
 0x7e0   : > { %v877_v17 = vmul.f32 0.03125, %v875_v16 }
 0x7e2   : > { %v878_v18 = vsub.f32 %v870_v14, %v877_v17 }
 0x7e4   : > { %v879_v19 = vmul.f32 %v878_v18, %v878_v18 }
 0x7e6   : > { %v880_v20 = vsel %vm491_vm1, %v879_v19, 0.0 }
 0x7e7   : > { %881 = vadd.xlane.f32.xlu1 %v880_v20 }
 0x874   : > { %v882_v23 = vpop.xlane.xlu1 %881 }
 0x875   : > { %v883_v24 = vmul.f32 0.03125, %v882_v23 }
 0x877   : > { %v884_v25 = vadd.f32 1e-12, %v883_v24 }
 0x879   : > { %1400 = vrsqrt.f32 %v884_v25 }
 0x883   : > { %v1401_v26 = vpop.eup %1400 }
 0x884   : > { %v886_v28 = vmul.f32 %v1401_v26, %v878_v18 }
 0x886   : > { %v893_v30 = vmul.f32 %v1212_v27, %v886_v28 }
 0x888   : > { %v900_v31 = vadd.f32 %v1213_v29, %v893_v30 }
 0x88a   : > { %v901_v32 = vpack.c.bf16 %v900_v31, %v900_v31 }
 0x88c   : > { %1309 = vmatmul.mubr.msk.bf16.vlgmr.msra.gmra.mrb[20].mxu1 %vm491_vm1, %v901_v32 }
 0x95f   : > { %v962_v41 = vpop.f32.mrb[20].mxu1 }
 0x960   : > { %v963_v42 = vadd.f32 %v1214_v40, %v962_v41  ;;  %v1310_v43 = vpop.f32.mrb[21].mxu1 }
 0x961   : > { %v965_v44 = vpop.f32.mrb[22].mxu1 }
 0x962   : > { %v969_v45 = vmul.f32 0.044715, %v963_v42  ;;  %v1311_v46 = vpop.f32.mrb[23].mxu1  ;;  %v968_v52 = vmul.f32 0.5, %v963_v42 }
 0x964   : > { %v970_v47 = vmul.f32 %v969_v45, %v963_v42 }
 0x966   : > { %v971_v48 = vmul.f32 %v970_v47, %v963_v42 }
 0x968   : > { %v972_v49 = vadd.f32 %v971_v48, %v963_v42 }
 0x96a   : > { %v973_v50 = vmul.f32 0.7978846, %v972_v49 }
 0x96c   : > { %1402 = vtanh.f32 %v973_v50 }
 0x976   : > { %v1403_v51 = vpop.eup %1402 }
 0x977   : > { %v975_v53 = vadd.f32 1.0, %v1403_v51 }
 0x979   : > { %v976_v1 = vmul.f32 %v975_v53, %v968_v52 }
 0x97b   : > { %v977_v54 = vpack.c.bf16 %v976_v1, %v976_v1 }
 0x97d   : > { %1329 = vmatmul.mubr.bf16.vlgmr.msra.gmra.mrb[8].mxu0 %v977_v54 }
 0xa50   : > { %v1083_v56 = vpop.f32.mrb[8].mxu0 }
 0xa51   : > { %v1084_v57 = vadd.f32 %v1218_v55, %v1083_v56  ;;  %v1330_v58 = vpop.f32.mrb[9].mxu0 }
 0xa52   : > { %v1086_v59 = vpop.f32.mrb[10].mxu0 }
 0xa53   : > { %v1331_v60 = vpop.f32.mrb[11].mxu0  ;;  %v1089_v61 = vadd.f32 %v1084_v57, %v900_v31 }
 0xa55   : > { %v1092_v62 = vsel %vm491_vm1, %v1089_v61, 0.0 }
 0xa56   : > { %1093 = vadd.xlane.f32.xlu1 %v1092_v62 }
 0xae3   : > { %v1094_v63 = vpop.xlane.xlu1 %1093 }
 0xae4   : > { %v1095_v0 = vmul.f32 0.03125, %v1094_v63 }
 0xae6   : > { %v1096_v2 = vsub.f32 %v1089_v61, %v1095_v0 }
 0xae8   : > { %v1097_v4 = vmul.f32 %v1096_v2, %v1096_v2 }
 0xaea   : > { %v1098_v5 = vsel %vm491_vm1, %v1097_v4, 0.0 }
 0xaeb   : > { %1099 = vadd.xlane.f32.xlu1 %v1098_v5 }
 0xb78   : > { %v1100_v6 = vpop.xlane.xlu1 %1099 }
 0xb79   : > { %v1101_v7 = vmul.f32 0.03125, %v1100_v6 }
 0xb7b   : > { %v1102_v8 = vadd.f32 1e-12, %v1101_v7 }
 0xb7d   : > { %1404 = vrsqrt.f32 %v1102_v8 }
 0xb87   : > { %v1405_v9 = vpop.eup %1404 }
 0xb88   : > { %v1104_v11 = vmul.f32 %v1405_v9, %v1096_v2 }
 0xb8a   : > { %v1111_v13 = vmul.f32 %v1227_v10, %v1104_v11 }
 0xb8c   : > { %v1118_v14 = vadd.f32 %v1228_v12, %v1111_v13 }
 0xb8e   : > { %1119 = vst.msk [vmem:[%s458_s25] sm:$0xff] %vm491_vm1, %v1118_v14 }
 0xb8f   : > { %1419 = shalt.err (!%p1416_p3)
}
 0xb90   : > { %s1420_s2 = scalar_lea.hbm %s1749_s4, 128  ;;  %s1424_s20 = scalar_lea.hbm %s1806_s14, 256 }
 0xb91   : > { %p1421_p4 = scmp.ne.s32.totalorder %s1749_s4, %s1420_s2  ;;  %p1425_p9 = scmp.lt.u32.totalorder %s1749_s4, %s1806_s14 }
 0xb92   : > { %p1426_p10 = scmp.lt.u32.totalorder %s1424_s20, %s1420_s2  ;;  %p1428_p12 = scmp.lt.u32.totalorder %s1420_s2, %s1749_s4 }
 0xb93   : > { %p1422_p7 = pnand %p1421_p4, %p1591_p5 }
 0xb94   : > { %p1427_p11 = por %p1426_p10, %p1425_p9 }
 0xb95   : > { %p1423_p8 = pneg %p1422_p7 }
 0xb96   : > { %p1429_p13 = por %p1428_p12, %p1427_p11 }
 0xb98   : > { %p1430_p0 = pnand %p1429_p13, %p1423_p8 }
 0xb9a   : > { %1433 = shalt.err (!%p1430_p0)
}
 0xb9b   : > { %1332 = dma.vmem_to_hbm [thread:$0]  (%p1591_p5), %s1751_s1, 128, %s1749_s4, %s1121_s28  }
 0xb9c PF: > { %p1338_p1 = scmp.ge.s32.totalorder %s1468_s16, 2  ;;  %s1146_s0 = sand.u32 1, %s1456_s29  }
 0xb9d   : > { %s1147_s17 = scalar_lea.sflag [#allocation3], %s1146_s0 }
 0xb9e   : > { %p1335_p2 = pnand %p1338_p1, %p1595_p6 }
 0xba0   : > { %1451 = dma.done.wait (!%p1335_p2), %s1147_s17, 128  }
 0xba1   : > { %1453 = vsyncadd (!%p1335_p2), %s1147_s17, 4294967168  ;;  %p24_p3 = scmp.ge.s32.totalorder %s1578_s19, 4   ;;  %s1819_s29 = smov %s1460_s30 }
 0xba2   : > { %s1820_s30 = smov %s1464_s15  ;;  %s1821_s15 = smov %s1589_s22 }
 0xba3   : > { %s1822_s16 = smov %s1578_s19  ;;  %26 = sbr.rel (!%p24_p3) target bundleno = 9 (0x9), region = 111 }
 0xbaa   :  { %1152 = vsyncpa [#allocation3], 1 }
 0xbab   :  { %1154 = vsyncpa [#allocation3 + $0x1], 1 }

// kernel: tpu_custom_call.1
= control target key start
LH: loop header
LB: loop body
LE: loop exit
PB: predicated region body
PF: predicated region fallthrough
CT: control target
= control target key end

     0   :  { %s1789_s0 = inlined_call_operand.vmem [shape: f32[2,8,32], index: 0, kind: input, shape index: {}]   ;;  %s1790_s1 = inlined_call_operand.vmem [shape: bf16[8,8], index: 1, kind: input, shape index: {}]   ;;  %s1791_s2 = inlined_call_operand.vmem [shape: bf16[32,96], index: 2, kind: input, shape index: {}]   ;;  %s1792_s3 = inlined_call_operand.vmem [shape: f32[1,96], index: 3, kind: input, shape index: {}]   ;;  %s1793_s4 = inlined_call_operand.vmem [shape: bf16[32,32], index: 4, kind: input, shape index: {}]   ;;  %s1794_s5 = inlined_call_operand.vmem [shape: f32[1,32], index: 5, kind: input, shape index: {}]   ;;  %s1795_s6 = inlined_call_operand.vmem [shape: f32[1,32], index: 6, kind: input, shape index: {}]   ;;  %s1796_s7 = inlined_call_operand.vmem [shape: f32[1,32], index: 7, kind: input, shape index: {}]   ;;  %s1797_s8 = inlined_call_operand.vmem [shape: bf16[32,128], index: 8, kind: input, shape index: {}]   ;;  %s1798_s9 = inlined_call_operand.vmem [shape: f32[1,128], index: 9, kind: input, shape index: {}]   ;;  %s1799_s10 = inlined_call_operand.vmem [shape: bf16[128,32], index: 10, kind: input, shape index: {}]   ;;  %s1800_s11 = inlined_call_operand.vmem [shape: f32[1,32], index: 11, kind: input, shape index: {}]   ;;  %s1801_s12 = inlined_call_operand.vmem [shape: f32[1,32], index: 12, kind: input, shape index: {}]   ;;  %s1802_s13 = inlined_call_operand.vmem [shape: f32[1,32], index: 13, kind: input, shape index: {}]   ;;  %s1803_s14 = inlined_call_operand.hbm [shape: f32[2,8,32], index: 14, kind: output, shape index: {}]  }
   0x1   :  { %1804 = sst [smem:[#allocation5_spill]] %s1789_s0 }
   0x2   :  { %1805 = sst [smem:[#allocation6_spill]] %s1790_s1 }
   0x3   :  { %1806 = sst [smem:[#allocation7_spill]] %s1791_s2 }
   0x4   :  { %1807 = sst [smem:[#allocation8_spill]] %s1792_s3 }
   0x5   :  { %1808 = sst [smem:[#allocation9_spill]] %s1793_s4 }
   0x6   :  { %19 = vsyncpa [#allocation3], 0 }
   0x7   :  { %21 = vsyncpa [#allocation3 + $0x1], 0  ;;  %s1550_s29 = smov 0   ;;  %s1552_s30 = smov 0  }
   0x8   :  { %s1554_s15 = smov 0   ;;  %s1556_s16 = smov 0  }
   0x9 LB: > { %s1571_s17 = sadd.s32 4294967295, %s1465_s16   ;;  %s1190_s18 = sadd.s32 4294967294, %s1465_s16   ;;  %s1465_s16 = sphi %s1556_s16, %s1819_s16   ;;  %s1461_s15 = sphi %s1554_s15, %s1818_s15   ;;  %s1457_s30 = sphi %s1552_s30, %s1817_s30   ;;  %s1453_s29 = sphi %s1550_s29, %s1816_s29  }
   0xa   : > { %s1575_s19 = sadd.s32 1, %s1465_s16   ;;  %s333_s20 = sadd.s32 1, %s1461_s15 }
   0xb   : > { %s330_s21 = ssub.s32 %s1465_s16, %s1575_s19  ;;  %p343_p0 = scmp.ne.s32.totalorder %s1461_s15, %s1457_s30 }
   0xc   : > { %p331_p1 = scmp.eq.s32.totalorder %s330_s21, 0  ;;  %p344_p2 = scmp.eq.s32.totalorder %s1571_s17, 1 }
   0xd   : > { %p349_p3 = scmp.ne.s32.totalorder %s1457_s30, %s1453_s29  ;;  %p350_p4 = scmp.eq.s32.totalorder %s1190_s18, 1 }
   0xe   : > { %s1586_s22 = scalar_select %p331_p1, %s1461_s15, %s333_s20  }
   0xf   : > { %p1588_p5 = por %p344_p2, %p343_p0  ;;  %p1592_p6 = por %p350_p4, %p349_p3 }
  0x10   : > { %p1193_p7 = scmp.ge.s32.totalorder %s1465_s16, 1  ;;  %p414_p8 = scmp.lt.s32.totalorder %s1465_s16, 3 }
  0x12   : > { %p415_p9 = pnand %p1193_p7, %p414_p8 }
  0x13   : > { %s1811_s2 = sld [smem:[#allocation7_spill]] (!%p415_p9)  ;;  %v1467_v1 = vmov (!%p415_p9), 0.0   ;;  %vm1468_vm0 = vmmov (!%p415_p9), 0   ;;  %p459_p10 = scmp.lt.s32.totalorder (!%p415_p9), %s1571_s17, 1  ;;  %vm491_vm1 = vcmask (!%p415_p9), 261120   ;;  %vm539_vm2 = vcmask (!%p415_p9), 130048  }
  0x14   : > { %418 = sbr.rel (%p415_p9) target bundleno = 2964 (0xb94), region = 76  ;;  %1257 = vmatprep.subr.bf16.mxu1 (!%p415_p9), %v1467_v1  ;;  %1283 = vmatprep.subr.bf16.mxu0 (!%p415_p9), %v1467_v1  ;;  %s1812_s0 = sld [smem:[#allocation5_spill]] (!%p415_p9)  ;;  %vm604_vm3 = vcmask (!%p415_p9), 1043456   ;;  %vm586_vm4 = vcmask (!%p415_p9), 64512  }
  0x15   : > { %1261 = vmatprep.mubr.msk.bf16.mxu1 (!%p415_p9), %vm1468_vm0, %v1467_v1  ;;  %1285 = vmatprep.mubr.msk.bf16.mxu0 (!%p415_p9), %vm1468_vm0, %v1467_v1  ;;  %s1813_s3 = sld [smem:[#allocation8_spill]] (!%p415_p9)  ;;  %s1814_s1 = sld [smem:[#allocation6_spill]] (!%p415_p9) }
  0x16   : > { %s1472_s27 = smov (!%p415_p9), 112   ;;  %s1473_s28 = smov (!%p415_p9), 48  }
  0x17   : > { %s1815_s4 = sld [smem:[#allocation9_spill]] (!%p415_p9)  ;;  %s456_s21 = sand.u32 (!%p415_p9), 1, %s1457_s30  }
  0x18   : > { %s1194_s25 = sshll.u32 (!%p415_p9), %s456_s21, 3 }
  0x19   : > { %v1375_v0 = vld [vmem:[%s1811_s2] sm:$0xff] (!%p415_p9)   ;;  %v1376_v2 = vld [vmem:[%s1811_s2 + $0x8] sm:$0xff] (!%p415_p9)  }
  0x1a   : > { %1258 = vmatpush3.bf16.msra.mxu1 (!%p415_p9), %v1375_v0 }
  0x1b   : > { %1259 = vmatprep.subr.bf16.mxu1 %v1467_v1  ;;  %s460_s18 = scalar_select %p459_p10, %s1571_s17, 1  ;;  %v1196_v5 = vld [vmem:[%s1813_s3] ss:$0 sm:$0xff] }
  0x1c   : > { %v466_v16 = vld [vmem:[%s1814_s1] sm:$0xf] }
  0x1d   : > { %s1195_s20 = sshll.u32 %s460_s18, 3  ;;  %s1469_s18 = smov 64   ;;  %v467_v17 = vunpack.c.l.bf16 %v466_v16  ;;  %v1378_v51 = vld [vmem:[%s1815_s4 + $0x8] sm:$0xff]   ;;  %v1377_v57 = vld [vmem:[%s1815_s4] sm:$0xff]  }
  0x1e   : > { %1260 = vmatpush3.bf16.msra.mxu1 %v1376_v2  ;;  %s462_s26 = scalar_lea.vmem %s1812_s0, %s1195_s20  ;;  %s1470_s20 = smov 96  }
  0x1f   : > { %1265 = vmatprep.subr.bf16.mxu1 %v1467_v1  ;;  %v1617_v3 = vld [vmem:[%s462_s26] sm:$0xff]  ;;  %s1471_s26 = smov 80   ;;  %s458_s0 = scalar_lea.vmem [#allocation2], %s1194_s25 }
  0x20   : > { %v465_v4 = vpack.c.bf16 %v1617_v3, %v1617_v3  ;;  %s1131_s1 = sshll.u32 %s458_s0, 4  ;;  %s1748_s1 = int_to_ptr.vmem [resolvable:$true] %s1131_s1 }
  0x22   : > { %1262 = vmatmul.mubr.msk.bf16.vlgmr.msra.gmra.mrb[0].mxu1 %vm491_vm1, %v465_v4 }
  0x23   : > { %1267 = vmatprep.mubr.msk.bf16.mxu1 %vm1468_vm0, %v1467_v1 }
  0xf5   : > { %v529_v6 = vpop.f32.mrb[0].mxu1 }
  0xf6   : > { %v530_v7 = vadd.f32 %v1196_v5, %v529_v6  ;;  %v1263_v8 = vpop.f32.mrb[1].mxu1 }
  0xf7   : > { %v532_v9 = vpop.f32.mrb[2].mxu1  ;;  %v1208_v8 = vld [vmem:[%s1794_s5] ss:$0 sm:$0xff] }
  0xf8   : > { %v1627_v10 = vpack.c.bf16 %v530_v7, %v530_v7  ;;  %v1264_v11 = vpop.f32.mrb[3].mxu1 }
  0xfa   : > { %599 = vrot.lane.b32.xlu1 %v1627_v10, %s1469_s18  ;;  %537 = vrot.lane.b32.xlu0 %v1627_v10, %s1470_s20  ;;  %s1227_s20 = sshll.u32 %s1571_s17, 7  ;;  %s1474_s17 = smov [#allocation2]  }
  0xfb   : > { %s1746_s4 = scalar_lea.hbm %s1803_s14, %s1227_s20  ;;  %s1407_s25 = sshll.u32 %s1474_s17, 4  ;;  %s1408_s25 = int_to_ptr.vmem [resolvable:$false] %s1407_s25 }
  0xfc   : > { %p1410_p0 = scmp.lt.s32.totalorder %s1748_s1, %s1408_s25 }
 0x16c   : > { %v538_v12 = vpop.permute.xlu0 %537  ;;  %v600_v14 = vpop.permute.xlu1 %599 }
 0x16d   : > { %v544_v13 = vsel %vm539_vm2, %v538_v12, 0  ;;  %v606_v15 = vsel %vm604_vm3, %v600_v14, 0 }
 0x16e   : > { %1266 = vmatpush3.bf16.xpose.msra.mxu1 %v544_v13 }
 0x16f   : > { %1271 = vmatprep.subr.bf16.mxu1 %v1467_v1 }
 0x175   : > { %1268 = vmatmul.mubr.msk.bf16.vlgmr.msra.gmra.mrb[4].mxu1 %vm539_vm2, %v1627_v10 }
 0x176   : > { %1272 = vmatpush3.bf16.msra.mxu1 %v606_v15  ;;  %1273 = vmatprep.mubr.msk.bf16.mxu1 %vm1468_vm0, %v1467_v1 }
 0x177   : > { %1277 = vmatprep.subr.bf16.mxu1 %v1467_v1 }
 0x248   : > { %v580_v18 = vpop.f32.mrb[4].mxu1 }
 0x249   : > { %v581_v19 = vadd.f32 %v580_v18, %v467_v17  ;;  %v1269_v20 = vpop.f32.mrb[5].mxu1 }
 0x24a   : > { %v583_v21 = vpop.f32.mrb[6].mxu1 }
 0x24b   : > { %v1270_v22 = vpop.f32.mrb[7].mxu1  ;;  %v587_v23 = vsel %vm586_vm4, %v581_v19, -inf  ;;  %v1379_v21 = vld [vmem:[%s1797_s8] sm:$0xff]  }
 0x24c   : > { %588 = vmax.xlane.f32.xlu0 %v587_v23  ;;  %v1380_v22 = vld [vmem:[%s1797_s8 + $0x8] sm:$0xff]  }
 0x24d   : > { %v1382_v23 = vld [vmem:[%s1799_s10 + $0x8] sm:$0xff]  }
 0x2d9   : > { %v589_v24 = vpop.xlane.xlu0 %588 }
 0x2da   : > { %v590_v25 = vsub.f32 %v581_v19, %v589_v24  ;;  %v1383_v24 = vld [vmem:[%s1799_s10 + $0x10] sm:$0xff]  }
 0x2dc   : > { %v591_v26 = vmul.f32 1.442695, %v590_v25 }
 0x2de   : > { %1389 = vpow2.f32 %v591_v26 }
 0x2e8   : > { %v1390_v27 = vpop.eup %1389 }
 0x2e9   : > { %v593_v28 = vsel %vm586_vm4, %v1390_v27, 0.0 }
 0x2ea   : > { %594 = vadd.xlane.f32.xlu1 %v593_v28 }
 0x2fb   : > { %653 = vrot.lane.b32.xlu1 %v1627_v10, %s1471_s26  ;;  %s1118_s26 = scalar_lea.sflag [#allocation3], %s456_s21 }
 0x2ff   : > { %651 = vrot.lane.b32.xlu1 %v1627_v10, %s1472_s27  ;;  %s1403_s27 = scalar_lea.vmem %s1748_s1, 128 }
 0x300   : > { %p1404_p11 = scmp.ne.s32.totalorder %s1748_s1, %s1403_s27 }
 0x302   : > { %p1405_p12 = pnand %p1404_p11, %p1588_p5 }
 0x304   : > { %p1406_p13 = pneg %p1405_p12 }
 0x377   : > { %v595_v29 = vpop.xlane.xlu1 %594 }
 0x378   : > { %1391 = vrcp.f32 %v595_v29  ;;  %v1209_v29 = vld [vmem:[%s1795_s6] ss:$0 sm:$0xff] }
 0x37b   : > { %v654_v32 = vpop.permute.xlu1 %653 }
 0x37c   : > { %v659_v34 = vsel %vm539_vm2, %v654_v32, 0 }
 0x37f   : > { %v652_v35 = vpop.permute.xlu1 %651 }
 0x382   : > { %v1392_v30 = vpop.eup %1391 }
 0x383   : > { %v597_v31 = vmul.f32 %v1392_v30, %v1390_v27 }
 0x385   : > { %v598_v33 = vpack.c.bf16 %v597_v31, %v597_v31  ;;  %v1210_v31 = vld [vmem:[%s1796_s7] ss:$0 sm:$0xff] }
 0x387   : > { %1274 = vmatmul.mubr.msk.bf16.vlgmr.msra.gmra.mrb[8].mxu1 %vm586_vm4, %v598_v33 }
 0x388   : > { %1278 = vmatpush3.bf16.xpose.msra.mxu1 %v659_v34  ;;  %1279 = vmatprep.mubr.msk.bf16.mxu1 %vm1468_vm0, %v1467_v1 }
 0x389   : > { %1289 = vmatprep.subr.bf16.mxu1 %v1467_v1 }
 0x38f   : > { %1280 = vmatmul.mubr.msk.bf16.vlgmr.msra.gmra.mrb[12].mxu1 %vm539_vm2, %v652_v35  ;;  %v1384_v35 = vld [vmem:[%s1799_s10 + $0x18] sm:$0xff]  }
 0x390   : > { %1291 = vmatprep.mubr.msk.bf16.mxu1 %vm1468_vm0, %v1467_v1  ;;  %1290 = vmatpush3.bf16.msra.mxu1 %v1378_v51  ;;  %v1215_v51 = vld [vmem:[%s1800_s11] ss:$0 sm:$0xff] }
 0x391   : > { %1301 = vmatprep.subr.bf16.mxu1 %v1467_v1 }
 0x45a   : > { %v642_v36 = vpop.f32.mrb[8].mxu1 }
 0x45b   : > { %v1275_v37 = vpop.f32.mrb[9].mxu1  ;;  %v648_v59 = vpack.c.bf16 %v642_v36, %v642_v36  ;;  %v1385_v36 = vld [vmem:[%s1799_s10 + $0x20] sm:$0xff]  }
 0x45c   : > { %v645_v38 = vpop.f32.mrb[10].mxu1  ;;  %v1386_v37 = vld [vmem:[%s1799_s10 + $0x28] sm:$0xff]  }
 0x45d   : > { %v1276_v39 = vpop.f32.mrb[11].mxu1  ;;  %v1387_v38 = vld [vmem:[%s1799_s10 + $0x30] sm:$0xff]  }
 0x45e   : > { %v1388_v39 = vld [vmem:[%s1799_s10 + $0x38] sm:$0xff]  }
 0x462   : > { %v695_v40 = vpop.f32.mrb[12].mxu1 }
 0x463   : > { %v696_v41 = vadd.f32 %v695_v40, %v467_v17  ;;  %v1281_v42 = vpop.f32.mrb[13].mxu1  ;;  %v1211_v40 = vld [vmem:[%s1798_s9] ss:$0 sm:$0xff] }
 0x464   : > { %v698_v43 = vpop.f32.mrb[14].mxu1 }
 0x465   : > { %v1282_v44 = vpop.f32.mrb[15].mxu1  ;;  %v701_v45 = vsel %vm586_vm4, %v696_v41, -inf }
 0x466   : > { %702 = vmax.xlane.f32.xlu1 %v701_v45 }
 0x4f3   : > { %v703_v46 = vpop.xlane.xlu1 %702 }
 0x4f4   : > { %v704_v47 = vsub.f32 %v696_v41, %v703_v46 }
 0x4f6   : > { %v705_v48 = vmul.f32 1.442695, %v704_v47 }
 0x4f8   : > { %1393 = vpow2.f32 %v705_v48 }
 0x502   : > { %v1394_v49 = vpop.eup %1393 }
 0x503   : > { %v707_v50 = vsel %vm586_vm4, %v1394_v49, 0.0 }
 0x504   : > { %708 = vadd.xlane.f32.xlu0 %v707_v50 }
 0x51a   : > { %713 = vrot.lane.b32.xlu0 %v1627_v10, %s1473_s28  ;;  %s1409_s28 = scalar_lea.vmem %s1408_s25, 256 }
 0x51b   : > { %p1411_p1 = scmp.lt.s32.totalorder %s1409_s28, %s1403_s27 }
 0x51d   : > { %p1412_p2 = por %p1411_p1, %p1410_p0 }
 0x51f   : > { %p1413_p3 = pnand %p1412_p2, %p1406_p13 }
 0x591   : > { %v709_v52 = vpop.xlane.xlu0 %708 }
 0x592   : > { %1395 = vrcp.f32 %v709_v52 }
 0x595   : > { %v714_v53 = vpop.permute.xlu0 %713 }
 0x596   : > { %v719_v54 = vsel %vm604_vm3, %v714_v53, 0 }
 0x597   : > { %1284 = vmatpush3.bf16.msra.mxu0 %v719_v54 }
 0x598   : > { %1295 = vmatprep.subr.bf16.mxu0 %v1467_v1 }
 0x59c   : > { %v1396_v55 = vpop.eup %1395 }
 0x59d   : > { %v711_v56 = vmul.f32 %v1396_v55, %v1394_v49 }
 0x59f   : > { %v712_v58 = vpack.c.bf16 %v711_v56, %v711_v56 }
 0x5a1   : > { %1286 = vmatmul.mubr.msk.bf16.vlgmr.msra.gmra.mrb[0].mxu0 %vm586_vm4, %v712_v58 }
 0x5a2   : > { %1296 = vmatpush3.bf16.msra.mxu0 %v1377_v57  ;;  %1297 = vmatprep.mubr.msk.bf16.mxu0 %vm1468_vm0, %v1467_v1 }
 0x5a3   : > { %1309 = vmatprep.subr.bf16.mxu0 %v1467_v1 }
 0x5a9   : > { %1298 = vmatmul.mubr.msk.bf16.vlgmr.msra.gmra.mrb[4].mxu0 %vm539_vm2, %v648_v59 }
 0x5aa   : > { %1325 = vmatprep.mubr.msk.bf16.mxu0 %vm1468_vm0, %v1467_v1 }
 0x674   : > { %v755_v60 = vpop.f32.mrb[0].mxu0 }
 0x675   : > { %v761_v61 = vpack.c.bf16 %v755_v60, %v755_v60  ;;  %v1287_v62 = vpop.f32.mrb[1].mxu0 }
 0x676   : > { %v758_v63 = vpop.f32.mrb[2].mxu0 }
 0x677   : > { %v1288_v0 = vpop.f32.mrb[3].mxu0  ;;  %1292 = vmatmul.mubr.msk.bf16.vlgmr.msra.gmra.mrb[16].mxu1 %vm539_vm2, %v761_v61 }
 0x678   : > { %1305 = vmatprep.mubr.msk.bf16.mxu1 %vm1468_vm0, %v1467_v1  ;;  %1302 = vmatpush3.bf16.msra.mxu1 %v1379_v21 }
 0x679   : > { %1303 = vmatprep.subr.bf16.mxu1 %v1467_v1 }
 0x67c   : > { %v856_v2 = vpop.f32.mrb[4].mxu0  ;;  %1304 = vmatpush3.bf16.msra.mxu1 %v1380_v22 }
 0x67d   : > { %v1299_v4 = vpop.f32.mrb[5].mxu0 }
 0x67e   : > { %v859_v5 = vpop.f32.mrb[6].mxu0 }
 0x67f   : > { %v1300_v6 = vpop.f32.mrb[7].mxu0 }
 0x680   : > { %v1224_v6 = vld [vmem:[%s1801_s12] ss:$0 sm:$0xff] }
 0x74a   : > { %v807_v7 = vpop.f32.mrb[16].mxu1 }
 0x74b   : > { %v857_v9 = vadd.f32 %v856_v2, %v807_v7  ;;  %v1293_v10 = vpop.f32.mrb[17].mxu1 }
 0x74c   : > { %v810_v11 = vpop.f32.mrb[18].mxu1 }
 0x74d   : > { %v869_v12 = vadd.f32 %v1208_v8, %v857_v9  ;;  %v1294_v13 = vpop.f32.mrb[19].mxu1  ;;  %v1225_v8 = vld [vmem:[%s1802_s13] ss:$0 sm:$0xff] }
 0x74f   : > { %v870_v14 = vadd.f32 %v869_v12, %v1617_v3  ;;  %v1381_v3 = vld [vmem:[%s1799_s10] sm:$0xff]  }
 0x750   : > { %1310 = vmatpush3.bf16.msra.mxu0 %v1381_v3 }
 0x751   : > { %v873_v15 = vsel %vm491_vm1, %v870_v14, 0.0  ;;  %1311 = vmatprep.subr.bf16.mxu0 %v1467_v1 }
 0x752   : > { %874 = vadd.xlane.f32.xlu0 %v873_v15 }
 0x754   : > { %1312 = vmatpush3.bf16.msra.mxu0 %v1382_v23 }
 0x755   : > { %1313 = vmatprep.subr.bf16.mxu0 %v1467_v1 }
 0x758   : > { %1314 = vmatpush3.bf16.msra.mxu0 %v1383_v24 }
 0x759   : > { %1315 = vmatprep.subr.bf16.mxu0 %v1467_v1 }
 0x75c   : > { %1316 = vmatpush3.bf16.msra.mxu0 %v1384_v35 }
 0x75d   : > { %1317 = vmatprep.subr.bf16.mxu0 %v1467_v1 }
 0x760   : > { %1318 = vmatpush3.bf16.msra.mxu0 %v1385_v36 }
 0x761   : > { %1319 = vmatprep.subr.bf16.mxu0 %v1467_v1 }
 0x764   : > { %1320 = vmatpush3.bf16.msra.mxu0 %v1386_v37 }
 0x765   : > { %1321 = vmatprep.subr.bf16.mxu0 %v1467_v1 }
 0x768   : > { %1322 = vmatpush3.bf16.msra.mxu0 %v1387_v38 }
 0x769   : > { %1323 = vmatprep.subr.bf16.mxu0 %v1467_v1 }
 0x76c   : > { %1324 = vmatpush3.bf16.msra.mxu0 %v1388_v39 }
 0x7df   : > { %v875_v16 = vpop.xlane.xlu0 %874 }
 0x7e0   : > { %v877_v17 = vmul.f32 0.03125, %v875_v16 }
 0x7e2   : > { %v878_v18 = vsub.f32 %v870_v14, %v877_v17 }
 0x7e4   : > { %v879_v19 = vmul.f32 %v878_v18, %v878_v18 }
 0x7e6   : > { %v880_v20 = vsel %vm491_vm1, %v879_v19, 0.0 }
 0x7e7   : > { %881 = vadd.xlane.f32.xlu1 %v880_v20 }
 0x874   : > { %v882_v25 = vpop.xlane.xlu1 %881 }
 0x875   : > { %v883_v26 = vmul.f32 0.03125, %v882_v25 }
 0x877   : > { %v884_v27 = vadd.f32 1e-12, %v883_v26 }
 0x879   : > { %1397 = vrsqrt.f32 %v884_v27 }
 0x883   : > { %v1398_v28 = vpop.eup %1397 }
 0x884   : > { %v886_v30 = vmul.f32 %v1398_v28, %v878_v18 }
 0x886   : > { %v893_v32 = vmul.f32 %v1209_v29, %v886_v30 }
 0x888   : > { %v900_v33 = vadd.f32 %v1210_v31, %v893_v32 }
 0x88a   : > { %v901_v34 = vpack.c.bf16 %v900_v33, %v900_v33 }
 0x88c   : > { %1306 = vmatmul.mubr.msk.bf16.vlgmr.msra.gmra.mrb[20].mxu1 %vm491_vm1, %v901_v34 }
 0x95f   : > { %v962_v41 = vpop.f32.mrb[20].mxu1 }
 0x960   : > { %v963_v42 = vadd.f32 %v1211_v40, %v962_v41  ;;  %v1307_v43 = vpop.f32.mrb[21].mxu1 }
 0x961   : > { %v965_v44 = vpop.f32.mrb[22].mxu1 }
 0x962   : > { %v970_v45 = vmul.f32 0.70710677, %v963_v42  ;;  %v1308_v46 = vpop.f32.mrb[23].mxu1  ;;  %v968_v48 = vmul.f32 0.5, %v963_v42 }
 0x964   : > { %1399 = verf.f32 %v970_v45 }
 0x96e   : > { %v1400_v47 = vpop.eup %1399 }
 0x96f   : > { %v972_v49 = vadd.f32 1.0, %v1400_v47 }
 0x971   : > { %v973_v1 = vmul.f32 %v972_v49, %v968_v48 }
 0x973   : > { %v974_v50 = vpack.c.bf16 %v973_v1, %v973_v1 }
 0x975   : > { %1326 = vmatmul.mubr.bf16.vlgmr.msra.gmra.mrb[8].mxu0 %v974_v50 }
 0xa48   : > { %v1080_v52 = vpop.f32.mrb[8].mxu0 }
 0xa49   : > { %v1081_v53 = vadd.f32 %v1215_v51, %v1080_v52  ;;  %v1327_v54 = vpop.f32.mrb[9].mxu0 }
 0xa4a   : > { %v1083_v55 = vpop.f32.mrb[10].mxu0 }
 0xa4b   : > { %v1328_v56 = vpop.f32.mrb[11].mxu0  ;;  %v1086_v57 = vadd.f32 %v1081_v53, %v900_v33 }
 0xa4d   : > { %v1089_v58 = vsel %vm491_vm1, %v1086_v57, 0.0 }
 0xa4e   : > { %1090 = vadd.xlane.f32.xlu1 %v1089_v58 }
 0xadb   : > { %v1091_v59 = vpop.xlane.xlu1 %1090 }
 0xadc   : > { %v1092_v60 = vmul.f32 0.03125, %v1091_v59 }
 0xade   : > { %v1093_v61 = vsub.f32 %v1086_v57, %v1092_v60 }
 0xae0   : > { %v1094_v62 = vmul.f32 %v1093_v61, %v1093_v61 }
 0xae2   : > { %v1095_v63 = vsel %vm491_vm1, %v1094_v62, 0.0 }
 0xae3   : > { %1096 = vadd.xlane.f32.xlu1 %v1095_v63 }
 0xb70   : > { %v1097_v0 = vpop.xlane.xlu1 %1096 }
 0xb71   : > { %v1098_v2 = vmul.f32 0.03125, %v1097_v0 }
 0xb73   : > { %v1099_v4 = vadd.f32 1e-12, %v1098_v2 }
 0xb75   : > { %1401 = vrsqrt.f32 %v1099_v4 }
 0xb7f   : > { %v1402_v5 = vpop.eup %1401 }
 0xb80   : > { %v1101_v7 = vmul.f32 %v1402_v5, %v1093_v61 }
 0xb82   : > { %v1108_v9 = vmul.f32 %v1224_v6, %v1101_v7 }
 0xb84   : > { %v1115_v10 = vadd.f32 %v1225_v8, %v1108_v9 }
 0xb86   : > { %1116 = vst.msk [vmem:[%s458_s0] sm:$0xff] %vm491_vm1, %v1115_v10 }
 0xb87   : > { %1416 = shalt.err (!%p1413_p3)
}
 0xb88   : > { %s1417_s2 = scalar_lea.hbm %s1746_s4, 128  ;;  %s1421_s18 = scalar_lea.hbm %s1803_s14, 256 }
 0xb89   : > { %p1418_p4 = scmp.ne.s32.totalorder %s1746_s4, %s1417_s2  ;;  %p1422_p9 = scmp.lt.u32.totalorder %s1746_s4, %s1803_s14 }
 0xb8a   : > { %p1423_p10 = scmp.lt.u32.totalorder %s1421_s18, %s1417_s2  ;;  %p1425_p12 = scmp.lt.u32.totalorder %s1417_s2, %s1746_s4 }
 0xb8b   : > { %p1419_p7 = pnand %p1418_p4, %p1588_p5 }
 0xb8c   : > { %p1424_p11 = por %p1423_p10, %p1422_p9 }
 0xb8d   : > { %p1420_p8 = pneg %p1419_p7 }
 0xb8e   : > { %p1426_p13 = por %p1425_p12, %p1424_p11 }
 0xb90   : > { %p1427_p0 = pnand %p1426_p13, %p1420_p8 }
 0xb92   : > { %1430 = shalt.err (!%p1427_p0)
}
 0xb93   : > { %1329 = dma.vmem_to_hbm [thread:$0]  (%p1588_p5), %s1748_s1, 128, %s1746_s4, %s1118_s26  }
 0xb94 PF: > { %p1335_p1 = scmp.ge.s32.totalorder %s1465_s16, 2  ;;  %s1143_s27 = sand.u32 1, %s1453_s29  }
 0xb95   : > { %s1144_s17 = scalar_lea.sflag [#allocation3], %s1143_s27 }
 0xb96   : > { %p1332_p2 = pnand %p1335_p1, %p1592_p6 }
 0xb98   : > { %1448 = dma.done.wait (!%p1332_p2), %s1144_s17, 128  }
 0xb99   : > { %1450 = vsyncadd (!%p1332_p2), %s1144_s17, 4294967168  ;;  %p24_p3 = scmp.ge.s32.totalorder %s1575_s19, 4   ;;  %s1816_s29 = smov %s1457_s30 }
 0xb9a   : > { %s1817_s30 = smov %s1461_s15  ;;  %s1818_s15 = smov %s1586_s22 }
 0xb9b   : > { %s1819_s16 = smov %s1575_s19  ;;  %26 = sbr.rel (!%p24_p3) target bundleno = 9 (0x9), region = 111 }
 0xba2   :  { %1149 = vsyncpa [#allocation3], 1 }
 0xba3   :  { %1151 = vsyncpa [#allocation3 + $0x1], 1 }

// kernel: tpu_custom_call.1
= control target key start
LH: loop header
LB: loop body
LE: loop exit
PB: predicated region body
PF: predicated region fallthrough
CT: control target
= control target key end

     0   :  { %s1792_s0 = inlined_call_operand.vmem [shape: f32[2,8,32], index: 0, kind: input, shape index: {}]   ;;  %s1793_s1 = inlined_call_operand.vmem [shape: bf16[8,8], index: 1, kind: input, shape index: {}]   ;;  %s1794_s2 = inlined_call_operand.vmem [shape: bf16[32,96], index: 2, kind: input, shape index: {}]   ;;  %s1795_s3 = inlined_call_operand.vmem [shape: f32[1,96], index: 3, kind: input, shape index: {}]   ;;  %s1796_s4 = inlined_call_operand.vmem [shape: bf16[32,32], index: 4, kind: input, shape index: {}]   ;;  %s1797_s5 = inlined_call_operand.vmem [shape: f32[1,32], index: 5, kind: input, shape index: {}]   ;;  %s1798_s6 = inlined_call_operand.vmem [shape: f32[1,32], index: 6, kind: input, shape index: {}]   ;;  %s1799_s7 = inlined_call_operand.vmem [shape: f32[1,32], index: 7, kind: input, shape index: {}]   ;;  %s1800_s8 = inlined_call_operand.vmem [shape: bf16[32,128], index: 8, kind: input, shape index: {}]   ;;  %s1801_s9 = inlined_call_operand.vmem [shape: f32[1,128], index: 9, kind: input, shape index: {}]   ;;  %s1802_s10 = inlined_call_operand.vmem [shape: bf16[128,32], index: 10, kind: input, shape index: {}]   ;;  %s1803_s11 = inlined_call_operand.vmem [shape: f32[1,32], index: 11, kind: input, shape index: {}]   ;;  %s1804_s12 = inlined_call_operand.vmem [shape: f32[1,32], index: 12, kind: input, shape index: {}]   ;;  %s1805_s13 = inlined_call_operand.vmem [shape: f32[1,32], index: 13, kind: input, shape index: {}]   ;;  %s1806_s14 = inlined_call_operand.hbm [shape: f32[2,8,32], index: 14, kind: output, shape index: {}]  }
   0x1   :  { %1807 = sst [smem:[#allocation5_spill]] %s1792_s0 }
   0x2   :  { %1808 = sst [smem:[#allocation6_spill]] %s1793_s1 }
   0x3   :  { %1809 = sst [smem:[#allocation7_spill]] %s1794_s2 }
   0x4   :  { %1810 = sst [smem:[#allocation8_spill]] %s1795_s3 }
   0x5   :  { %1811 = sst [smem:[#allocation9_spill]] %s1796_s4 }
   0x6   :  { %19 = vsyncpa [#allocation3], 0 }
   0x7   :  { %21 = vsyncpa [#allocation3 + $0x1], 0  ;;  %s1553_s29 = smov 0   ;;  %s1555_s30 = smov 0  }
   0x8   :  { %s1557_s15 = smov 0   ;;  %s1559_s16 = smov 0  }
   0x9 LB: > { %s1574_s17 = sadd.s32 4294967295, %s1468_s16   ;;  %s1193_s18 = sadd.s32 4294967294, %s1468_s16   ;;  %s1468_s16 = sphi %s1559_s16, %s1822_s16   ;;  %s1464_s15 = sphi %s1557_s15, %s1821_s15   ;;  %s1460_s30 = sphi %s1555_s30, %s1820_s30   ;;  %s1456_s29 = sphi %s1553_s29, %s1819_s29  }
   0xa   : > { %s1578_s19 = sadd.s32 1, %s1468_s16   ;;  %s333_s20 = sadd.s32 1, %s1464_s15 }
   0xb   : > { %s330_s21 = ssub.s32 %s1468_s16, %s1578_s19  ;;  %p343_p0 = scmp.ne.s32.totalorder %s1464_s15, %s1460_s30 }
   0xc   : > { %p331_p1 = scmp.eq.s32.totalorder %s330_s21, 0  ;;  %p344_p2 = scmp.eq.s32.totalorder %s1574_s17, 1 }
   0xd   : > { %p349_p3 = scmp.ne.s32.totalorder %s1460_s30, %s1456_s29  ;;  %p350_p4 = scmp.eq.s32.totalorder %s1193_s18, 1 }
   0xe   : > { %s1589_s22 = scalar_select %p331_p1, %s1464_s15, %s333_s20  }
   0xf   : > { %p1591_p5 = por %p344_p2, %p343_p0  ;;  %p1595_p6 = por %p350_p4, %p349_p3 }
  0x10   : > { %p1196_p7 = scmp.ge.s32.totalorder %s1468_s16, 1  ;;  %p414_p8 = scmp.lt.s32.totalorder %s1468_s16, 3 }
  0x12   : > { %p415_p9 = pnand %p1196_p7, %p414_p8 }
  0x13   : > { %s1814_s2 = sld [smem:[#allocation7_spill]] (!%p415_p9)  ;;  %v1470_v1 = vmov (!%p415_p9), 0.0   ;;  %vm1471_vm0 = vmmov (!%p415_p9), 0   ;;  %p459_p10 = scmp.lt.s32.totalorder (!%p415_p9), %s1574_s17, 1  ;;  %vm491_vm1 = vcmask (!%p415_p9), 261120   ;;  %vm539_vm2 = vcmask (!%p415_p9), 130048  }
  0x14   : > { %418 = sbr.rel (%p415_p9) target bundleno = 2972 (0xb9c), region = 76  ;;  %1260 = vmatprep.subr.bf16.mxu1 (!%p415_p9), %v1470_v1  ;;  %1286 = vmatprep.subr.bf16.mxu0 (!%p415_p9), %v1470_v1  ;;  %s1815_s0 = sld [smem:[#allocation5_spill]] (!%p415_p9)  ;;  %vm604_vm3 = vcmask (!%p415_p9), 1043456   ;;  %vm586_vm4 = vcmask (!%p415_p9), 64512  }
  0x15   : > { %1264 = vmatprep.mubr.msk.bf16.mxu1 (!%p415_p9), %vm1471_vm0, %v1470_v1  ;;  %1288 = vmatprep.mubr.msk.bf16.mxu0 (!%p415_p9), %vm1471_vm0, %v1470_v1  ;;  %s1816_s3 = sld [smem:[#allocation8_spill]] (!%p415_p9)  ;;  %s1817_s1 = sld [smem:[#allocation6_spill]] (!%p415_p9) }
  0x16   : > { %s1475_s27 = smov (!%p415_p9), 112   ;;  %s1476_s28 = smov (!%p415_p9), 48  }
  0x17   : > { %s1818_s4 = sld [smem:[#allocation9_spill]] (!%p415_p9)  ;;  %s1230_s21 = sshll.u32 (!%p415_p9), %s1574_s17, 7 }
  0x19   : > { %v1378_v0 = vld [vmem:[%s1814_s2] sm:$0xff] (!%p415_p9)   ;;  %v1379_v2 = vld [vmem:[%s1814_s2 + $0x8] sm:$0xff] (!%p415_p9)  }
  0x1a   : > { %1261 = vmatpush3.bf16.msra.mxu1 (!%p415_p9), %v1378_v0 }
  0x1b   : > { %1262 = vmatprep.subr.bf16.mxu1 %v1470_v1  ;;  %s460_s18 = scalar_select %p459_p10, %s1574_s17, 1  ;;  %v1199_v5 = vld [vmem:[%s1816_s3] ss:$0 sm:$0xff] }
  0x1c   : > { %v466_v16 = vld [vmem:[%s1817_s1] sm:$0xf]  ;;  %s1477_s17 = smov [#allocation2]  }
  0x1d   : > { %s1198_s20 = sshll.u32 %s460_s18, 3  ;;  %s1472_s18 = smov 64   ;;  %v467_v17 = vunpack.c.l.bf16 %v466_v16  ;;  %v1381_v51 = vld [vmem:[%s1818_s4 + $0x8] sm:$0xff]   ;;  %v1380_v57 = vld [vmem:[%s1818_s4] sm:$0xff]  }
  0x1e   : > { %1263 = vmatpush3.bf16.msra.mxu1 %v1379_v2  ;;  %s462_s26 = scalar_lea.vmem %s1815_s0, %s1198_s20  ;;  %s1473_s20 = smov 96  }
  0x1f   : > { %1268 = vmatprep.subr.bf16.mxu1 %v1470_v1  ;;  %v1620_v3 = vld [vmem:[%s462_s26] sm:$0xff]  ;;  %s1474_s26 = smov 80   ;;  %s1749_s4 = scalar_lea.hbm %s1806_s14, %s1230_s21 }
  0x20   : > { %v465_v4 = vpack.c.bf16 %v1620_v3, %v1620_v3 }
  0x22   : > { %1265 = vmatmul.mubr.msk.bf16.vlgmr.msra.gmra.mrb[0].mxu1 %vm491_vm1, %v465_v4 }
  0x23   : > { %1270 = vmatprep.mubr.msk.bf16.mxu1 %vm1471_vm0, %v1470_v1 }
  0xf5   : > { %v529_v6 = vpop.f32.mrb[0].mxu1 }
  0xf6   : > { %v530_v7 = vadd.f32 %v1199_v5, %v529_v6  ;;  %v1266_v8 = vpop.f32.mrb[1].mxu1 }
  0xf7   : > { %v532_v9 = vpop.f32.mrb[2].mxu1  ;;  %v1211_v8 = vld [vmem:[%s1797_s5] ss:$0 sm:$0xff] }
  0xf8   : > { %v1630_v10 = vpack.c.bf16 %v530_v7, %v530_v7  ;;  %v1267_v11 = vpop.f32.mrb[3].mxu1 }
  0xfa   : > { %599 = vrot.lane.b32.xlu1 %v1630_v10, %s1472_s18  ;;  %537 = vrot.lane.b32.xlu0 %v1630_v10, %s1473_s20 }
 0x16c   : > { %v538_v12 = vpop.permute.xlu0 %537  ;;  %v600_v14 = vpop.permute.xlu1 %599 }
 0x16d   : > { %v544_v13 = vsel %vm539_vm2, %v538_v12, 0  ;;  %v606_v15 = vsel %vm604_vm3, %v600_v14, 0 }
 0x16e   : > { %1269 = vmatpush3.bf16.xpose.msra.mxu1 %v544_v13 }
 0x16f   : > { %1274 = vmatprep.subr.bf16.mxu1 %v1470_v1 }
 0x175   : > { %1271 = vmatmul.mubr.msk.bf16.vlgmr.msra.gmra.mrb[4].mxu1 %vm539_vm2, %v1630_v10 }
 0x176   : > { %1275 = vmatpush3.bf16.msra.mxu1 %v606_v15  ;;  %1276 = vmatprep.mubr.msk.bf16.mxu1 %vm1471_vm0, %v1470_v1 }
 0x177   : > { %1280 = vmatprep.subr.bf16.mxu1 %v1470_v1 }
 0x248   : > { %v580_v18 = vpop.f32.mrb[4].mxu1 }
 0x249   : > { %v581_v19 = vadd.f32 %v580_v18, %v467_v17  ;;  %v1272_v20 = vpop.f32.mrb[5].mxu1 }
 0x24a   : > { %v583_v21 = vpop.f32.mrb[6].mxu1 }
 0x24b   : > { %v1273_v22 = vpop.f32.mrb[7].mxu1  ;;  %v587_v23 = vsel %vm586_vm4, %v581_v19, -inf  ;;  %v1382_v21 = vld [vmem:[%s1800_s8] sm:$0xff]  }
 0x24c   : > { %588 = vmax.xlane.f32.xlu0 %v587_v23  ;;  %v1383_v22 = vld [vmem:[%s1800_s8 + $0x8] sm:$0xff]  }
 0x2d9   : > { %v589_v24 = vpop.xlane.xlu0 %588 }
 0x2da   : > { %v590_v25 = vsub.f32 %v581_v19, %v589_v24 }
 0x2dc   : > { %v591_v26 = vmul.f32 1.442695, %v590_v25 }
 0x2de   : > { %1392 = vpow2.f32 %v591_v26 }
 0x2e8   : > { %v1393_v27 = vpop.eup %1392 }
 0x2e9   : > { %v593_v28 = vsel %vm586_vm4, %v1393_v27, 0.0 }
 0x2ea   : > { %594 = vadd.xlane.f32.xlu1 %v593_v28 }
 0x2fb   : > { %653 = vrot.lane.b32.xlu1 %v1630_v10, %s1474_s26  ;;  %s456_s26 = sand.u32 1, %s1460_s30  }
 0x2ff   : > { %651 = vrot.lane.b32.xlu1 %v1630_v10, %s1475_s27  ;;  %s1197_s27 = sshll.u32 %s456_s26, 3 }
 0x300   : > { %s458_s25 = scalar_lea.vmem [#allocation2], %s1197_s27  ;;  %s1410_s27 = sshll.u32 %s1477_s17, 4  ;;  %s1411_s27 = int_to_ptr.vmem [resolvable:$false] %s1410_s27 }
 0x301   : > { %s1134_s1 = sshll.u32 %s458_s25, 4  ;;  %s1412_s18 = scalar_lea.vmem %s1411_s27, 256  ;;  %s1751_s1 = int_to_ptr.vmem [resolvable:$true] %s1134_s1 }
 0x302   : > { %s1406_s0 = scalar_lea.vmem %s1751_s1, 128  ;;  %p1413_p0 = scmp.lt.s32.totalorder %s1751_s1, %s1411_s27 }
 0x303   : > { %p1407_p11 = scmp.ne.s32.totalorder %s1751_s1, %s1406_s0  ;;  %p1414_p1 = scmp.lt.s32.totalorder %s1412_s18, %s1406_s0 }
 0x305   : > { %p1408_p12 = pnand %p1407_p11, %p1591_p5  ;;  %p1415_p2 = por %p1414_p1, %p1413_p0 }
 0x307   : > { %p1409_p13 = pneg %p1408_p12 }
 0x309   : > { %p1416_p3 = pnand %p1415_p2, %p1409_p13 }
 0x377   : > { %v595_v29 = vpop.xlane.xlu1 %594 }
 0x378   : > { %1394 = vrcp.f32 %v595_v29  ;;  %v1213_v29 = vld [vmem:[%s1799_s7] ss:$0 sm:$0xff] }
 0x37b   : > { %v654_v32 = vpop.permute.xlu1 %653 }
 0x37c   : > { %v659_v34 = vsel %vm539_vm2, %v654_v32, 0 }
 0x37f   : > { %v652_v35 = vpop.permute.xlu1 %651 }
 0x382   : > { %v1395_v30 = vpop.eup %1394 }
 0x383   : > { %v597_v31 = vmul.f32 %v1395_v30, %v1393_v27  ;;  %v1212_v27 = vld [vmem:[%s1798_s6] ss:$0 sm:$0xff] }
 0x385   : > { %v598_v33 = vpack.c.bf16 %v597_v31, %v597_v31 }
 0x387   : > { %1277 = vmatmul.mubr.msk.bf16.vlgmr.msra.gmra.mrb[8].mxu1 %vm586_vm4, %v598_v33  ;;  %v1385_v33 = vld [vmem:[%s1802_s10 + $0x8] sm:$0xff]  }
 0x388   : > { %1281 = vmatpush3.bf16.xpose.msra.mxu1 %v659_v34  ;;  %1282 = vmatprep.mubr.msk.bf16.mxu1 %vm1471_vm0, %v1470_v1  ;;  %v1386_v34 = vld [vmem:[%s1802_s10 + $0x10] sm:$0xff]  }
 0x389   : > { %1292 = vmatprep.subr.bf16.mxu1 %v1470_v1 }
 0x38f   : > { %1283 = vmatmul.mubr.msk.bf16.vlgmr.msra.gmra.mrb[12].mxu1 %vm539_vm2, %v652_v35  ;;  %v1387_v35 = vld [vmem:[%s1802_s10 + $0x18] sm:$0xff]  }
 0x390   : > { %1294 = vmatprep.mubr.msk.bf16.mxu1 %vm1471_vm0, %v1470_v1  ;;  %1293 = vmatpush3.bf16.msra.mxu1 %v1381_v51 }
 0x391   : > { %1304 = vmatprep.subr.bf16.mxu1 %v1470_v1 }
 0x45a   : > { %v642_v36 = vpop.f32.mrb[8].mxu1 }
 0x45b   : > { %v1278_v37 = vpop.f32.mrb[9].mxu1  ;;  %v648_v59 = vpack.c.bf16 %v642_v36, %v642_v36  ;;  %v1388_v36 = vld [vmem:[%s1802_s10 + $0x20] sm:$0xff]  }
 0x45c   : > { %v645_v38 = vpop.f32.mrb[10].mxu1  ;;  %v1389_v37 = vld [vmem:[%s1802_s10 + $0x28] sm:$0xff]  }
 0x45d   : > { %v1279_v39 = vpop.f32.mrb[11].mxu1  ;;  %v1390_v38 = vld [vmem:[%s1802_s10 + $0x30] sm:$0xff]  }
 0x45e   : > { %v1391_v39 = vld [vmem:[%s1802_s10 + $0x38] sm:$0xff]  }
 0x462   : > { %v695_v40 = vpop.f32.mrb[12].mxu1 }
 0x463   : > { %v696_v41 = vadd.f32 %v695_v40, %v467_v17  ;;  %v1284_v42 = vpop.f32.mrb[13].mxu1  ;;  %v1214_v40 = vld [vmem:[%s1801_s9] ss:$0 sm:$0xff] }
 0x464   : > { %v698_v43 = vpop.f32.mrb[14].mxu1 }
 0x465   : > { %v1285_v44 = vpop.f32.mrb[15].mxu1  ;;  %v701_v45 = vsel %vm586_vm4, %v696_v41, -inf }
 0x466   : > { %702 = vmax.xlane.f32.xlu1 %v701_v45 }
 0x4f3   : > { %v703_v46 = vpop.xlane.xlu1 %702 }
 0x4f4   : > { %v704_v47 = vsub.f32 %v696_v41, %v703_v46 }
 0x4f6   : > { %v705_v48 = vmul.f32 1.442695, %v704_v47 }
 0x4f8   : > { %1396 = vpow2.f32 %v705_v48 }
 0x502   : > { %v1397_v49 = vpop.eup %1396 }
 0x503   : > { %v707_v50 = vsel %vm586_vm4, %v1397_v49, 0.0 }
 0x504   : > { %708 = vadd.xlane.f32.xlu0 %v707_v50 }
 0x51a   : > { %713 = vrot.lane.b32.xlu0 %v1630_v10, %s1476_s28  ;;  %s1121_s28 = scalar_lea.sflag [#allocation3], %s456_s26 }
 0x591   : > { %v709_v52 = vpop.xlane.xlu0 %708 }
 0x592   : > { %1398 = vrcp.f32 %v709_v52 }
 0x595   : > { %v714_v53 = vpop.permute.xlu0 %713 }
 0x596   : > { %v719_v54 = vsel %vm604_vm3, %v714_v53, 0 }
 0x597   : > { %1287 = vmatpush3.bf16.msra.mxu0 %v719_v54 }
 0x598   : > { %1298 = vmatprep.subr.bf16.mxu0 %v1470_v1 }
 0x59c   : > { %v1399_v55 = vpop.eup %1398 }
 0x59d   : > { %v711_v56 = vmul.f32 %v1399_v55, %v1397_v49  ;;  %v1218_v55 = vld [vmem:[%s1803_s11] ss:$0 sm:$0xff] }
 0x59f   : > { %v712_v58 = vpack.c.bf16 %v711_v56, %v711_v56 }
 0x5a1   : > { %1289 = vmatmul.mubr.msk.bf16.vlgmr.msra.gmra.mrb[0].mxu0 %vm586_vm4, %v712_v58 }
 0x5a2   : > { %1299 = vmatpush3.bf16.msra.mxu0 %v1380_v57  ;;  %1300 = vmatprep.mubr.msk.bf16.mxu0 %vm1471_vm0, %v1470_v1 }
 0x5a3   : > { %1312 = vmatprep.subr.bf16.mxu0 %v1470_v1 }
 0x5a9   : > { %1301 = vmatmul.mubr.msk.bf16.vlgmr.msra.gmra.mrb[4].mxu0 %vm539_vm2, %v648_v59 }
 0x5aa   : > { %1328 = vmatprep.mubr.msk.bf16.mxu0 %vm1471_vm0, %v1470_v1 }
 0x674   : > { %v755_v60 = vpop.f32.mrb[0].mxu0 }
 0x675   : > { %v761_v61 = vpack.c.bf16 %v755_v60, %v755_v60  ;;  %v1290_v62 = vpop.f32.mrb[1].mxu0 }
 0x676   : > { %v758_v63 = vpop.f32.mrb[2].mxu0 }
 0x677   : > { %v1291_v0 = vpop.f32.mrb[3].mxu0  ;;  %1295 = vmatmul.mubr.msk.bf16.vlgmr.msra.gmra.mrb[16].mxu1 %vm539_vm2, %v761_v61 }
 0x678   : > { %1308 = vmatprep.mubr.msk.bf16.mxu1 %vm1471_vm0, %v1470_v1  ;;  %1305 = vmatpush3.bf16.msra.mxu1 %v1382_v21 }
 0x679   : > { %1306 = vmatprep.subr.bf16.mxu1 %v1470_v1 }
 0x67c   : > { %v856_v2 = vpop.f32.mrb[4].mxu0  ;;  %1307 = vmatpush3.bf16.msra.mxu1 %v1383_v22 }
 0x67d   : > { %v1302_v4 = vpop.f32.mrb[5].mxu0 }
 0x67e   : > { %v859_v5 = vpop.f32.mrb[6].mxu0 }
 0x67f   : > { %v1303_v6 = vpop.f32.mrb[7].mxu0 }
 0x74a   : > { %v807_v7 = vpop.f32.mrb[16].mxu1 }
 0x74b   : > { %v857_v9 = vadd.f32 %v856_v2, %v807_v7  ;;  %v1296_v10 = vpop.f32.mrb[17].mxu1 }
 0x74c   : > { %v810_v11 = vpop.f32.mrb[18].mxu1  ;;  %v1227_v10 = vld [vmem:[%s1804_s12] ss:$0 sm:$0xff] }
 0x74d   : > { %v869_v12 = vadd.f32 %v1211_v8, %v857_v9  ;;  %v1297_v13 = vpop.f32.mrb[19].mxu1 }
 0x74f   : > { %v870_v14 = vadd.f32 %v869_v12, %v1620_v3  ;;  %v1384_v3 = vld [vmem:[%s1802_s10] sm:$0xff]  }
 0x750   : > { %1313 = vmatpush3.bf16.msra.mxu0 %v1384_v3  ;;  %v1228_v12 = vld [vmem:[%s1805_s13] ss:$0 sm:$0xff] }
 0x751   : > { %v873_v15 = vsel %vm491_vm1, %v870_v14, 0.0  ;;  %1314 = vmatprep.subr.bf16.mxu0 %v1470_v1 }
 0x752   : > { %874 = vadd.xlane.f32.xlu0 %v873_v15 }
 0x754   : > { %1315 = vmatpush3.bf16.msra.mxu0 %v1385_v33 }
 0x755   : > { %1316 = vmatprep.subr.bf16.mxu0 %v1470_v1 }
 0x758   : > { %1317 = vmatpush3.bf16.msra.mxu0 %v1386_v34 }
 0x759   : > { %1318 = vmatprep.subr.bf16.mxu0 %v1470_v1 }
 0x75c   : > { %1319 = vmatpush3.bf16.msra.mxu0 %v1387_v35 }
 0x75d   : > { %1320 = vmatprep.subr.bf16.mxu0 %v1470_v1 }
 0x760   : > { %1321 = vmatpush3.bf16.msra.mxu0 %v1388_v36 }
 0x761   : > { %1322 = vmatprep.subr.bf16.mxu0 %v1470_v1 }
 0x764   : > { %1323 = vmatpush3.bf16.msra.mxu0 %v1389_v37 }
 0x765   : > { %1324 = vmatprep.subr.bf16.mxu0 %v1470_v1 }
 0x768   : > { %1325 = vmatpush3.bf16.msra.mxu0 %v1390_v38 }
 0x769   : > { %1326 = vmatprep.subr.bf16.mxu0 %v1470_v1 }
 0x76c   : > { %1327 = vmatpush3.bf16.msra.mxu0 %v1391_v39 }
 0x7df   : > { %v875_v16 = vpop.xlane.xlu0 %874 }
 0x7e0   : > { %v877_v17 = vmul.f32 0.03125, %v875_v16 }
 0x7e2   : > { %v878_v18 = vsub.f32 %v870_v14, %v877_v17 }
 0x7e4   : > { %v879_v19 = vmul.f32 %v878_v18, %v878_v18 }
 0x7e6   : > { %v880_v20 = vsel %vm491_vm1, %v879_v19, 0.0 }
 0x7e7   : > { %881 = vadd.xlane.f32.xlu1 %v880_v20 }
 0x874   : > { %v882_v23 = vpop.xlane.xlu1 %881 }
 0x875   : > { %v883_v24 = vmul.f32 0.03125, %v882_v23 }
 0x877   : > { %v884_v25 = vadd.f32 1e-12, %v883_v24 }
 0x879   : > { %1400 = vrsqrt.f32 %v884_v25 }
 0x883   : > { %v1401_v26 = vpop.eup %1400 }
 0x884   : > { %v886_v28 = vmul.f32 %v1401_v26, %v878_v18 }
 0x886   : > { %v893_v30 = vmul.f32 %v1212_v27, %v886_v28 }
 0x888   : > { %v900_v31 = vadd.f32 %v1213_v29, %v893_v30 }
 0x88a   : > { %v901_v32 = vpack.c.bf16 %v900_v31, %v900_v31 }
 0x88c   : > { %1309 = vmatmul.mubr.msk.bf16.vlgmr.msra.gmra.mrb[20].mxu1 %vm491_vm1, %v901_v32 }
 0x95f   : > { %v962_v41 = vpop.f32.mrb[20].mxu1 }
 0x960   : > { %v963_v42 = vadd.f32 %v1214_v40, %v962_v41  ;;  %v1310_v43 = vpop.f32.mrb[21].mxu1 }
 0x961   : > { %v965_v44 = vpop.f32.mrb[22].mxu1 }
 0x962   : > { %v969_v45 = vmul.f32 0.044715, %v963_v42  ;;  %v1311_v46 = vpop.f32.mrb[23].mxu1  ;;  %v968_v52 = vmul.f32 0.5, %v963_v42 }
 0x964   : > { %v970_v47 = vmul.f32 %v969_v45, %v963_v42 }
 0x966   : > { %v971_v48 = vmul.f32 %v970_v47, %v963_v42 }
 0x968   : > { %v972_v49 = vadd.f32 %v971_v48, %v963_v42 }
 0x96a   : > { %v973_v50 = vmul.f32 0.7978846, %v972_v49 }
 0x96c   : > { %1402 = vtanh.f32 %v973_v50 }
 0x976   : > { %v1403_v51 = vpop.eup %1402 }
 0x977   : > { %v975_v53 = vadd.f32 1.0, %v1403_v51 }
 0x979   : > { %v976_v1 = vmul.f32 %v975_v53, %v968_v52 }
 0x97b   : > { %v977_v54 = vpack.c.bf16 %v976_v1, %v976_v1 }
 0x97d   : > { %1329 = vmatmul.mubr.bf16.vlgmr.msra.gmra.mrb[8].mxu0 %v977_v54 }
 0xa50   : > { %v1083_v56 = vpop.f32.mrb[8].mxu0 }
 0xa51   : > { %v1084_v57 = vadd.f32 %v1218_v55, %v1083_v56  ;;  %v1330_v58 = vpop.f32.mrb[9].mxu0 }
 0xa52   : > { %v1086_v59 = vpop.f32.mrb[10].mxu0 }
 0xa53   : > { %v1331_v60 = vpop.f32.mrb[11].mxu0  ;;  %v1089_v61 = vadd.f32 %v1084_v57, %v900_v31 }
 0xa55   : > { %v1092_v62 = vsel %vm491_vm1, %v1089_v61, 0.0 }
 0xa56   : > { %1093 = vadd.xlane.f32.xlu1 %v1092_v62 }
 0xae3   : > { %v1094_v63 = vpop.xlane.xlu1 %1093 }
 0xae4   : > { %v1095_v0 = vmul.f32 0.03125, %v1094_v63 }
 0xae6   : > { %v1096_v2 = vsub.f32 %v1089_v61, %v1095_v0 }
 0xae8   : > { %v1097_v4 = vmul.f32 %v1096_v2, %v1096_v2 }
 0xaea   : > { %v1098_v5 = vsel %vm491_vm1, %v1097_v4, 0.0 }
 0xaeb   : > { %1099 = vadd.xlane.f32.xlu1 %v1098_v5 }
 0xb78   : > { %v1100_v6 = vpop.xlane.xlu1 %1099 }
 0xb79   : > { %v1101_v7 = vmul.f32 0.03125, %v1100_v6 }
 0xb7b   : > { %v1102_v8 = vadd.f32 1e-12, %v1101_v7 }
 0xb7d   : > { %1404 = vrsqrt.f32 %v1102_v8 }
 0xb87   : > { %v1405_v9 = vpop.eup %1404 }
 0xb88   : > { %v1104_v11 = vmul.f32 %v1405_v9, %v1096_v2 }
 0xb8a   : > { %v1111_v13 = vmul.f32 %v1227_v10, %v1104_v11 }
 0xb8c   : > { %v1118_v14 = vadd.f32 %v1228_v12, %v1111_v13 }
 0xb8e   : > { %1119 = vst.msk [vmem:[%s458_s25] sm:$0xff] %vm491_vm1, %v1118_v14 }
 0xb8f   : > { %1419 = shalt.err (!%p1416_p3)
}
 0xb90   : > { %s1420_s2 = scalar_lea.hbm %s1749_s4, 128  ;;  %s1424_s20 = scalar_lea.hbm %s1806_s14, 256 }
 0xb91   : > { %p1421_p4 = scmp.ne.s32.totalorder %s1749_s4, %s1420_s2  ;;  %p1425_p9 = scmp.lt.u32.totalorder %s1749_s4, %s1806_s14 }
 0xb92   : > { %p1426_p10 = scmp.lt.u32.totalorder %s1424_s20, %s1420_s2  ;;  %p1428_p12 = scmp.lt.u32.totalorder %s1420_s2, %s1749_s4 }
 0xb93   : > { %p1422_p7 = pnand %p1421_p4, %p1591_p5 }
 0xb94   : > { %p1427_p11 = por %p1426_p10, %p1425_p9 }
 0xb95   : > { %p1423_p8 = pneg %p1422_p7 }
 0xb96   : > { %p1429_p13 = por %p1428_p12, %p1427_p11 }
 0xb98   : > { %p1430_p0 = pnand %p1429_p13, %p1423_p8 }
 0xb9a   : > { %1433 = shalt.err (!%p1430_p0)
}
 0xb9b   : > { %1332 = dma.vmem_to_hbm [thread:$0]  (%p1591_p5), %s1751_s1, 128, %s1749_s4, %s1121_s28  }
 0xb9c PF: > { %p1338_p1 = scmp.ge.s32.totalorder %s1468_s16, 2  ;;  %s1146_s0 = sand.u32 1, %s1456_s29  }
 0xb9d   : > { %s1147_s17 = scalar_lea.sflag [#allocation3], %s1146_s0 }
 0xb9e   : > { %p1335_p2 = pnand %p1338_p1, %p1595_p6 }
 0xba0   : > { %1451 = dma.done.wait (!%p1335_p2), %s1147_s17, 128  }
 0xba1   : > { %1453 = vsyncadd (!%p1335_p2), %s1147_s17, 4294967168  ;;  %p24_p3 = scmp.ge.s32.totalorder %s1578_s19, 4   ;;  %s1819_s29 = smov %s1460_s30 }
 0xba2   : > { %s1820_s30 = smov %s1464_s15  ;;  %s1821_s15 = smov %s1589_s22 }
 0xba3   : > { %s1822_s16 = smov %s1578_s19  ;;  %26 = sbr.rel (!%p24_p3) target bundleno = 9 (0x9), region = 111 }
 0xbaa   :  { %1152 = vsyncpa [#allocation3], 1 }
 0xbab   :  { %1154 = vsyncpa [#allocation3 + $0x1], 1 }

</bundles_post_ra>
